<compile_context>
chip_gen: v6e
topology: v6e:2x2x1
jax: 0.10.0
libtpu: 0.0.40
codegen_flags: <defaults>
</compile_context>

<pallas_src>
import functools

import jax
import jax.numpy as jnp
from jax.experimental import pallas as pl
from jax.experimental.pallas import tpu as pltpu


def _round_up(x, m):
    return (x + m - 1) // m * m


def _conv_bn_relu_kernel(x_ref, w_ref, shift_ref, o_ref, *, k, h_out, w_out):
    # x_ref:     (1, H_pad, W_pad, C_in)       bf16 zero-padded NHWC image
    # w_ref:     (K*K, C_in, C_out_pad)        bf16, BN scale already folded in
    # shift_ref: (1, C_out_pad)                f32  (beta - running_mean * scale)
    # o_ref:     (1, H_out*W_out, C_out_pad)   f32
    c_in = x_ref.shape[-1]
    cout_p = o_ref.shape[-1]

    acc = jnp.zeros((h_out * w_out, cout_p), jnp.float32)
    # K*K taps, each a (M, C_in) x (C_in, C_out_pad) MXU accumulation. The shifted
    # windows are assembled in VMEM only -- no inflated patch matrix ever hits HBM.
    for kh in range(k):
        for kw in range(k):
            patch = x_ref[0, kh:kh + h_out, kw:kw + w_out, :]   # (H_out, W_out, C_in)
            lhs = patch.reshape(h_out * w_out, c_in)            # free collapse (W_out % 8 == 0)
            acc = acc + jnp.dot(lhs, w_ref[kh * k + kw],
                                preferred_element_type=jnp.float32)

    y = acc + shift_ref[...]                 # f32 epilogue
    o_ref[0] = jnp.maximum(y, 0.0).astype(o_ref.dtype)


@functools.partial(jax.jit, static_argnames=("ksize", "padding", "eps"))
def basic_conv2d(x, weight, gamma, beta, running_mean, running_var,
                 *, ksize=3, padding=1, eps=1e-3):
    """x: (N, C_in, H, W) f32; weight: (C_out, C_in, K, K) f32. Returns (N, C_out, H, W) f32."""
    n, c_in, h, w = x.shape
    c_out = weight.shape[0]
    k = ksize
    h_pad, w_pad = h + 2 * padding, w + 2 * padding
    h_out = h_pad - k + 1
    w_out = w_pad - k + 1
    cout_p = _round_up(c_out, 128)            # lane-dense output stores

    # NCHW -> NHWC once, spatial zero-pad, bf16 for the MXU / HBM stream.
    xp = jnp.pad(x.transpose(0, 2, 3, 1),
                 ((0, 0), (padding, padding), (padding, padding), (0, 0)))
    xp = xp.astype(jnp.bfloat16)

    # Fold BN (inference form) into per-output-channel scale/shift; fold scale into the
    # weight (the conv has no bias), pad C_out up to the lane width.
    scale = gamma / jnp.sqrt(running_var + eps)                  # (C_out,)
    shift = beta - running_mean * scale                          # (C_out,)
    w_scaled = weight * scale[:, None, None, None]               # (C_out, C_in, K, K)
    w_taps = w_scaled.transpose(2, 3, 1, 0).reshape(k * k, c_in, c_out)   # [kh*k+kw, c, o]
    w_taps = jnp.pad(w_taps, ((0, 0), (0, 0), (0, cout_p - c_out))).astype(jnp.bfloat16)
    shift_p = jnp.pad(shift, (0, cout_p - c_out)).reshape(1, cout_p).astype(jnp.float32)

    kernel = functools.partial(_conv_bn_relu_kernel, k=k, h_out=h_out, w_out=w_out)

    out = pl.pallas_call(
        kernel,
        out_shape=jax.ShapeDtypeStruct((n, h_out * w_out, cout_p), jnp.float32),
        grid_spec=pltpu.PrefetchScalarGridSpec(
            num_scalar_prefetch=0,
            grid=(n,),  # one full feature map per step; for very large H*W, add an
                        # H_out row-tile axis with a K-1 halo instead.
            in_specs=[
                pl.BlockSpec((1, h_pad, w_pad, c_in), lambda i: (i, 0, 0, 0)),
                pl.BlockSpec((k * k, c_in, cout_p), lambda i: (0, 0, 0)),
                pl.BlockSpec((1, cout_p), lambda i: (0, 0)),
            ],
            out_specs=pl.BlockSpec((1, h_out * w_out, cout_p), lambda i: (i, 0, 0)),
        ),
        compiler_params=pltpu.CompilerParams(
            dimension_semantics=("parallel",),          # v7x: 2 TCs shard the batch loop
            vmem_limit_bytes=32 * 1024 * 1024,          # ample headroom on v5e/v6e/v7x
        ),
    )(xp, w_taps, shift_p)

    # Drop the lane padding and return NCHW (matching the PyTorch module).
    out = out[:, :, :c_out].reshape(n, h_out, w_out, c_out).transpose(0, 3, 1, 2)
    return out.astype(x.dtype)


def _reference(x, weight, gamma, beta, running_mean, running_var,
               *, padding=1, eps=1e-3, quantize_bf16=False):
    scale = gamma / jnp.sqrt(running_var + eps)
    shift = beta - running_mean * scale
    w_s = weight * scale[:, None, None, None]
    if quantize_bf16:
        # Same input/weight quantization as the kernel's MXU feed (f32 accumulation).
        x = x.astype(jnp.bfloat16).astype(jnp.float32)
        w_s = w_s.astype(jnp.bfloat16).astype(jnp.float32)
    y = jax.lax.conv_general_dilated(
        x, w_s, window_strides=(1, 1),
        padding=[(padding, padding), (padding, padding)],
        dimension_numbers=("NCHW", "OIHW", "NCHW"))
    y = y + shift[None, :, None, None]
    return jnp.maximum(y, 0.0)


if __name__ == "__main__":
    key = jax.random.PRNGKey(0)
    k1, k2, k3, k4, k5, k6 = jax.random.split(key, 6)

    N, C_IN, H, W = 2, 4, 16, 16
    C_OUT, K = 8, 3

    x = jax.random.normal(k1, (N, C_IN, H, W), dtype=jnp.float32)
    weight = jax.random.normal(k2, (C_OUT, C_IN, K, K), dtype=jnp.float32) * 0.1
    gamma = jax.random.normal(k3, (C_OUT,), dtype=jnp.float32) * 0.1 + 1.0
    beta = jax.random.normal(k4, (C_OUT,), dtype=jnp.float32) * 0.1
    running_mean = jax.random.normal(k5, (C_OUT,), dtype=jnp.float32) * 0.1
    running_var = jax.nn.softplus(jax.random.normal(k6, (C_OUT,), dtype=jnp.float32)) + 0.5

    out = basic_conv2d(x, weight, gamma, beta, running_mean, running_var,
                       ksize=K, padding=1)
    out = jax.block_until_ready(out)
    assert out.shape == (N, C_OUT, H, W)

    # 1) Exact check of the kernel logic (reference with the same bf16 input/weight
    #    quantization the kernel deliberately uses for the MXU).
    ref_q = _reference(x, weight, gamma, beta, running_mean, running_var,
                       padding=1, quantize_bf16=True)
    assert jnp.allclose(out, ref_q, atol=1e-4, rtol=1e-4)

    # 2) Sanity check against the full-f32 PyTorch-equivalent forward (difference is
    #    only the bf16 quantization of the MXU operands).
    ref_f32 = _reference(x, weight, gamma, beta, running_mean, running_var, padding=1)
    assert jnp.allclose(out, ref_f32, atol=5e-2, rtol=5e-2)

    print("KERNEL_OK")
</pallas_src>

<mosaic_0001>
module attributes {stable_mosaic.version = 11 : i64} {
  func.func @_conv_bn_relu_kernel(%arg0: i32, %arg1: memref<1x18x18x4xbf16, #tpu.memory_space<vmem>>, %arg2: memref<9x4x128xbf16, #tpu.memory_space<vmem>>, %arg3: memref<1x128xf32, #tpu.memory_space<vmem>>, %arg4: memref<1x256x128xf32, #tpu.memory_space<vmem>>) attributes {dimension_semantics = [#tpu.dimension_semantics<parallel>], iteration_bounds = array<i64: 2>, scalar_prefetch = 0 : i64, scratch_operands = 0 : i64, tpu.core_type = #tpu.core_type<tc>, window_params = [{transform_indices = @transform_0, window_bounds = array<i64: 1, 18, 18, 4>}, {pipeline_mode = #tpu.pipeline_mode<synchronous>, transform_indices = @transform_1, window_bounds = array<i64: 9, 4, 128>}, {pipeline_mode = #tpu.pipeline_mode<synchronous>, transform_indices = @transform_2, window_bounds = array<i64: 1, 128>}, {transform_indices = @transform_3, window_bounds = array<i64: 1, 256, 128>}]} {
    %cst = arith.constant 0.000000e+00 : f32
    %0 = vector.broadcast %cst : f32 to vector<256x128xf32>
    %c0 = arith.constant 0 : index
    %c0_0 = arith.constant 0 : index
    %c0_1 = arith.constant 0 : index
    %c0_2 = arith.constant 0 : index
    %1 = vector.load %arg1[%c0, %c0_0, %c0_1, %c0_2] : memref<1x18x18x4xbf16, #tpu.memory_space<vmem>>, vector<1x16x16x4xbf16>
    %2 = vector.shape_cast %1 : vector<1x16x16x4xbf16> to vector<16x16x4xbf16>
    %3 = vector.shape_cast %2 : vector<16x16x4xbf16> to vector<256x4xbf16>
    %c0_3 = arith.constant 0 : index
    %c0_4 = arith.constant 0 : index
    %c0_5 = arith.constant 0 : index
    %4 = vector.load %arg2[%c0_3, %c0_4, %c0_5] : memref<9x4x128xbf16, #tpu.memory_space<vmem>>, vector<1x4x128xbf16>
    %5 = vector.shape_cast %4 : vector<1x4x128xbf16> to vector<4x128xbf16>
    %cst_6 = arith.constant dense<0.000000e+00> : vector<256x128xf32>
    %6 = tpu.matmul %3, %5, %cst_6 {dimension_numbers = #tpu.dot_dimension_numbers<[1], [0], [0], [1], [0, 0, 1, 1], [], []>} : vector<256x4xbf16>, vector<4x128xbf16>, vector<256x128xf32> -> vector<256x128xf32>
    %7 = arith.addf %0, %6 : vector<256x128xf32>
    %c0_7 = arith.constant 0 : index
    %c0_8 = arith.constant 0 : index
    %c1 = arith.constant 1 : index
    %c0_9 = arith.constant 0 : index
    %8 = vector.load %arg1[%c0_7, %c0_8, %c1, %c0_9] : memref<1x18x18x4xbf16, #tpu.memory_space<vmem>>, vector<1x16x16x4xbf16>
    %9 = vector.shape_cast %8 : vector<1x16x16x4xbf16> to vector<16x16x4xbf16>
    %10 = vector.shape_cast %9 : vector<16x16x4xbf16> to vector<256x4xbf16>
    %c1_10 = arith.constant 1 : index
    %c0_11 = arith.constant 0 : index
    %c0_12 = arith.constant 0 : index
    %11 = vector.load %arg2[%c1_10, %c0_11, %c0_12] : memref<9x4x128xbf16, #tpu.memory_space<vmem>>, vector<1x4x128xbf16>
    %12 = vector.shape_cast %11 : vector<1x4x128xbf16> to vector<4x128xbf16>
    %cst_13 = arith.constant dense<0.000000e+00> : vector<256x128xf32>
    %13 = tpu.matmul %10, %12, %cst_13 {dimension_numbers = #tpu.dot_dimension_numbers<[1], [0], [0], [1], [0, 0, 1, 1], [], []>} : vector<256x4xbf16>, vector<4x128xbf16>, vector<256x128xf32> -> vector<256x128xf32>
    %14 = arith.addf %7, %13 : vector<256x128xf32>
    %c0_14 = arith.constant 0 : index
    %c0_15 = arith.constant 0 : index
    %c2 = arith.constant 2 : index
    %c0_16 = arith.constant 0 : index
    %15 = vector.load %arg1[%c0_14, %c0_15, %c2, %c0_16] : memref<1x18x18x4xbf16, #tpu.memory_space<vmem>>, vector<1x16x16x4xbf16>
    %16 = vector.shape_cast %15 : vector<1x16x16x4xbf16> to vector<16x16x4xbf16>
    %17 = vector.shape_cast %16 : vector<16x16x4xbf16> to vector<256x4xbf16>
    %c2_17 = arith.constant 2 : index
    %c0_18 = arith.constant 0 : index
    %c0_19 = arith.constant 0 : index
    %18 = vector.load %arg2[%c2_17, %c0_18, %c0_19] : memref<9x4x128xbf16, #tpu.memory_space<vmem>>, vector<1x4x128xbf16>
    %19 = vector.shape_cast %18 : vector<1x4x128xbf16> to vector<4x128xbf16>
    %cst_20 = arith.constant dense<0.000000e+00> : vector<256x128xf32>
    %20 = tpu.matmul %17, %19, %cst_20 {dimension_numbers = #tpu.dot_dimension_numbers<[1], [0], [0], [1], [0, 0, 1, 1], [], []>} : vector<256x4xbf16>, vector<4x128xbf16>, vector<256x128xf32> -> vector<256x128xf32>
    %21 = arith.addf %14, %20 : vector<256x128xf32>
    %c0_21 = arith.constant 0 : index
    %c1_22 = arith.constant 1 : index
    %c0_23 = arith.constant 0 : index
    %c0_24 = arith.constant 0 : index
    %22 = vector.load %arg1[%c0_21, %c1_22, %c0_23, %c0_24] : memref<1x18x18x4xbf16, #tpu.memory_space<vmem>>, vector<1x16x16x4xbf16>
    %23 = vector.shape_cast %22 : vector<1x16x16x4xbf16> to vector<16x16x4xbf16>
    %24 = vector.shape_cast %23 : vector<16x16x4xbf16> to vector<256x4xbf16>
    %c3 = arith.constant 3 : index
    %c0_25 = arith.constant 0 : index
    %c0_26 = arith.constant 0 : index
    %25 = vector.load %arg2[%c3, %c0_25, %c0_26] : memref<9x4x128xbf16, #tpu.memory_space<vmem>>, vector<1x4x128xbf16>
    %26 = vector.shape_cast %25 : vector<1x4x128xbf16> to vector<4x128xbf16>
    %cst_27 = arith.constant dense<0.000000e+00> : vector<256x128xf32>
    %27 = tpu.matmul %24, %26, %cst_27 {dimension_numbers = #tpu.dot_dimension_numbers<[1], [0], [0], [1], [0, 0, 1, 1], [], []>} : vector<256x4xbf16>, vector<4x128xbf16>, vector<256x128xf32> -> vector<256x128xf32>
    %28 = arith.addf %21, %27 : vector<256x128xf32>
    %c0_28 = arith.constant 0 : index
    %c1_29 = arith.constant 1 : index
    %c1_30 = arith.constant 1 : index
    %c0_31 = arith.constant 0 : index
    %29 = vector.load %arg1[%c0_28, %c1_29, %c1_30, %c0_31] : memref<1x18x18x4xbf16, #tpu.memory_space<vmem>>, vector<1x16x16x4xbf16>
    %30 = vector.shape_cast %29 : vector<1x16x16x4xbf16> to vector<16x16x4xbf16>
    %31 = vector.shape_cast %30 : vector<16x16x4xbf16> to vector<256x4xbf16>
    %c4 = arith.constant 4 : index
    %c0_32 = arith.constant 0 : index
    %c0_33 = arith.constant 0 : index
    %32 = vector.load %arg2[%c4, %c0_32, %c0_33] : memref<9x4x128xbf16, #tpu.memory_space<vmem>>, vector<1x4x128xbf16>
    %33 = vector.shape_cast %32 : vector<1x4x128xbf16> to vector<4x128xbf16>
    %cst_34 = arith.constant dense<0.000000e+00> : vector<256x128xf32>
    %34 = tpu.matmul %31, %33, %cst_34 {dimension_numbers = #tpu.dot_dimension_numbers<[1], [0], [0], [1], [0, 0, 1, 1], [], []>} : vector<256x4xbf16>, vector<4x128xbf16>, vector<256x128xf32> -> vector<256x128xf32>
    %35 = arith.addf %28, %34 : vector<256x128xf32>
    %c0_35 = arith.constant 0 : index
    %c1_36 = arith.constant 1 : index
    %c2_37 = arith.constant 2 : index
    %c0_38 = arith.constant 0 : index
    %36 = vector.load %arg1[%c0_35, %c1_36, %c2_37, %c0_38] : memref<1x18x18x4xbf16, #tpu.memory_space<vmem>>, vector<1x16x16x4xbf16>
    %37 = vector.shape_cast %36 : vector<1x16x16x4xbf16> to vector<16x16x4xbf16>
    %38 = vector.shape_cast %37 : vector<16x16x4xbf16> to vector<256x4xbf16>
    %c5 = arith.constant 5 : index
    %c0_39 = arith.constant 0 : index
    %c0_40 = arith.constant 0 : index
    %39 = vector.load %arg2[%c5, %c0_39, %c0_40] : memref<9x4x128xbf16, #tpu.memory_space<vmem>>, vector<1x4x128xbf16>
    %40 = vector.shape_cast %39 : vector<1x4x128xbf16> to vector<4x128xbf16>
    %cst_41 = arith.constant dense<0.000000e+00> : vector<256x128xf32>
    %41 = tpu.matmul %38, %40, %cst_41 {dimension_numbers = #tpu.dot_dimension_numbers<[1], [0], [0], [1], [0, 0, 1, 1], [], []>} : vector<256x4xbf16>, vector<4x128xbf16>, vector<256x128xf32> -> vector<256x128xf32>
    %42 = arith.addf %35, %41 : vector<256x128xf32>
    %c0_42 = arith.constant 0 : index
    %c2_43 = arith.constant 2 : index
    %c0_44 = arith.constant 0 : index
    %c0_45 = arith.constant 0 : index
    %43 = vector.load %arg1[%c0_42, %c2_43, %c0_44, %c0_45] : memref<1x18x18x4xbf16, #tpu.memory_space<vmem>>, vector<1x16x16x4xbf16>
    %44 = vector.shape_cast %43 : vector<1x16x16x4xbf16> to vector<16x16x4xbf16>
    %45 = vector.shape_cast %44 : vector<16x16x4xbf16> to vector<256x4xbf16>
    %c6 = arith.constant 6 : index
    %c0_46 = arith.constant 0 : index
    %c0_47 = arith.constant 0 : index
    %46 = vector.load %arg2[%c6, %c0_46, %c0_47] : memref<9x4x128xbf16, #tpu.memory_space<vmem>>, vector<1x4x128xbf16>
    %47 = vector.shape_cast %46 : vector<1x4x128xbf16> to vector<4x128xbf16>
    %cst_48 = arith.constant dense<0.000000e+00> : vector<256x128xf32>
    %48 = tpu.matmul %45, %47, %cst_48 {dimension_numbers = #tpu.dot_dimension_numbers<[1], [0], [0], [1], [0, 0, 1, 1], [], []>} : vector<256x4xbf16>, vector<4x128xbf16>, vector<256x128xf32> -> vector<256x128xf32>
    %49 = arith.addf %42, %48 : vector<256x128xf32>
    %c0_49 = arith.constant 0 : index
    %c2_50 = arith.constant 2 : index
    %c1_51 = arith.constant 1 : index
    %c0_52 = arith.constant 0 : index
    %50 = vector.load %arg1[%c0_49, %c2_50, %c1_51, %c0_52] : memref<1x18x18x4xbf16, #tpu.memory_space<vmem>>, vector<1x16x16x4xbf16>
    %51 = vector.shape_cast %50 : vector<1x16x16x4xbf16> to vector<16x16x4xbf16>
    %52 = vector.shape_cast %51 : vector<16x16x4xbf16> to vector<256x4xbf16>
    %c7 = arith.constant 7 : index
    %c0_53 = arith.constant 0 : index
    %c0_54 = arith.constant 0 : index
    %53 = vector.load %arg2[%c7, %c0_53, %c0_54] : memref<9x4x128xbf16, #tpu.memory_space<vmem>>, vector<1x4x128xbf16>
    %54 = vector.shape_cast %53 : vector<1x4x128xbf16> to vector<4x128xbf16>
    %cst_55 = arith.constant dense<0.000000e+00> : vector<256x128xf32>
    %55 = tpu.matmul %52, %54, %cst_55 {dimension_numbers = #tpu.dot_dimension_numbers<[1], [0], [0], [1], [0, 0, 1, 1], [], []>} : vector<256x4xbf16>, vector<4x128xbf16>, vector<256x128xf32> -> vector<256x128xf32>
    %56 = arith.addf %49, %55 : vector<256x128xf32>
    %c0_56 = arith.constant 0 : index
    %c2_57 = arith.constant 2 : index
    %c2_58 = arith.constant 2 : index
    %c0_59 = arith.constant 0 : index
    %57 = vector.load %arg1[%c0_56, %c2_57, %c2_58, %c0_59] : memref<1x18x18x4xbf16, #tpu.memory_space<vmem>>, vector<1x16x16x4xbf16>
    %58 = vector.shape_cast %57 : vector<1x16x16x4xbf16> to vector<16x16x4xbf16>
    %59 = vector.shape_cast %58 : vector<16x16x4xbf16> to vector<256x4xbf16>
    %c8 = arith.constant 8 : index
    %c0_60 = arith.constant 0 : index
    %c0_61 = arith.constant 0 : index
    %60 = vector.load %arg2[%c8, %c0_60, %c0_61] : memref<9x4x128xbf16, #tpu.memory_space<vmem>>, vector<1x4x128xbf16>
    %61 = vector.shape_cast %60 : vector<1x4x128xbf16> to vector<4x128xbf16>
    %cst_62 = arith.constant dense<0.000000e+00> : vector<256x128xf32>
    %62 = tpu.matmul %59, %61, %cst_62 {dimension_numbers = #tpu.dot_dimension_numbers<[1], [0], [0], [1], [0, 0, 1, 1], [], []>} : vector<256x4xbf16>, vector<4x128xbf16>, vector<256x128xf32> -> vector<256x128xf32>
    %63 = arith.addf %56, %62 : vector<256x128xf32>
    %c0_63 = arith.constant 0 : index
    %c0_64 = arith.constant 0 : index
    %64 = vector.load %arg3[%c0_63, %c0_64] : memref<1x128xf32, #tpu.memory_space<vmem>>, vector<1x128xf32>
    %65 = vector.broadcast %64 : vector<1x128xf32> to vector<256x128xf32>
    %66 = arith.addf %63, %65 : vector<256x128xf32>
    %cst_65 = arith.constant 0.000000e+00 : f32
    %67 = vector.broadcast %cst_65 : f32 to vector<256x128xf32>
    %68 = arith.maximumf %66, %67 : vector<256x128xf32>
    %c0_66 = arith.constant 0 : index
    %c0_67 = arith.constant 0 : index
    %c0_68 = arith.constant 0 : index
    %69 = vector.load %arg4[%c0_66, %c0_67, %c0_68] : memref<1x256x128xf32, #tpu.memory_space<vmem>>, vector<1x256x128xf32>
    %70 = vector.shape_cast %69 : vector<1x256x128xf32> to vector<256x128xf32>
    %71 = vector.shape_cast %68 : vector<256x128xf32> to vector<1x256x128xf32>
    tpu.vector_store %arg4[%c0_66, %c0_67, %c0_68], %71 {strides = array<i32>} : memref<1x256x128xf32, #tpu.memory_space<vmem>>, vector<1x256x128xf32>,
    return
  }
  func.func @transform_0(%arg0: i32) -> (i32, i32, i32, i32) {
    %c0_i32 = arith.constant 0 : i32
    %c0_i32_0 = arith.constant 0 : i32
    %c0_i32_1 = arith.constant 0 : i32
    %c0_i32_2 = arith.constant 0 : i32
    return %arg0, %c0_i32, %c0_i32_0, %c0_i32_1 : i32, i32, i32, i32
  }
  func.func @transform_1(%arg0: i32) -> (i32, i32, i32) {
    %c0_i32 = arith.constant 0 : i32
    %c0_i32_0 = arith.constant 0 : i32
    %c0_i32_1 = arith.constant 0 : i32
    %c0_i32_2 = arith.constant 0 : i32
    return %c0_i32, %c0_i32_0, %c0_i32_1 : i32, i32, i32
  }
  func.func @transform_2(%arg0: i32) -> (i32, i32) {
    %c0_i32 = arith.constant 0 : i32
    %c0_i32_0 = arith.constant 0 : i32
    %c0_i32_1 = arith.constant 0 : i32
    return %c0_i32, %c0_i32_0 : i32, i32
  }
  func.func @transform_3(%arg0: i32) -> (i32, i32, i32) {
    %c0_i32 = arith.constant 0 : i32
    %c0_i32_0 = arith.constant 0 : i32
    %c0_i32_1 = arith.constant 0 : i32
    return %arg0, %c0_i32, %c0_i32_0 : i32, i32, i32
  }
}

</mosaic_0001>

<bundles_post_ra>
// kernel: basic_conv2d.1
= control target key start
LH: loop header
LB: loop body
LE: loop exit
PB: predicated region body
PF: predicated region fallthrough
CT: control target
= control target key end

     0   :  { %s5995_s12 = smov 0   ;;  %s8640_s0 = inlined_call_operand.vmem [shape: bf16[2,18,18,4], index: 0, kind: input, shape index: {}]   ;;  %s8641_s1 = inlined_call_operand.vmem [shape: bf16[9,4,128], index: 1, kind: input, shape index: {}]   ;;  %s8642_s2 = inlined_call_operand.vmem [shape: f32[1,128], index: 2, kind: input, shape index: {}]   ;;  %s8643_s3 = inlined_call_operand.vmem [shape: f32[2,256,128], index: 3, kind: output, shape index: {}]  }
   0x1 LB: > { %s4889_s13 = sadd.s32 4294967295, %s5973_s12   ;;  %p4893_p0 = scmp.ge.s32.totalorder %s5973_s12, 1  ;;  %s5973_s12 = sphi %s5995_s12, %s13_s12  }
   0x2   : > { %p137_p1 = scmp.lt.s32.totalorder %s5973_s12, 3 }
   0x4   : > { %p138_p2 = pnand %p4893_p0, %p137_p1 }
   0x6   : > { %141 = sbr.rel (%p138_p2) target bundleno = 556 (0x22c), region = 32 }
   0xb   : > { %v4897_v0 = vld [vmem:[%s8641_s1 + $0x2] sm:$0x3]  ;;  %vm707_vm0 = vcmask 1041408   ;;  %p161_p3 = scmp.lt.s32.totalorder %s4889_s13, 1  ;;  %v204_v2 = vld [vmem:[%s8641_s1] sm:$0x3] }
   0xc   : > { %5899 = vmatprep.subr.msk.bf16.mxu1 %vm707_vm0, %v4897_v0  ;;  %5898 = vmatprep.subr.msk.bf16.mxu0 %vm707_vm0, %v4897_v0  ;;  %v709_v1 = vsel %vm707_vm0, %v4897_v0, 0  ;;  %v4978_v3 = vld [vmem:[%s8641_s1 + $0x4] sm:$0x3]  ;;  %vm221_vm1 = vsmask.f32 3328  ;;  %v6026_v4 = vsel %vm707_vm0, %v204_v2, 0 }
   0xd   : > { %5897 = vmatpush3.bf16.msra.mxu1 %v709_v1  ;;  %5591 = vmatpush3.bf16.msra.mxu0 %v709_v1  ;;  %s8919_s13 = smov (!%p161_p3, %s4889_s13), 1  ;;  %vm222_vm2 = vsmask.f32 7440  ;;  %vm658_vm3 = vcmask 31744   ;;  %v6052_v16 = vsel %vm707_vm0, %v4978_v3, 0  ;;  %vm1212_vm5 = vcmask 1042432  }
   0xe   : > { %5900 = vmatprep.subr.msk.bf16.mxu1 %vm707_vm0, %v204_v2  ;;  %5901 = vmatprep.subr.msk.bf16.mxu0 %vm707_vm0, %v4978_v3  ;;  %s5908_s20 = smul.u32 216, %s8919_s13  ;;  %vm6067_vm4 = vmor %vm221_vm1, %vm222_vm2  ;;  %vm1213_vm6 = vcmask 1046532   ;;  %s5436_s11 = sshll.u32 %s8919_s13, 8 }
   0xf   : > { %vm6353_vm7 = vmor %vm1212_vm5, %vm1213_vm6  ;;  %s8495_s15 = scalar_lea.vmem %s8643_s3, %s5436_s11 }
  0x10   : > { %s6023_s23 = scalar_lea.vmem %s8640_s0, %s5908_s20 }
  0x11   : > { %v6029_v5 = vld [vmem:[%s6023_s23] sm:$0xf]  ;;  %v6032_v6 = vld [vmem:[%s6023_s23 + $0x4] sm:$0xf]  ;;  %v6035_v7 = vld [vmem:[%s6023_s23 + $0x8] sm:$0x1] }
  0x12   : > { %v225_v8 = vshrl.u32 %v6029_v5, 16  ;;  %v228_v9 = vshll.u32 %v6029_v5, 16  ;;  %v234_v10 = vshll.u32 %v6032_v6, 16  ;;  %v238_v11 = vshrl.u32 %v6032_v6, 16  ;;  %v6042_v12 = vld [vmem:[%s6023_s23 + $0x60] sm:$0xf] }
  0x13   : > { %v244_v13 = vshll.u32 %v6035_v7, 16  ;;  %v6046_v14 = vld [vmem:[%s6023_s23 + $0x64] sm:$0xf]  ;;  %v6049_v15 = vld [vmem:[%s6023_s23 + $0x68] sm:$0x1]  ;;  %v417_v22 = vshrl.u32 %v6042_v12, 16 }
  0x14   : > { %v227_v17 = vrot.slane %v225_v8, 4  ;;  %v230_v18 = vrot.slane %v228_v9, 5  ;;  %v236_v19 = vrot.slane %v234_v10, 5  ;;  %v240_v20 = vrot.slane %v238_v11, 4  ;;  %v6060_v29 = vld [vmem:[%s6023_s23 + $0xc] sm:$0xf] }
  0x15   : > { %v246_v21 = vrot.slane %v244_v13, 5  ;;  %v420_v23 = vshll.u32 %v6042_v12, 16  ;;  %v426_v24 = vshll.u32 %v6046_v14, 16  ;;  %v430_v27 = vshrl.u32 %v6046_v14, 16  ;;  %v6063_v30 = vld [vmem:[%s6023_s23 + $0x10] sm:$0xf] }
  0x16   : > { %v231_v25 = vor.u32 %v230_v18, %v227_v17  ;;  %v241_v26 = vor.u32 %v240_v20, %v236_v19  ;;  %v436_v28 = vshll.u32 %v6049_v15, 16  ;;  %v419_v33 = vrot.slane %v417_v22, 4  ;;  %v6073_v41 = vld [vmem:[%s6023_s23 + $0x14] sm:$0x1]  ;;  %v6084_v53 = vld [vmem:[%s6023_s23 + $0x6c] sm:$0xf] }
  0x17   : > { %v422_v34 = vrot.slane %v420_v23, 5  ;;  %v428_v35 = vrot.slane %v426_v24, 5  ;;  %v432_v38 = vrot.slane %v430_v27, 4  ;;  %v249_v42 = vshrl.u32 %v6060_v29, 16  ;;  %v6088_v58 = vld [vmem:[%s6023_s23 + $0x70] sm:$0xf] }
  0x18   : > { %v232_v36 = vrot.slane %v231_v25, 4  ;;  %v242_v37 = vrot.slane %v241_v26, 4  ;;  %v438_v39 = vrot.slane %v436_v28, 5  ;;  %v252_v43 = vshll.u32 %v6060_v29, 16  ;;  %v6096_v63 = vld [vmem:[%s6023_s23 + $0x74] sm:$0x1] }
  0x19   : > { %v423_v40 = vor.u32 %v422_v34, %v419_v33  ;;  %v258_v44 = vshll.u32 %v6063_v30, 16  ;;  %v433_v47 = vor.u32 %v432_v38, %v428_v35  ;;  %v262_v48 = vshrl.u32 %v6063_v30, 16  ;;  %v6102_v8 = vld [vmem:[%s6023_s23 + $0x18] sm:$0xf]  ;;  %v6115_v25 = vld [vmem:[%s6023_s23 + $0x20] sm:$0x1] }
  0x1a   : > { %v237_v45 = vsel %vm6067_vm4, %v232_v36, %v236_v19  ;;  %v247_v46 = vsel %vm6067_vm4, %v242_v37, %v246_v21  ;;  %v251_v51 = vrot.slane %v249_v42, 4  ;;  %v254_v52 = vrot.slane %v252_v43, 5  ;;  %v6109_v21 = vld [vmem:[%s6023_s23 + $0x1c] sm:$0xf] }
  0x1b   : > { %v4898_v49 = vcombine.low %v237_v45, %v247_v46  ;;  %v424_v50 = vrot.slane %v423_v40, 4  ;;  %v434_v54 = vrot.slane %v433_v47, 4  ;;  %v260_v55 = vrot.slane %v258_v44, 5  ;;  %v6128_v40 = vld [vmem:[%s8641_s1 + $0x8] sm:$0x3] }
  0x1c   : > { %v264_v56 = vrot.slane %v262_v48, 4  ;;  %v268_v57 = vshll.u32 %v6073_v41, 16  ;;  %v255_v60 = vor.u32 %v254_v52, %v251_v51  ;;  %v441_v3 = vshrl.u32 %v6084_v53, 16  ;;  %v6133_v46 = vld [vmem:[%s6023_s23 + $0x7c] sm:$0xf] }
  0x1d   : > { %5592 = vmatprep.mubr.msk.bf16.mxu0 %vm658_vm3, %v4898_v49  ;;  %v429_v59 = vsel %vm6067_vm4, %v424_v50, %v428_v35  ;;  %v439_v0 = vsel %vm6067_vm4, %v434_v54, %v438_v39  ;;  %v444_v11 = vshll.u32 %v6084_v53, 16  ;;  %v450_v13 = vshll.u32 %v6088_v58, 16  ;;  %v6122_v35 = vld [vmem:[%s6023_s23 + $0x78] sm:$0xf] }
  0x1e   : > { %v265_v1 = vor.u32 %v264_v56, %v260_v55  ;;  %v270_v2 = vrot.slane %v268_v57, 5  ;;  %v4906_v9 = vcombine.low %v429_v59, %v439_v0  ;;  %v256_v10 = vrot.slane %v255_v60, 4  ;;  %v6140_v56 = vld [vmem:[%s6023_s23 + $0x80] sm:$0x1] }
  0x1f   : > { %v443_v18 = vrot.slane %v441_v3, 4  ;;  %v454_v19 = vshrl.u32 %v6088_v58, 16  ;;  %v460_v20 = vshll.u32 %v6096_v63, 16  ;;  %v446_v23 = vrot.slane %v444_v11, 5  ;;  %8679 = vst [vmem:[#allocation2_spill] sm:$0xff] %v6140_v56 }
  0x20   : > { %v266_v17 = vrot.slane %v265_v1, 4  ;;  %5608 = vmatprep.mubr.msk.bf16.mxu1 %vm658_vm3, %v4906_v9  ;;  %v261_v22 = vsel %vm6067_vm4, %v256_v10, %v260_v55  ;;  %v452_v24 = vrot.slane %v450_v13, 5  ;;  %v273_v26 = vshrl.u32 %v6102_v8, 16  ;;  %v6146_v1 = vld [vmem:[%s6023_s23 + $0x24] sm:$0xf] }
  0x21   : > { %v456_v28 = vrot.slane %v454_v19, 4  ;;  %v462_v33 = vrot.slane %v460_v20, 5  ;;  %v276_v34 = vshll.u32 %v6102_v8, 16  ;;  %v447_v37 = vor.u32 %v446_v23, %v443_v18  ;;  %v6154_v10 = vld [vmem:[%s6023_s23 + $0x28] sm:$0xf] }
  0x22   : > { %v271_v27 = vsel %vm6067_vm4, %v266_v17, %v270_v2  ;;  %v275_v38 = vrot.slane %v273_v26, 4  ;;  %v282_v39 = vshll.u32 %v6109_v21, 16  ;;  %v286_v44 = vshrl.u32 %v6109_v21, 16  ;;  %v6160_v19 = vld [vmem:[%s8641_s1 + $0x6] sm:$0x3] }
  0x23   : > { %v4899_v36 = vcombine.low %v261_v22, %v271_v27  ;;  %v457_v42 = vor.u32 %v456_v28, %v452_v24  ;;  %v278_v43 = vrot.slane %v276_v34, 5  ;;  %v292_v45 = vshll.u32 %v6115_v25, 16 }
  0x24   : > { %v448_v47 = vrot.slane %v447_v37, 4  ;;  %v284_v48 = vrot.slane %v282_v39, 5  ;;  %v465_v49 = vshrl.u32 %v6122_v35, 16  ;;  %v468_v50 = vshll.u32 %v6122_v35, 16 }
  0x25   : > { %5593 = vmatmul.mubr.msk.bf16.vlgmr.msra.gmra.mxu0 %vm658_vm3, %v4899_v36  ;;  %v458_v51 = vrot.slane %v457_v42, 4  ;;  %v279_v52 = vor.u32 %v278_v43, %v275_v38  ;;  %v288_v54 = vrot.slane %v286_v44, 4  ;;  %v294_v55 = vrot.slane %v292_v45, 5  ;;  %v6172_v36 = vld [vmem:[%s6023_s23 + $0x84] sm:$0xf] }
  0x26   : > { %5659 = vmatpush3.bf16.msra.mxu0 %v6052_v16  ;;  %v453_v57 = vsel %vm6067_vm4, %v448_v47, %v452_v24  ;;  %v467_v59 = vrot.slane %v465_v49, 4  ;;  %v470_v60 = vrot.slane %v468_v50, 5  ;;  %v474_v0 = vshll.u32 %v6133_v46, 16  ;;  %v6165_v24 = vld [vmem:[%s6023_s23 + $0x2c] sm:$0x1] }
  0x27   : > { %5903 = vmatprep.subr.msk.bf16.mxu0 %vm707_vm0, %v6128_v40  ;;  %v463_v16 = vsel %vm6067_vm4, %v458_v51, %v462_v33  ;;  %v280_v2 = vrot.slane %v279_v52, 4  ;;  %v289_v3 = vor.u32 %v288_v54, %v284_v48  ;;  %v478_v9 = vshrl.u32 %v6133_v46, 16  ;;  %v6179_v43 = vld [vmem:[%s6023_s23 + $0x88] sm:$0xf]  ;;  %v6187_v51 = vld [vmem:[%s6023_s23 + $0x8c] sm:$0x1] }
  0x28   : > { %v4907_v11 = vcombine.low %v453_v57, %v463_v16  ;;  %v471_v13 = vor.u32 %v470_v60, %v467_v59  ;;  %v476_v17 = vrot.slane %v474_v0, 5  ;;  %v484_v18 = vshll.u32 %v6140_v56, 16  ;;  %8680 = vst [vmem:[#allocation3_spill] sm:$0xff] %v6187_v51  ;;  %v6195_v60 = vld [vmem:[%s6023_s23 + $0x30] sm:$0xf] }
  0x29   : > { %v285_v20 = vsel %vm6067_vm4, %v280_v2, %v284_v48  ;;  %v290_v22 = vrot.slane %v289_v3, 4  ;;  %v480_v23 = vrot.slane %v478_v9, 4  ;;  %v297_v26 = vshrl.u32 %v6146_v1, 16  ;;  %v6200_v9 = vld [vmem:[%s6023_s23 + $0x34] sm:$0xf] }
  0x2a   : > { %5609 = vmatmul.mubr.msk.bf16.vlgmr.msra.gmra.mxu1 %vm658_vm3, %v4907_v11  ;;  %v472_v27 = vrot.slane %v471_v13, 4  ;;  %v486_v28 = vrot.slane %v484_v18, 5  ;;  %v300_v33 = vshll.u32 %v6146_v1, 16  ;;  %v306_v34 = vshll.u32 %v6154_v10, 16 }
  0x2b   : > { %5625 = vmatpush3.bf16.msra.mxu1 %v6026_v4  ;;  %v295_v37 = vsel %vm6067_vm4, %v290_v22, %v294_v55  ;;  %v481_v38 = vor.u32 %v480_v23, %v476_v17  ;;  %v299_v39 = vrot.slane %v297_v26, 4  ;;  %v310_v42 = vshrl.u32 %v6154_v10, 16 }
  0x2c   : > { %v4900_v44 = vcombine.low %v285_v20, %v295_v37  ;;  %v477_v45 = vsel %vm6067_vm4, %v472_v27, %v476_v17  ;;  %v302_v47 = vrot.slane %v300_v33, 5  ;;  %v308_v48 = vrot.slane %v306_v34, 5  ;;  %5902 = vmatprep.subr.msk.bf16.mxu1 %vm707_vm0, %v6160_v19  ;;  %v6208_v33 = vld [vmem:[%s6023_s23 + $0x38] sm:$0x1] }
  0x2d   : > { %v482_v4 = vrot.slane %v481_v38, 4  ;;  %v312_v49 = vrot.slane %v310_v42, 4  ;;  %v316_v50 = vshll.u32 %v6165_v24, 16  ;;  %v489_v52 = vshrl.u32 %v6172_v36, 16  ;;  %v6213_v38 = vld [vmem:[%s6023_s23 + $0x90] sm:$0xf] }
  0x2e   : > { %5596 = vmatprep.mubr.msk.bf16.mxu0 %vm658_vm3, %v4900_v44  ;;  %v303_v54 = vor.u32 %v302_v47, %v299_v39  ;;  %v492_v55 = vshll.u32 %v6172_v36, 16  ;;  %v498_v57 = vshll.u32 %v6179_v43, 16  ;;  %v502_v59 = vshrl.u32 %v6179_v43, 16  ;;  %8681 = vst [vmem:[#allocation4_spill] sm:$0xff] %v6213_v38  ;;  %v6218_v47 = vld [vmem:[%s6023_s23 + $0x94] sm:$0xf] }
  0x2f   : > { %v487_v0 = vsel %vm6067_vm4, %v482_v4, %v486_v28  ;;  %v313_v16 = vor.u32 %v312_v49, %v308_v48  ;;  %v318_v2 = vrot.slane %v316_v50, 5  ;;  %v491_v3 = vrot.slane %v489_v52, 4  ;;  %8682 = vst [vmem:[#allocation5_spill] sm:$0xff] %v6218_v47 }
  0x30   : > { %v4908_v11 = vcombine.low %v477_v45, %v487_v0  ;;  %v304_v13 = vrot.slane %v303_v54, 4  ;;  %v494_v17 = vrot.slane %v492_v55, 5  ;;  %v500_v18 = vrot.slane %v498_v57, 5 }
  0x31   : > { %v314_v20 = vrot.slane %v313_v16, 4  ;;  %v504_v22 = vrot.slane %v502_v59, 4  ;;  %v508_v23 = vshll.u32 %v6187_v51, 16  ;;  %v321_v26 = vshrl.u32 %v6195_v60, 16  ;;  %v6227_v16 = vld [vmem:[%s6023_s23 + $0x98] sm:$0x1] }
  0x32   : > { %5612 = vmatprep.mubr.msk.bf16.mxu1 %vm658_vm3, %v4908_v11  ;;  %v309_v27 = vsel %vm6067_vm4, %v304_v13, %v308_v48  ;;  %v495_v28 = vor.u32 %v494_v17, %v491_v3  ;;  %v324_v34 = vshll.u32 %v6195_v60, 16  ;;  %v330_v37 = vshll.u32 %v6200_v9, 16  ;;  %8683 = vst [vmem:[#allocation6_spill] sm:$0xff] %v6227_v16  ;;  %v6232_v11 = vld [vmem:[%s6023_s23 + $0x3c] sm:$0xf] }
  0x33   : > { %v319_v39 = vsel %vm6067_vm4, %v314_v20, %v318_v2  ;;  %v505_v42 = vor.u32 %v504_v22, %v500_v18  ;;  %v510_v44 = vrot.slane %v508_v23, 5  ;;  %v323_v45 = vrot.slane %v321_v26, 4  ;;  %v6237_v23 = vld [vmem:[%s6023_s23 + $0x40] sm:$0xf]  ;;  %v1165_v51 = vld [vmem:[%s6023_s23 + $0xc] sm:$0xe] }
  0x34   : > { %v4901_v48 = vcombine.low %v309_v27, %v319_v39  ;;  %v496_v4 = vrot.slane %v495_v28, 4  ;;  %v326_v49 = vrot.slane %v324_v34, 5  ;;  %v332_v50 = vrot.slane %v330_v37, 5 }
  0x35   : > { %v506_v52 = vrot.slane %v505_v42, 4  ;;  %v334_v54 = vshrl.u32 %v6200_v9, 16  ;;  %v340_v55 = vshll.u32 %v6208_v33, 16  ;;  %v513_v57 = vshrl.u32 %v6213_v38, 16 }
  0x36   : > { %5597 = vmatmul.mubr.msk.bf16.gmra.mxu0 %vm658_vm3, %v4901_v48  ;;  %v501_v59 = vsel %vm6067_vm4, %v496_v4, %v500_v18  ;;  %v327_v0 = vor.u32 %v326_v49, %v323_v45  ;;  %v516_v2 = vshll.u32 %v6213_v38, 16  ;;  %v522_v3 = vshll.u32 %v6218_v47, 16  ;;  %v6246_v48 = vld [vmem:[%s6023_s23 + $0x44] sm:$0x1] }
  0x37   : > { %v511_v13 = vsel %vm6067_vm4, %v506_v52, %v510_v44  ;;  %v336_v17 = vrot.slane %v334_v54, 4  ;;  %v342_v20 = vrot.slane %v340_v55, 5  ;;  %v515_v22 = vrot.slane %v513_v57, 4  ;;  %v6251_v52 = vld [vmem:[%s6023_s23 + $0x9c] sm:$0xf] }
  0x38   : > { %v4909_v18 = vcombine.low %v501_v59, %v511_v13  ;;  %v328_v26 = vrot.slane %v327_v0, 4  ;;  %v518_v27 = vrot.slane %v516_v2, 5  ;;  %v524_v28 = vrot.slane %v522_v3, 5  ;;  %8684 = vst [vmem:[#allocation7_spill] sm:$0xff] %v6251_v52  ;;  %v6255_v13 = vld [vmem:[%s6023_s23 + $0xa0] sm:$0xf] }
  0x39   : > { %v337_v34 = vor.u32 %v336_v17, %v332_v50  ;;  %v526_v37 = vshrl.u32 %v6218_v47, 16  ;;  %v532_v39 = vshll.u32 %v6227_v16, 16  ;;  %v345_v42 = vshrl.u32 %v6232_v11, 16  ;;  %8685 = vst [vmem:[#allocation8_spill] sm:$0xff] %v6255_v13 }
  0x3a   : > { %5613 = vmatmul.mubr.msk.bf16.gmra.mxu1 %vm658_vm3, %v4909_v18  ;;  %v333_v44 = vsel %vm6067_vm4, %v328_v26, %v332_v50  ;;  %v519_v45 = vor.u32 %v518_v27, %v515_v22  ;;  %v348_v4 = vshll.u32 %v6232_v11, 16  ;;  %v354_v49 = vshll.u32 %v6237_v23, 16  ;;  %v6261_v26 = vld [vmem:[%s6023_s23 + $0xa4] sm:$0x1] }
  0x3b   : > { %v338_v54 = vrot.slane %v337_v34, 4  ;;  %v528_v55 = vrot.slane %v526_v37, 4  ;;  %v534_v57 = vrot.slane %v532_v39, 5  ;;  %v347_v59 = vrot.slane %v345_v42, 4  ;;  %8686 = vst [vmem:[#allocation9_spill] sm:$0xff] %v6261_v26 }
  0x3c   : > { %v520_v0 = vrot.slane %v519_v45, 4  ;;  %v350_v2 = vrot.slane %v348_v4, 5  ;;  %v356_v3 = vrot.slane %v354_v49, 5  ;;  %v358_v50 = vshrl.u32 %v6237_v23, 16  ;;  %v6265_v34 = vld [vmem:[%s6023_s23 + $0x48] sm:$0xf] }
  0x3d   : > { %v343_v17 = vsel %vm6067_vm4, %v338_v54, %v342_v20  ;;  %v529_v22 = vor.u32 %v528_v55, %v524_v28  ;;  %v364_v18 = vshll.u32 %v6246_v48, 16  ;;  %v537_v27 = vshrl.u32 %v6251_v52, 16 }
  0x3e   : > { %v4902_v37 = vcombine.low %v333_v44, %v343_v17  ;;  %v525_v39 = vsel %vm6067_vm4, %v520_v0, %v524_v28  ;;  %v351_v42 = vor.u32 %v350_v2, %v347_v59  ;;  %v360_v45 = vrot.slane %v358_v50, 4  ;;  %v6274_v17 = vld [vmem:[%s6023_s23 + $0x4c] sm:$0xf]  ;;  %v6280_v2 = vld [vmem:[%s6023_s23 + $0x50] sm:$0x1] }
  0x3f   : > { %v530_v4 = vrot.slane %v529_v22, 4  ;;  %v366_v49 = vrot.slane %v364_v18, 5  ;;  %v539_v20 = vrot.slane %v537_v27, 4  ;;  %v540_v54 = vshll.u32 %v6251_v52, 16 }
  0x40   : > { %5600 = vmatprep.mubr.msk.bf16.mxu0 %vm658_vm3, %v4902_v37  ;;  %v352_v55 = vrot.slane %v351_v42, 4  ;;  %v361_v62 = vor.u32 %v360_v45, %v356_v3  ;;  %v546_v32 = vshll.u32 %v6255_v13, 16  ;;  %v550_v44 = vshrl.u32 %v6255_v13, 16  ;;  %v6286_v42 = vld [vmem:[%s6023_s23 + $0xa8] sm:$0xf] }
  0x41   : > { %v535_v28 = vsel %vm6067_vm4, %v530_v4, %v534_v57  ;;  %v542_v59 = vrot.slane %v540_v54, 5  ;;  %v556_v0 = vshll.u32 %v6261_v26, 16  ;;  %v369_v50 = vshrl.u32 %v6265_v34, 16  ;;  %8687 = vst [vmem:[#allocation10_spill] sm:$0xff] %v6286_v42 }
  0x42   : > { %v4910_v22 = vcombine.low %v525_v39, %v535_v28  ;;  %v357_v18 = vsel %vm6067_vm4, %v352_v55, %v356_v3  ;;  %v362_v27 = vrot.slane %v361_v62, 4  ;;  %v548_v37 = vrot.slane %v546_v32, 5 }
  0x43   : > { %v543_v45 = vor.u32 %v542_v59, %v539_v20  ;;  %v552_v61 = vrot.slane %v550_v44, 4  ;;  %v558_v57 = vrot.slane %v556_v0, 5  ;;  %v371_v4 = vrot.slane %v369_v50, 4  ;;  %v6296_v44 = vld [vmem:[%s6023_s23 + $0xac] sm:$0xf] }
  0x44   : > { %5616 = vmatprep.mubr.msk.bf16.mxu1 %vm658_vm3, %v4910_v22  ;;  %v367_v54 = vsel %vm6067_vm4, %v362_v27, %v366_v49  ;;  %v372_v39 = vshll.u32 %v6265_v34, 16  ;;  %v378_v28 = vshll.u32 %v6274_v17, 16  ;;  %v382_v62 = vshrl.u32 %v6274_v17, 16  ;;  %8688 = vst [vmem:[#allocation11_spill] sm:$0xff] %v6296_v44  ;;  %v6299_v22 = vld [vmem:[%s6023_s23 + $0xb0] sm:$0x1] }
  0x45   : > { %v4903_v3 = vcombine.low %v357_v18, %v367_v54  ;;  %v544_v32 = vrot.slane %v543_v45, 4  ;;  %v553_v55 = vor.u32 %v552_v61, %v548_v37  ;;  %v388_v20 = vshll.u32 %v6280_v2, 16  ;;  %8689 = vst [vmem:[#allocation12_spill] sm:$0xff] %v6299_v22 }
  0x46   : > { %v374_v59 = vrot.slane %v372_v39, 5  ;;  %v380_v0 = vrot.slane %v378_v28, 5  ;;  %v384_v50 = vrot.slane %v382_v62, 4  ;;  %v561_v49 = vshrl.u32 %v6286_v42, 16  ;;  %v6308_v62 = vld [vmem:[%s6023_s23 + $0x54] sm:$0xf] }
  0x47   : > { %5601 = vmatmul.mubr.msk.bf16.gmra.mxu0 %vm658_vm3, %v4903_v3  ;;  %v549_v18 = vsel %vm6067_vm4, %v544_v32, %v548_v37  ;;  %v554_v27 = vrot.slane %v553_v55, 4  ;;  %v390_v61 = vrot.slane %v388_v20, 5  ;;  %v564_v45 = vshll.u32 %v6286_v42, 16  ;;  %v6315_v55 = vld [vmem:[%s6023_s23 + $0x58] sm:$0xf] }
  0x48   : > { %v375_v54 = vor.u32 %v374_v59, %v371_v4  ;;  %v385_v56 = vor.u32 %v384_v50, %v380_v0  ;;  %v563_v39 = vrot.slane %v561_v49, 4  ;;  %v570_v28 = vshll.u32 %v6296_v44, 16  ;;  %v6318_v49 = vld [vmem:[%s6023_s23 + $0x5c] sm:$0x1] }
  0x49   : > { %v559_v3 = vsel %vm6067_vm4, %v554_v27, %v558_v57  ;;  %v566_v26 = vrot.slane %v564_v45, 5  ;;  %v574_v37 = vshrl.u32 %v6296_v44, 16  ;;  %v580_v32 = vshll.u32 %v6299_v22, 16  ;;  %v1164_v22 = vld [vmem:[%s6023_s23] sm:$0xe] }
  0x4a   : > { %v4911_v4 = vcombine.low %v549_v18, %v559_v3  ;;  %v376_v20 = vrot.slane %v375_v54, 4  ;;  %v386_v59 = vrot.slane %v385_v56, 4  ;;  %v572_v50 = vrot.slane %v570_v28, 5  ;;  %v6329_v54 = vld [vmem:[%s6023_s23 + $0xb4] sm:$0xf] }
  0x4b   : > { %v567_v42 = vor.u32 %v566_v26, %v563_v39  ;;  %v576_v52 = vrot.slane %v574_v37, 4  ;;  %v582_v13 = vrot.slane %v580_v32, 5  ;;  %v393_v57 = vshrl.u32 %v6308_v62, 16  ;;  %8690 = vst [vmem:[#allocation13_spill] sm:$0xff] %v6329_v54  ;;  %v6332_v37 = vld [vmem:[%s6023_s23 + $0xb8] sm:$0xf] }
  0x4c   : > { %5617 = vmatmul.mubr.msk.bf16.gmra.mxu1 %vm658_vm3, %v4911_v4  ;;  %v381_v27 = vsel %vm6067_vm4, %v376_v20, %v380_v0  ;;  %v391_v18 = vsel %vm6067_vm4, %v386_v59, %v390_v61  ;;  %v396_v56 = vshll.u32 %v6308_v62, 16  ;;  %v402_v45 = vshll.u32 %v6315_v55, 16  ;;  %v6337_v61 = vld [vmem:[%s6023_s23 + $0xbc] sm:$0x1] }
  0x4d   : > { %v4904_v26 = vcombine.low %v381_v27, %v391_v18  ;;  %v568_v39 = vrot.slane %v567_v42, 4  ;;  %v577_v28 = vor.u32 %v576_v52, %v572_v50  ;;  %v395_v3 = vrot.slane %v393_v57, 4 }
  0x4e   : > { %v398_v32 = vrot.slane %v396_v56, 5  ;;  %v404_v4 = vrot.slane %v402_v45, 5  ;;  %v406_v0 = vshrl.u32 %v6315_v55, 16  ;;  %v412_v20 = vshll.u32 %v6318_v49, 16 }
  0x4f   : > { %5604 = vmatprep.mubr.msk.bf16.mxu0 %vm658_vm3, %v4904_v26  ;;  %v573_v59 = vsel %vm6067_vm4, %v568_v39, %v572_v50  ;;  %v578_v27 = vrot.slane %v577_v28, 4  ;;  %v585_v52 = vshrl.u32 %v6329_v54, 16  ;;  %v588_v42 = vshll.u32 %v6329_v54, 16 }
  0x50   : > { %v399_v57 = vor.u32 %v398_v32, %v395_v3  ;;  %v408_v18 = vrot.slane %v406_v0, 4  ;;  %v414_v56 = vrot.slane %v412_v20, 5  ;;  %v594_v45 = vshll.u32 %v6332_v37, 16 }
  0x51   : > { %v583_v44 = vsel %vm6067_vm4, %v578_v27, %v582_v13  ;;  %v587_v16 = vrot.slane %v585_v52, 4  ;;  %v590_v26 = vrot.slane %v588_v42, 5  ;;  %v598_v38 = vshrl.u32 %v6332_v37, 16 }
  0x52   : > { %v4912_v50 = vcombine.low %v573_v59, %v583_v44  ;;  %v400_v39 = vrot.slane %v399_v57, 4  ;;  %v409_v28 = vor.u32 %v408_v18, %v404_v4  ;;  %v596_v47 = vrot.slane %v594_v45, 5  ;;  %v1166_v57 = vld [vmem:[%s6023_s23 + $0x18] sm:$0xe] }
  0x53   : > { %v591_v54 = vor.u32 %v590_v26, %v587_v16  ;;  %v600_v3 = vrot.slane %v598_v38, 4  ;;  %v604_v32 = vshll.u32 %v6337_v61, 16  ;;  %v4962_v13 = vrot.slane %v1164_v22, 9 }
  0x54   : > { %5620 = vmatprep.mubr.msk.bf16.mxu1 %vm658_vm3, %v4912_v50  ;;  %v405_v44 = vsel %vm6067_vm4, %v400_v39, %v404_v4  ;;  %v410_v20 = vrot.slane %v409_v28, 4  ;;  %v1217_v59 = vrot.slane %v6032_v6, 5  ;;  %v4931_v38 = vcombine.low %v6060_v29, %v6063_v30 }
  0x55   : > { %v592_v16 = vrot.slane %v591_v54, 4  ;;  %v601_v27 = vor.u32 %v600_v3, %v596_v47  ;;  %v606_v52 = vrot.slane %v604_v32, 5  ;;  %v4963_v42 = vrot.slane %v1165_v51, 9 }
  0x56   : > { %v415_v18 = vsel %vm6067_vm4, %v410_v20, %v414_v56  ;;  %v1218_v22 = vsel %vm6353_vm7, %v4962_v13, %v1217_v59  ;;  %v1219_v45 = vrot.slane %v1217_v59, 4  ;;  %v8693_v4 = vrot.slane %v6063_v30, 5 }
  0x57   : > { %v4905_v50 = vcombine.low %v405_v44, %v415_v18  ;;  %v597_v54 = vsel %vm6067_vm4, %v592_v16, %v596_v47  ;;  %v602_v39 = vrot.slane %v601_v27, 4  ;;  %v4930_v51 = vcombine.low %v6029_v5, %v6032_v6  ;;  %v1167_v27 = vld [vmem:[%s6023_s23 + $0x24] sm:$0xe] }
  0x58   : > { %v1226_v26 = vrot.slane %v8693_v4, 4  ;;  %v8694_v28 = vrot.slane %v6035_v7, 5  ;;  %v8695_v3 = vmov %v8693_v4  ;;  %v4932_v13 = vcombine.low %v6102_v8, %v6109_v21  ;;  %v1169_v4 = vld [vmem:[%s6023_s23 + $0x3c] sm:$0xe] }
  0x59   : > { %v1225_v32 = vsel %vm6353_vm7, %v4963_v42, %v8695_v3  ;;  %v4964_v44 = vrot.slane %v1166_v57, 9  ;;  %5605 = vmatmul.mubr.msk.bf16.gmra.mxu0 %vm658_vm3, %v4905_v50  ;;  %v607_v47 = vsel %vm6067_vm4, %v602_v39, %v606_v52  ;;  %v8696_v6 = vrot.slane %v6073_v41, 5  ;;  %v1168_v42 = vld [vmem:[%s6023_s23 + $0x30] sm:$0xe]  ;;  %v1170_v39 = vld [vmem:[%s6023_s23 + $0x48] sm:$0xe] }
  0x5a   : > { %v1221_v56 = vsel %vm6353_vm7, %v1219_v45, %v8694_v28  ;;  %v1231_v20 = vrot.slane %v6109_v21, 5  ;;  %v4913_v59 = vcombine.low %v597_v54, %v607_v47  ;;  %v1234_v16 = vrot.slane %v6115_v25, 5  ;;  %v1171_v47 = vld [vmem:[%s6023_s23 + $0x54] sm:$0xe]  ;;  %v6648_v21 = vld [vmem:[%s6023_s23 + $0x2c] sm:$0x1] }
  0x5b   : > { %v4979_v5 = vcombine.low %v1218_v22, %v1221_v56  ;;  %v1228_v7 = vsel %vm6353_vm7, %v1226_v26, %v8696_v6  ;;  %v1785_v52 = vsel %vm707_vm0, %v6160_v19, 0  ;;  %v1238_v18 = vrot.slane %v6154_v10, 5 }
  0x5c   : > { %v1232_v41 = vsel %vm6353_vm7, %v4964_v44, %v1231_v20  ;;  %v1233_v57 = vrot.slane %v1231_v20, 4  ;;  %5621 = vmatmul.mubr.msk.bf16.gmra.mxu1 %vm658_vm3, %v4913_v59  ;;  %v4980_v22 = vcombine.low %v1225_v32, %v1228_v7  ;;  %v2511_v25 = vsel %vm707_vm0, %v6128_v40, 0 }
  0x5d   : > { %5660 = vmatprep.mubr.msk.bf16.mxu0 %vm658_vm3, %v4979_v5  ;;  %v1245_v45 = vrot.slane %v6200_v9, 5  ;;  %5626 = vmatprep.mubr.msk.bf16.mxu1 %vm658_vm3, %v4930_v51  ;;  %v4965_v26 = vrot.slane %v1167_v27, 9  ;;  %v1241_v50 = vrot.slane %v6165_v24, 5  ;;  %v4966_v54 = vrot.slane %v1168_v42, 9  ;;  %v6420_v24 = vld [vmem:[%s8641_s1 + $0xc] sm:$0x3] }
  0x5e   : > { %v1235_v19 = vsel %vm6353_vm7, %v1233_v57, %v1234_v16  ;;  %v1240_v56 = vrot.slane %v1238_v18, 4  ;;  %v1248_v32 = vrot.slane %v6208_v33, 5  ;;  %v4967_v44 = vrot.slane %v1169_v4, 9 }
  0x5f   : > { %v4981_v28 = vcombine.low %v1232_v41, %v1235_v19  ;;  %v1247_v3 = vrot.slane %v1245_v45, 4  ;;  %v1252_v40 = vrot.slane %v6237_v23, 5  ;;  %v1276_v5 = vrot.slane %v6049_v15, 5 }
  0x60   : > { %v1255_v51 = vrot.slane %v6246_v48, 5  ;;  %v4968_v6 = vrot.slane %v1170_v39, 9  ;;  %v1259_v7 = vrot.slane %v6274_v17, 5  ;;  %v4933_v33 = vcombine.low %v6146_v1, %v6154_v10  ;;  %v1172_v1 = vld [vmem:[%s6023_s23 + $0x60] sm:$0xe] }
  0x61   : > { %5661 = vmatmul.mubr.msk.bf16.vlgmr.msra.gmra.mxu0 %vm658_vm3, %v4980_v22  ;;  %v1239_v20 = vsel %vm6353_vm7, %v4965_v26, %v1238_v18  ;;  %v1254_v59 = vrot.slane %v1252_v40, 4  ;;  %v1262_v16 = vrot.slane %v6280_v2, 5  ;;  %v1242_v48 = vsel %vm6353_vm7, %v1240_v56, %v1241_v50  ;;  %v6448_v22 = vld [vmem:[%s8641_s1 + $0xa] sm:$0x3]  ;;  %v6473_v50 = vld [vmem:[%s6023_s23 + $0x6c] sm:$0xe] }
  0x62   : > { %5727 = vmatpush3.bf16.msra.mxu0 %v2511_v25  ;;  %5664 = vmatprep.mubr.msk.bf16.mxu0 %vm658_vm3, %v4981_v28  ;;  %v1246_v27 = vsel %vm6353_vm7, %v4966_v54, %v1245_v45  ;;  %v1249_v42 = vsel %vm6353_vm7, %v1247_v3, %v1248_v32  ;;  %v1261_v41 = vrot.slane %v1259_v7, 4  ;;  %v6438_v10 = vsel %vm6353_vm7, %v4967_v44, %v1252_v40  ;;  %v1175_v39 = vld [vmem:[%s6023_s23 + $0x84] sm:$0xe]  ;;  %v6502_v44 = vld [vmem:[%s6023_s23 + $0x78] sm:$0xe] }
  0x63   : > { %v6442_v2 = vsel %vm6353_vm7, %v4968_v6, %v1259_v7  ;;  %v4969_v57 = vrot.slane %v1171_v47, 9  ;;  %v1266_v18 = vrot.slane %v6315_v55, 5  ;;  %5905 = vmatprep.subr.msk.bf16.mxu0 %vm707_vm0, %v6420_v24  ;;  %v6458_v25 = vsel %vm6353_vm7, %v1254_v59, %v1255_v51  ;;  %v1176_v40 = vld [vmem:[%s6023_s23 + $0x90] sm:$0xe] }
  0x64   : > { %5627 = vmatmul.mubr.msk.bf16.vlgmr.msra.gmra.mxu1 %vm658_vm3, %v4931_v38  ;;  %v6462_v45 = vsel %vm6353_vm7, %v1261_v41, %v1262_v16  ;;  %v1269_v4 = vrot.slane %v6318_v49, 5  ;;  %v1273_v19 = vrot.slane %v6046_v14, 5  ;;  %v4982_v29 = vcombine.low %v1239_v20, %v1242_v48  ;;  %v8697_v48 = vld [vmem:[#allocation3_spill] sm:$0xff] }
  0x65   : > { %5693 = vmatpush3.bf16.msra.mxu1 %v1785_v52  ;;  %5630 = vmatprep.mubr.msk.bf16.mxu1 %vm658_vm3, %v4932_v13  ;;  %v4934_v30 = vcombine.low %v6195_v60, %v6200_v9  ;;  %v1268_v38 = vrot.slane %v1266_v18, 4  ;;  %v4970_v26 = vrot.slane %v1172_v1, 9  ;;  %v4983_v49 = vcombine.low %v1246_v27, %v1249_v42  ;;  %v1177_v42 = vld [vmem:[%s6023_s23 + $0x9c] sm:$0xe] }
  0x66   : > { %v4935_v52 = vcombine.low %v6232_v11, %v6237_v23  ;;  %v4936_v8 = vcombine.low %v6265_v34, %v6274_v17  ;;  %5904 = vmatprep.subr.msk.bf16.mxu1 %vm707_vm0, %v6448_v22  ;;  %v4984_v60 = vcombine.low %v6438_v10, %v6458_v25  ;;  %v4985_v9 = vcombine.low %v6442_v2, %v6462_v45  ;;  %v8698_v10 = vld [vmem:[#allocation5_spill] sm:$0xff]  ;;  %v8699_v2 = vld [vmem:[#allocation4_spill] sm:$0xff] }
  0x67   : > { %v1275_v54 = vrot.slane %v1273_v19, 4  ;;  %v6492_v28 = vsel %vm6353_vm7, %v4969_v57, %v1266_v18  ;;  %v6496_v56 = vsel %vm6353_vm7, %v1268_v38, %v1269_v4  ;;  %v4971_v32 = vrot.slane %v6473_v50, 9  ;;  %v1178_v18 = vld [vmem:[%s6023_s23 + $0xa8] sm:$0xe]  ;;  %v8701_v38 = vld [vmem:[#allocation8_spill] sm:$0xff] }
  0x68   : > { %v6508_v47 = vsel %vm6353_vm7, %v4970_v26, %v1273_v19  ;;  %v1280_v51 = vrot.slane %v6088_v58, 5  ;;  %v1283_v6 = vrot.slane %v6096_v63, 5  ;;  %v4973_v59 = vrot.slane %v1175_v39, 9  ;;  %v8700_v19 = vld [vmem:[#allocation6_spill] sm:$0xff]  ;;  %v8702_v26 = vld [vmem:[#allocation7_spill] sm:$0xff] }
  0x69   : > { %5665 = vmatmul.mubr.msk.bf16.gmra.mxu0 %vm658_vm3, %v4982_v29  ;;  %v1294_v16 = vrot.slane %v6179_v43, 5  ;;  %v1297_v27 = vrot.slane %v8697_v48, 5  ;;  %v4986_v41 = vcombine.low %v6492_v28, %v6496_v56  ;;  %v6526_v63 = vsel %vm6353_vm7, %v1275_v54, %v1276_v5  ;;  %v8704_v48 = vld [vmem:[#allocation11_spill] sm:$0xff] }
  0x6a   : > { %5668 = vmatprep.mubr.msk.bf16.mxu0 %vm658_vm3, %v4983_v49  ;;  %v4972_v1 = vrot.slane %v6502_v44, 9  ;;  %v4974_v4 = vrot.slane %v1176_v40, 9  ;;  %v1301_v15 = vrot.slane %v8698_v10, 5  ;;  %v1282_v5 = vrot.slane %v1280_v51, 4  ;;  %v5076_v57 = vld [vmem:[%s6023_s23 + $0xc] sm:$0xf] }
  0x6b   : > { %v6535_v25 = vsel %vm6353_vm7, %v4973_v59, %v1294_v16  ;;  %v1296_v45 = vrot.slane %v1294_v16, 4  ;;  %v1304_v29 = vrot.slane %v8700_v19, 5  ;;  %v4975_v49 = vrot.slane %v1177_v42, 9  ;;  %v8703_v59 = vld [vmem:[#allocation9_spill] sm:$0xff]  ;;  %v8705_v42 = vld [vmem:[#allocation10_spill] sm:$0xff] }
  0x6c   : > { %5631 = vmatmul.mubr.msk.bf16.gmra.mxu1 %vm658_vm3, %v4933_v33  ;;  %v1287_v33 = vrot.slane %v6133_v46, 5  ;;  %v6549_v39 = vsel %vm6353_vm7, %v4974_v4, %v1301_v15  ;;  %v1303_v44 = vrot.slane %v1301_v15, 4  ;;  %v1308_v40 = vrot.slane %v8701_v38, 5  ;;  %v8706_v15 = vld [vmem:[#allocation12_spill] sm:$0xff] }
  0x6d   : > { %5634 = vmatprep.mubr.msk.bf16.mxu1 %vm658_vm3, %v4934_v30  ;;  %v6545_v54 = vsel %vm6353_vm7, %v1296_v45, %v1297_v27  ;;  %v1311_v16 = vrot.slane %v8703_v59, 5  ;;  %v4976_v45 = vrot.slane %v1178_v18, 9  ;;  %v1315_v4 = vrot.slane %v8704_v48, 5 }
  0x6e   : > { %v6559_v27 = vsel %vm6353_vm7, %v1303_v44, %v1304_v29  ;;  %v1318_v50 = vrot.slane %v8706_v15, 5  ;;  %v6569_v19 = vsel %vm6353_vm7, %v4975_v49, %v1308_v40  ;;  %v1310_v7 = vrot.slane %v1308_v40, 4  ;;  %v8707_v29 = vld [vmem:[#allocation13_spill] sm:$0xff]  ;;  %v8708_v15 = vld [vmem:[#allocation2_spill] sm:$0xff]  ;;  %v6584_v49 = vld [vmem:[%s6023_s23 + $0x10] sm:$0xf] }
  0x6f   : > { %v6576_v18 = vsel %vm6353_vm7, %v4971_v32, %v1280_v51  ;;  %v6581_v59 = vsel %vm6353_vm7, %v4976_v45, %v1315_v4  ;;  %v1317_v30 = vrot.slane %v1315_v4, 4  ;;  %v5079_v40 = vld [vmem:[%s6023_s23 + $0x18] sm:$0xf]  ;;  %v1289_v20 = vrot.slane %v1287_v33, 4 }
  0x70   : > { %v2029_v44 = vshrl.u32 %v5076_v57, 16  ;;  %v2032_v32 = vshll.u32 %v5076_v57, 16  ;;  %v4987_v51 = vcombine.low %v6508_v47, %v6526_v63  ;;  %v6599_v45 = vsel %vm6353_vm7, %v1282_v5, %v1283_v6  ;;  %v1179_v57 = vld [vmem:[%s6023_s23 + $0xb4] sm:$0xe]  ;;  %v6620_v47 = vld [vmem:[%s6023_s23 + $0x14] sm:$0x1] }
  0x71   : > { %5669 = vmatmul.mubr.msk.bf16.gmra.mxu0 %vm658_vm3, %v4984_v60  ;;  %v1290_v60 = vrot.slane %v8708_v15, 5  ;;  %v6614_v11 = vsel %vm6353_vm7, %v4972_v1, %v1287_v33  ;;  %v2038_v6 = vshll.u32 %v6584_v49, 16  ;;  %v5080_v63 = vld [vmem:[%s6023_s23 + $0x1c] sm:$0xf]  ;;  %v2042_v17 = vshrl.u32 %v6584_v49, 16 }
  0x72   : > { %5672 = vmatprep.mubr.msk.bf16.mxu0 %vm658_vm3, %v4985_v9  ;;  %v6589_v9 = vsel %vm6353_vm7, %v1310_v7, %v1311_v16  ;;  %v6605_v7 = vsel %vm6353_vm7, %v1317_v30, %v1318_v50  ;;  %v2031_v5 = vrot.slane %v2029_v44, 4  ;;  %v2034_v34 = vrot.slane %v2032_v32, 5  ;;  %v5082_v15 = vld [vmem:[%s6023_s23 + $0x24] sm:$0xf]  ;;  %v6633_v44 = vld [vmem:[%s6023_s23 + $0x28] sm:$0xf] }
  0x73   : > { %v2053_v50 = vshrl.u32 %v5079_v40, 16  ;;  %v1291_v1 = vsel %vm6353_vm7, %v1289_v20, %v1290_v60  ;;  %v4977_v33 = vrot.slane %v1179_v57, 9  ;;  %v6628_v30 = vrot.slane %v2038_v6, 5 }
  0x74   : > { %5635 = vmatmul.mubr.msk.bf16.gmra.mxu1 %vm658_vm3, %v4935_v52  ;;  %v1322_v52 = vrot.slane %v6332_v37, 5  ;;  %v2056_v16 = vshll.u32 %v5079_v40, 16  ;;  %v1325_v23 = vrot.slane %v6337_v61, 5  ;;  %v2044_v4 = vrot.slane %v2042_v17, 4 }
  0x75   : > { %5638 = vmatprep.mubr.msk.bf16.mxu1 %vm658_vm3, %v4936_v8  ;;  %v5081_v8 = vld [vmem:[%s6023_s23 + $0x20] sm:$0x1]  ;;  %v2055_v3 = vrot.slane %v2053_v50, 4  ;;  %v2062_v13 = vshll.u32 %v5080_v63, 16  ;;  %v2048_v20 = vshll.u32 %v6620_v47, 16  ;;  %v2066_v57 = vshrl.u32 %v5080_v63, 16 }
  0x76   : > { %v1324_v32 = vrot.slane %v1322_v52, 4  ;;  %v2058_v60 = vrot.slane %v2056_v16, 5  ;;  %v4988_v61 = vcombine.low %v6576_v18, %v6599_v45  ;;  %v4989_v40 = vcombine.low %v6614_v11, %v1291_v1 }
  0x77   : > { %v2035_v6 = vor.u32 %v2034_v34, %v2031_v5  ;;  %v6644_v17 = vrot.slane %v2062_v13, 5  ;;  %v2045_v28 = vor.u32 %v2044_v4, %v6628_v30  ;;  %v2072_v50 = vshll.u32 %v5081_v8, 16  ;;  %v6671_v5 = vld [vmem:[%s6023_s23 + $0x34] sm:$0xf] }
  0x78   : > { %v2059_v56 = vor.u32 %v2058_v60, %v2055_v3  ;;  %v6656_v18 = vsel %vm6353_vm7, %v4977_v33, %v1322_v52  ;;  %v2077_v13 = vshrl.u32 %v5082_v15, 16  ;;  %v2080_v45 = vshll.u32 %v5082_v15, 16  ;;  %v5085_v52 = vld [vmem:[%s6023_s23 + $0x30] sm:$0xf] }
  0x79   : > { %5673 = vmatmul.mubr.msk.bf16.gmra.mxu0 %vm658_vm3, %v4986_v41  ;;  %v2068_v41 = vrot.slane %v2066_v57, 4  ;;  %v2086_v11 = vshll.u32 %v6633_v44, 16  ;;  %v8710_v3 = vcombine.low %v6042_v12, %v6046_v14  ;;  %v6665_v4 = vsel %vm6353_vm7, %v1324_v32, %v1325_v23 }
  0x7a   : > { %5676 = vmatprep.mubr.msk.bf16.mxu0 %vm658_vm3, %v4987_v51  ;;  %v8709_v51 = vcombine.low %v6308_v62, %v6315_v55  ;;  %v2050_v62 = vrot.slane %v2048_v20, 5  ;;  %v2090_v63 = vshrl.u32 %v6633_v44, 16  ;;  %v2036_v34 = vrot.slane %v2035_v6, 4 }
  0x7b   : > { %v2069_v55 = vor.u32 %v2068_v41, %v6644_v17  ;;  %v2079_v8 = vrot.slane %v2077_v13, 4  ;;  %v2082_v1 = vrot.slane %v2080_v45, 5  ;;  %v6673_v33 = vrot.slane %v2086_v11, 5  ;;  %v6679_v41 = vld [vmem:[%s6023_s23 + $0x38] sm:$0x1] }
  0x7c   : > { %5639 = vmatmul.mubr.msk.bf16.gmra.mxu1 %vm658_vm3, %v8709_v51  ;;  %v2046_v12 = vrot.slane %v2045_v28, 4  ;;  %v2060_v14 = vrot.slane %v2059_v56, 4  ;;  %v2074_v16 = vrot.slane %v2072_v50, 5  ;;  %v2092_v23 = vrot.slane %v2090_v63, 4  ;;  %v5088_v13 = vld [vmem:[%s6023_s23 + $0x3c] sm:$0xf] }
  0x7d   : > { %5642 = vmatprep.mubr.msk.bf16.mxu1 %vm658_vm3, %v8710_v3  ;;  %v2070_v15 = vrot.slane %v2069_v55, 4  ;;  %v2096_v32 = vshll.u32 %v6648_v21, 16  ;;  %v2101_v20 = vshrl.u32 %v5085_v52, 16  ;;  %v2104_v60 = vshll.u32 %v5085_v52, 16 }
  0x7e   : > { %v2083_v57 = vor.u32 %v2082_v1, %v2079_v8  ;;  %v2093_v6 = vor.u32 %v2092_v23, %v6673_v33  ;;  %v2110_v28 = vshll.u32 %v6671_v5, 16  ;;  %v2114_v56 = vshrl.u32 %v6671_v5, 16  ;;  %v5091_v8 = vld [vmem:[%s6023_s23 + $0x48] sm:$0xf]  ;;  %v6706_v1 = vld [vmem:[%s6023_s23 + $0x4c] sm:$0xf] }
  0x7f   : > { %v2103_v50 = vrot.slane %v2101_v20, 4  ;;  %v2106_v51 = vrot.slane %v2104_v60, 5  ;;  %v8711_v3 = vcombine.low %v6084_v53, %v6088_v58  ;;  %v4994_v55 = vcombine.low %v6656_v18, %v6665_v4 }
  0x80   : > { %v6685_v45 = vrot.slane %v2110_v28, 5  ;;  %v2116_v11 = vrot.slane %v2114_v56, 4  ;;  %v2051_v63 = vsel %vm6067_vm4, %v2046_v12, %v2050_v62  ;;  %v2065_v52 = vsel %vm6067_vm4, %v2060_v14, %v6644_v17 }
  0x81   : > { %5677 = vmatmul.mubr.msk.bf16.gmra.mxu0 %vm658_vm3, %v4988_v61  ;;  %v6688_v61 = vld [vmem:[%s6023_s23 + $0x40] sm:$0xf]  ;;  %v8712_v53 = vcombine.low %v6122_v35, %v6133_v46  ;;  %v2075_v58 = vsel %vm6067_vm4, %v2070_v15, %v2074_v16  ;;  %v2084_v23 = vrot.slane %v2083_v57, 4  ;;  %v2107_v20 = vor.u32 %v2106_v51, %v2103_v50  ;;  %v6740_v50 = vld [vmem:[%s6023_s23 + $0x44] sm:$0x1] }
  0x82   : > { %5680 = vmatprep.mubr.msk.bf16.mxu0 %vm658_vm3, %v4989_v40  ;;  %v2041_v40 = vsel %vm6067_vm4, %v2036_v34, %v6628_v30  ;;  %v2094_v30 = vrot.slane %v2093_v6, 4  ;;  %v2098_v34 = vrot.slane %v2096_v32, 5  ;;  %v2120_v62 = vshll.u32 %v6679_v41, 16  ;;  %v5094_v51 = vld [vmem:[%s6023_s23 + $0x54] sm:$0xf] }
  0x83   : > { %v2125_v12 = vshrl.u32 %v5088_v13, 16  ;;  %v2128_v17 = vshll.u32 %v5088_v13, 16  ;;  %v6717_v14 = vsel %vm707_vm0, %v6448_v22, 0  ;;  %v2117_v35 = vor.u32 %v2116_v11, %v6685_v45 }
  0x84   : > { %5643 = vmatmul.mubr.msk.bf16.gmra.mxu1 %vm658_vm3, %v8711_v3  ;;  %v2134_v46 = vshll.u32 %v6688_v61, 16  ;;  %v2138_v16 = vshrl.u32 %v6688_v61, 16  ;;  %v6722_v15 = vcombine.low %v2041_v40, %v2051_v63  ;;  %v6726_v32 = vsel %vm707_vm0, %v6420_v24, 0  ;;  %v6749_v40 = vld [vmem:[%s6023_s23 + $0x58] sm:$0xf] }
  0x85   : > { %5646 = vmatprep.mubr.msk.bf16.mxu1 %vm658_vm3, %v8712_v53  ;;  %v2149_v60 = vshrl.u32 %v5091_v8, 16  ;;  %v2152_v57 = vshll.u32 %v5091_v8, 16  ;;  %v8713_v6 = vcombine.low %v6535_v25, %v6545_v54  ;;  %v6732_v22 = vcombine.low %v2065_v52, %v2075_v58  ;;  %v6754_v8 = vld [vmem:[%s6023_s23 + $0x50] sm:$0x1] }
  0x86   : > { %v2089_v28 = vsel %vm6067_vm4, %v2084_v23, %v6673_v33  ;;  %v2099_v56 = vsel %vm6067_vm4, %v2094_v30, %v2098_v34  ;;  %v2158_v24 = vshll.u32 %v6706_v1, 16  ;;  %v8714_v25 = vcombine.low %v6549_v39, %v6559_v27  ;;  %v5097_v34 = vld [vmem:[%s6023_s23 + $0x60] sm:$0xf] }
  0x87   : > { %v2108_v54 = vrot.slane %v2107_v20, 4  ;;  %v2122_v13 = vrot.slane %v2120_v62, 5  ;;  %v2127_v11 = vrot.slane %v2125_v12, 4  ;;  %v2130_v3 = vrot.slane %v2128_v17, 5 }
  0x88   : > { %v2118_v33 = vrot.slane %v2117_v35, 4  ;;  %v6751_v63 = vrot.slane %v2134_v46, 5  ;;  %v2140_v52 = vrot.slane %v2138_v16, 4  ;;  %v2162_v53 = vshrl.u32 %v6706_v1, 16  ;;  %v6771_v35 = vld [vmem:[%s6023_s23 + $0x5c] sm:$0x1] }
  0x89   : > { %5681 = vmatmul.mubr.msk.bf16.gmra.mxu0 %vm658_vm3, %v8713_v6  ;;  %v8715_v39 = vcombine.low %v6172_v36, %v6179_v43  ;;  %v2151_v27 = vrot.slane %v2149_v60, 4  ;;  %v2154_v58 = vrot.slane %v2152_v57, 5  ;;  %v2173_v23 = vshrl.u32 %v5094_v51, 16 }
  0x8a   : > { %5684 = vmatprep.mubr.msk.bf16.mxu0 %vm658_vm3, %v8714_v25  ;;  %v2176_v30 = vshll.u32 %v5094_v51, 16  ;;  %v8716_v20 = vcombine.low %v8699_v2, %v8698_v10  ;;  %v6766_v62 = vcombine.low %v2089_v28, %v2099_v56  ;;  %v6768_v12 = vrot.slane %v2158_v24, 5  ;;  %v6784_v28 = vld [vmem:[%s6023_s23 + $0x64] sm:$0xf] }
  0x8b   : > { %v2164_v17 = vrot.slane %v2162_v53, 4  ;;  %v2182_v36 = vshll.u32 %v6749_v40, 16  ;;  %v2144_v43 = vshll.u32 %v6740_v50, 16  ;;  %v2175_v46 = vrot.slane %v2173_v23, 4 }
  0x8c   : > { %5647 = vmatmul.mubr.msk.bf16.gmra.mxu1 %vm658_vm3, %v8715_v39  ;;  %v2178_v16 = vrot.slane %v2176_v30, 5  ;;  %v2186_v60 = vshrl.u32 %v6749_v40, 16  ;;  %v2113_v10 = vsel %vm6067_vm4, %v2108_v54, %v6685_v45  ;;  %v2123_v2 = vsel %vm6067_vm4, %v2118_v33, %v2122_v13  ;;  %v6806_v30 = vld [vmem:[%s6023_s23 + $0x68] sm:$0x1] }
  0x8d   : > { %5650 = vmatprep.mubr.msk.bf16.mxu1 %vm658_vm3, %v8716_v20  ;;  %v2131_v57 = vor.u32 %v2130_v3, %v2127_v11  ;;  %v6781_v6 = vrot.slane %v2182_v36, 5  ;;  %v2141_v56 = vor.u32 %v2140_v52, %v6751_v63  ;;  %v2155_v24 = vor.u32 %v2154_v58, %v2151_v27  ;;  %v5100_v3 = vld [vmem:[%s6023_s23 + $0x6c] sm:$0xf]  ;;  %v6803_v27 = vld [vmem:[%s6023_s23 + $0x70] sm:$0xf] }
  0x8e   : > { %v2168_v51 = vshll.u32 %v6754_v8, 16  ;;  %v2188_v25 = vrot.slane %v2186_v60, 4  ;;  %v8717_v53 = vcombine.low %v6569_v19, %v6589_v9  ;;  %v2165_v45 = vor.u32 %v2164_v17, %v6768_v12 }
  0x8f   : > { %v2179_v54 = vor.u32 %v2178_v16, %v2175_v46  ;;  %v2197_v13 = vshrl.u32 %v5097_v34, 16  ;;  %v2200_v11 = vshll.u32 %v5097_v34, 16  ;;  %v8718_v33 = vcombine.low %v6581_v59, %v6605_v7  ;;  %v5103_v16 = vld [vmem:[%s6023_s23 + $0x78] sm:$0xf] }
  0x90   : > { %v2189_v52 = vor.u32 %v2188_v25, %v6781_v6  ;;  %v2192_v39 = vshll.u32 %v6771_v35, 16  ;;  %v2206_v19 = vshll.u32 %v6784_v28, 16  ;;  %v2210_v9 = vshrl.u32 %v6784_v28, 16 }
  0x91   : > { %5685 = vmatmul.mubr.msk.bf16.gmra.mxu0 %vm658_vm3, %v8717_v53  ;;  %v2132_v58 = vrot.slane %v2131_v57, 4  ;;  %v2146_v23 = vrot.slane %v2144_v43, 5  ;;  %v2199_v34 = vrot.slane %v2197_v13, 4  ;;  %v2202_v20 = vrot.slane %v2200_v11, 5 }
  0x92   : > { %5688 = vmatprep.mubr.msk.bf16.mxu0 %vm658_vm3, %v8718_v33  ;;  %v8719_v59 = vcombine.low %v8702_v26, %v8701_v38  ;;  %v6812_v7 = vcombine.low %v2113_v10, %v2123_v2  ;;  %v2142_v17 = vrot.slane %v2141_v56, 4  ;;  %v2156_v36 = vrot.slane %v2155_v24, 4  ;;  %v6822_v2 = vld [vmem:[%s6023_s23 + $0x7c] sm:$0xf] }
  0x93   : > { %v6814_v46 = vrot.slane %v2206_v19, 5  ;;  %v8720_v43 = vcombine.low %v8705_v42, %v8704_v48  ;;  %v2166_v60 = vrot.slane %v2165_v45, 4  ;;  %v2170_v57 = vrot.slane %v2168_v51, 5  ;;  %8721 = vst [vmem:[#allocation3_spill] sm:$0xff] %v6822_v2  ;;  %v5106_v19 = vld [vmem:[%s6023_s23 + $0x84] sm:$0xf] }
  0x94   : > { %5651 = vmatmul.mubr.msk.bf16.gmra.mxu1 %vm658_vm3, %v8719_v59  ;;  %v2180_v25 = vrot.slane %v2179_v54, 4  ;;  %v2212_v38 = vrot.slane %v2210_v9, 4  ;;  %v2190_v26 = vrot.slane %v2189_v52, 4  ;;  %v2194_v53 = vrot.slane %v2192_v39, 5 }
  0x95   : > { %5654 = vmatprep.mubr.msk.bf16.mxu1 %vm658_vm3, %v8720_v43  ;;  %v2203_v13 = vor.u32 %v2202_v20, %v2199_v34  ;;  %v2221_v10 = vshrl.u32 %v5100_v3, 16  ;;  %v2137_v56 = vsel %vm6067_vm4, %v2132_v58, %v6751_v63  ;;  %v2224_v24 = vshll.u32 %v5100_v3, 16  ;;  %v5933_v63 = vld [vmem:[%s6023_s23 + $0xc] sm:$0xff]   ;;  %v6856_v34 = vld [vmem:[%s6023_s23 + $0x88] sm:$0xf] }
  0x96   : > { %v2230_v48 = vshll.u32 %v6803_v27, 16  ;;  %v2234_v42 = vshrl.u32 %v6803_v27, 16  ;;  %v2147_v51 = vsel %vm6067_vm4, %v2142_v17, %v2146_v23  ;;  %v2161_v45 = vsel %vm6067_vm4, %v2156_v36, %v6768_v12  ;;  %8722 = vst [vmem:[#allocation5_spill] sm:$0xff] %v6856_v34  ;;  %v6865_v36 = vld [vmem:[%s6023_s23 + $0x74] sm:$0x1] }
  0x97   : > { %v2213_v54 = vor.u32 %v2212_v38, %v6814_v46  ;;  %v2216_v11 = vshll.u32 %v6806_v30, 16  ;;  %v2171_v3 = vsel %vm6067_vm4, %v2166_v60, %v2170_v57  ;;  %v2185_v33 = vsel %vm6067_vm4, %v2180_v25, %v6781_v6  ;;  %8724 = vst [vmem:[#allocation4_spill] sm:$0xff] %v6865_v36  ;;  %v6875_v38 = vld [vmem:[%s6023_s23 + $0x80] sm:$0x1] }
  0x98   : > { %v2245_v52 = vshrl.u32 %v5103_v16, 16  ;;  %v2248_v12 = vshll.u32 %v5103_v16, 16  ;;  %v2195_v18 = vsel %vm6067_vm4, %v2190_v26, %v2194_v53  ;;  %v2204_v4 = vrot.slane %v2203_v13, 4  ;;  %8725 = vst [vmem:[#allocation6_spill] sm:$0xff] %v6875_v38  ;;  %v6878_v26 = vld [vmem:[%s6023_s23 + $0x8c] sm:$0x1] }
  0x99   : > { %5689 = vmatmul.mubr.msk.bf16.gmra.mxu0 %vm658_vm3, %v4994_v55  ;;  %v2223_v55 = vrot.slane %v2221_v10, 4  ;;  %v2254_v39 = vshll.u32 %v6822_v2, 16  ;;  %v2226_v9 = vrot.slane %v2224_v24, 5  ;;  %v6852_v58 = vrot.slane %v2230_v48, 5  ;;  %8726 = vst [vmem:[#allocation8_spill] sm:$0xff] %v6878_v26  ;;  %v5934_v10 = vld [vmem:[%s6023_s23 + $0x18] sm:$0xff]  }
  0x9a   : > { %5728 = vmatprep.mubr.msk.bf16.mxu0 %vm658_vm3, %v6722_v15  ;;  %v2236_v23 = vrot.slane %v2234_v42, 4  ;;  %v2258_v6 = vshrl.u32 %v6822_v2, 16  ;;  %v8723_v15 = vcombine.low %v8707_v29, %v6332_v37  ;;  %v6862_v20 = vcombine.low %v2137_v56, %v2147_v51  ;;  %v5109_v51 = vld [vmem:[%s6023_s23 + $0x90] sm:$0xf] }
  0x9b   : > { %v2214_v59 = vrot.slane %v2213_v54, 4  ;;  %v2218_v17 = vrot.slane %v2216_v11, 5  ;;  %v2247_v16 = vrot.slane %v2245_v52, 4  ;;  %v2250_v43 = vrot.slane %v2248_v12, 5 }
  0x9c   : > { %5655 = vmatmul.mubr.msk.bf16.gmra.mxu1 %vm658_vm3, %v8723_v15  ;;  %v6868_v60 = vrot.slane %v2254_v39, 5  ;;  %v2260_v57 = vrot.slane %v2258_v6, 4  ;;  %v2269_v25 = vshrl.u32 %v5106_v19, 16  ;;  %v6870_v37 = vcombine.low %v2161_v45, %v2171_v3  ;;  %v6889_v45 = vld [vmem:[%s6023_s23 + $0x94] sm:$0xf] }
  0x9d   : > { %5694 = vmatprep.mubr.msk.bf16.mxu1 %vm658_vm3, %v5933_v63  ;;  %v6872_v29 = vcombine.low %v2185_v33, %v2195_v18  ;;  %v2272_v53 = vshll.u32 %v5106_v19, 16  ;;  %v2278_v13 = vshll.u32 %v6856_v34, 16  ;;  %v2209_v56 = vsel %vm6067_vm4, %v2204_v4, %v6814_v46  ;;  %8727 = vst [vmem:[#allocation7_spill] sm:$0xff] %v6889_v45  ;;  %v6897_v33 = vld [vmem:[%s8641_s1 + $0x10] sm:$0x3]  ;;  %v5935_v46 = vld [vmem:[%s6023_s23 + $0x24] sm:$0xff]  }
  0x9e   : > { %v2227_v24 = vor.u32 %v2226_v9, %v2223_v55  ;;  %v2237_v48 = vor.u32 %v2236_v23, %v6852_v58  ;;  %v2240_v42 = vshll.u32 %v6865_v36, 16  ;;  %v2271_v54 = vrot.slane %v2269_v25, 4  ;;  %8728 = vst [vmem:[#allocation9_spill] sm:$0xff] %v6897_v33 }
  0x9f   : > { %v2274_v11 = vrot.slane %v2272_v53, 5  ;;  %v6891_v63 = vrot.slane %v2278_v13, 5  ;;  %v2282_v3 = vshrl.u32 %v6856_v34, 16  ;;  %v2219_v52 = vsel %vm6067_vm4, %v2214_v59, %v2218_v17 }
  0xa0   : > { %v2251_v12 = vor.u32 %v2250_v43, %v2247_v16  ;;  %v2261_v18 = vor.u32 %v2260_v57, %v6868_v60  ;;  %v2264_v4 = vshll.u32 %v6875_v38, 16  ;;  %v2293_v19 = vshrl.u32 %v5109_v51, 16  ;;  %v6931_v57 = vld [vmem:[%s6023_s23 + $0xa0] sm:$0xf] }
  0xa1   : > { %5729 = vmatmul.mubr.msk.bf16.vlgmr.msra.gmra.mxu0 %vm658_vm3, %v6732_v22  ;;  %v2275_v55 = vor.u32 %v2274_v11, %v2271_v54  ;;  %v2284_v39 = vrot.slane %v2282_v3, 4  ;;  %v2296_v9 = vshll.u32 %v5109_v51, 16  ;;  %v5112_v22 = vld [vmem:[%s6023_s23 + $0x9c] sm:$0xf]  ;;  %v6910_v23 = vrot.slane %v2227_v24, 4  ;;  %8730 = vst [vmem:[#allocation10_spill] sm:$0xff] %v6931_v57 }
  0xa2   : > { %5795 = vmatpush3.bf16.msra.mxu0 %v6726_v32  ;;  %5732 = vmatprep.mubr.msk.bf16.mxu0 %vm658_vm3, %v6766_v62  ;;  %v6912_v6 = vrot.slane %v2240_v42, 5  ;;  %v2288_v15 = vshll.u32 %v6878_v26, 16  ;;  %v2302_v59 = vshll.u32 %v6889_v45, 16  ;;  %v6919_v32 = vld [vmem:[%s8641_s1 + $0xe] sm:$0x3]  ;;  %v6924_v62 = vcombine.low %v2209_v56, %v2219_v52 }
  0xa3   : > { %8729 = vst [vmem:[#allocation11_spill] sm:$0xff] %v6919_v32  ;;  %5907 = vmatprep.subr.msk.bf16.mxu0 %vm707_vm0, %v6897_v33  ;;  %v6926_v17 = vrot.slane %v2237_v48, 4  ;;  %v2285_v16 = vor.u32 %v2284_v39, %v6891_v63  ;;  %v2306_v43 = vshrl.u32 %v6889_v45, 16  ;;  %v6935_v25 = vrot.slane %v2251_v12, 4  ;;  %v6944_v56 = vld [vmem:[%s6023_s23 + $0x98] sm:$0x1] }
  0xa4   : > { %5695 = vmatmul.mubr.msk.bf16.vlgmr.msra.gmra.mxu1 %vm658_vm3, %v5934_v10  ;;  %v6937_v53 = vrot.slane %v2261_v18, 4  ;;  %v6939_v13 = vrot.slane %v2264_v4, 5  ;;  %v6941_v10 = vrot.slane %v2275_v55, 4  ;;  %8731 = vst [vmem:[#allocation12_spill] sm:$0xff] %v6944_v56  ;;  %v2295_v24 = vrot.slane %v2293_v19, 4  ;;  %v5937_v19 = vld [vmem:[%s6023_s23 + $0x3c] sm:$0xff]  }
  0xa5   : > { %5761 = vmatpush3.bf16.msra.mxu1 %v6717_v14  ;;  %5698 = vmatprep.mubr.msk.bf16.mxu1 %vm658_vm3, %v5935_v46  ;;  %v2298_v48 = vrot.slane %v2296_v9, 5  ;;  %v2317_v42 = vshrl.u32 %v5112_v22, 16  ;;  %v2320_v51 = vshll.u32 %v5112_v22, 16  ;;  %v5936_v14 = vld [vmem:[%s6023_s23 + $0x30] sm:$0xff]   ;;  %v6953_v11 = vrot.slane %v2288_v15, 5 }
  0xa6   : > { %5906 = vmatprep.subr.msk.bf16.mxu1 %vm707_vm0, %v6919_v32  ;;  %v6955_v3 = vrot.slane %v2302_v59, 5  ;;  %v2326_v46 = vshll.u32 %v6931_v57, 16  ;;  %v5115_v52 = vld [vmem:[%s6023_s23 + $0xa8] sm:$0xf]  ;;  %v6959_v12 = vrot.slane %v2285_v16, 4  ;;  %v2308_v18 = vrot.slane %v2306_v43, 4 }
  0xa7   : > { %v2312_v4 = vshll.u32 %v6944_v56, 16  ;;  %v2330_v55 = vshrl.u32 %v6931_v57, 16  ;;  %v6964_v39 = vld [vmem:[%s6023_s23 + $0xac] sm:$0xf]  ;;  %v2299_v59 = vor.u32 %v2298_v48, %v2295_v24  ;;  %v6988_v16 = vld [vmem:[%s6023_s23 + $0xa4] sm:$0x1] }
  0xa8   : > { %8732 = vst [vmem:[#allocation13_spill] sm:$0xff] %v6964_v39  ;;  %8733 = vst [vmem:[#allocation2_spill] sm:$0xff] %v6988_v16  ;;  %v2319_v43 = vrot.slane %v2317_v42, 4  ;;  %v2322_v22 = vrot.slane %v2320_v51, 5  ;;  %v2341_v54 = vshrl.u32 %v5115_v52, 16  ;;  %v6990_v9 = vrot.slane %v2326_v46, 5 }
  0xa9   : > { %5733 = vmatmul.mubr.msk.bf16.gmra.mxu0 %vm658_vm3, %v6812_v7  ;;  %v2332_v32 = vrot.slane %v2330_v55, 4  ;;  %v2344_v15 = vshll.u32 %v5115_v52, 16  ;;  %v2350_v33 = vshll.u32 %v6964_v39, 16  ;;  %v5118_v57 = vld [vmem:[%s6023_s23 + $0xb4] sm:$0xf]  ;;  %v2309_v24 = vor.u32 %v2308_v18, %v6955_v3 }
  0xaa   : > { %5736 = vmatprep.mubr.msk.bf16.mxu0 %vm658_vm3, %v6862_v20  ;;  %v2291_v20 = vsel %vm6067_vm4, %v6959_v12, %v6953_v11  ;;  %v7000_v48 = vrot.slane %v2312_v4, 5  ;;  %v7003_v42 = vld [vmem:[%s6023_s23 + $0xb0] sm:$0x1]  ;;  %v2343_v51 = vrot.slane %v2341_v54, 4  ;;  %v7006_v46 = vld [vmem:[%s6023_s23 + $0xb8] sm:$0xf]  ;;  %v2323_v18 = vor.u32 %v2322_v22, %v2319_v43 }
  0xab   : > { %8734 = vst [vmem:[#allocation14_spill] sm:$0xff] %v7003_v42  ;;  %8735 = vst [vmem:[#allocation15_spill] sm:$0xff] %v7006_v46  ;;  %v2346_v52 = vrot.slane %v2344_v15, 5  ;;  %v7010_v55 = vrot.slane %v2350_v33, 5  ;;  %v2354_v11 = vshrl.u32 %v6964_v39, 16  ;;  %v7013_v12 = vrot.slane %v2299_v59, 4 }
  0xac   : > { %5699 = vmatmul.mubr.msk.bf16.gmra.mxu1 %vm658_vm3, %v5936_v14  ;;  %v2336_v14 = vshll.u32 %v6988_v16, 16  ;;  %v7016_v4 = vld [vmem:[%s6023_s23 + $0xbc] sm:$0x1]  ;;  %v2365_v54 = vshrl.u32 %v5118_v57, 16  ;;  %v2368_v7 = vshll.u32 %v5118_v57, 16  ;;  %v2333_v56 = vor.u32 %v2332_v32, %v6990_v9  ;;  %v5938_v16 = vld [vmem:[%s6023_s23 + $0x48] sm:$0xff]  }
  0xad   : > { %5702 = vmatprep.mubr.msk.bf16.mxu1 %vm658_vm3, %v5937_v19  ;;  %v2356_v45 = vrot.slane %v2354_v11, 4  ;;  %v2360_v19 = vshll.u32 %v7003_v42, 16  ;;  %v2374_v15 = vshll.u32 %v7006_v46, 16  ;;  %v5121_v33 = vld [vmem:[%s6023_s23 + $0xc0] sm:$0xf]  ;;  %v2347_v26 = vor.u32 %v2346_v52, %v2343_v51  ;;  %v5939_v57 = vld [vmem:[%s6023_s23 + $0x54] sm:$0xff]  }
  0xae   : > { %v2367_v39 = vrot.slane %v2365_v54, 4  ;;  %v2370_v34 = vrot.slane %v2368_v7, 5  ;;  %v2378_v59 = vshrl.u32 %v7006_v46, 16  ;;  %v7025_v22 = vld [vmem:[%s6023_s23 + $0xc4] sm:$0xf]  ;;  %v2310_v43 = vrot.slane %v2309_v24, 4 }
  0xaf   : > { %v2338_v32 = vrot.slane %v2336_v14, 5  ;;  %v2357_v11 = vor.u32 %v2356_v45, %v7010_v55  ;;  %v2376_v42 = vrot.slane %v2374_v15, 5  ;;  %v2384_v7 = vshll.u32 %v7016_v4, 16  ;;  %v7037_v45 = vld [vmem:[%s6023_s23 + $0xc8] sm:$0x1] }
  0xb0   : > { %v2371_v51 = vor.u32 %v2370_v34, %v2367_v39  ;;  %v2380_v52 = vrot.slane %v2378_v59, 4  ;;  %v2389_v54 = vshrl.u32 %v5121_v33, 16  ;;  %v2324_v46 = vrot.slane %v2323_v18, 4 }
  0xb1   : > { %5737 = vmatmul.mubr.msk.bf16.gmra.mxu0 %vm658_vm3, %v6870_v37  ;;  %v2334_v38 = vrot.slane %v2333_v56, 4  ;;  %v2392_v2 = vshll.u32 %v5121_v33, 16  ;;  %v2398_v37 = vshll.u32 %v7025_v22, 16  ;;  %v2348_v24 = vrot.slane %v2347_v26, 4 }
  0xb2   : > { %5740 = vmatprep.mubr.msk.bf16.mxu0 %vm658_vm3, %v6872_v29  ;;  %v2362_v14 = vrot.slane %v2360_v19, 5  ;;  %v2381_v36 = vor.u32 %v2380_v52, %v2376_v42  ;;  %v2391_v15 = vrot.slane %v2389_v54, 4  ;;  %v2358_v34 = vrot.slane %v2357_v11, 4 }
  0xb3   : > { %v2394_v29 = vrot.slane %v2392_v2, 5  ;;  %v7040_v39 = vrot.slane %v2398_v37, 5  ;;  %v2402_v56 = vshrl.u32 %v7025_v22, 16  ;;  %v8736_v26 = vsel %vm6067_vm4, %v6926_v17, %v6912_v6 }
  0xb4   : > { %5703 = vmatmul.mubr.msk.bf16.gmra.mxu1 %vm658_vm3, %v5938_v16  ;;  %v8737_v16 = vsel %vm6067_vm4, %v6910_v23, %v6852_v58  ;;  %v2372_v19 = vrot.slane %v2371_v51, 4  ;;  %v2382_v33 = vrot.slane %v2381_v36, 4  ;;  %v2386_v2 = vrot.slane %v2384_v7, 5  ;;  %v5940_v23 = vld [vmem:[%s6023_s23 + $0x60] sm:$0xff]  }
  0xb5   : > { %5706 = vmatprep.mubr.msk.bf16.mxu1 %vm658_vm3, %v5939_v57  ;;  %v5133_v18 = vcombine.low %v8737_v16, %v8736_v26  ;;  %v8738_v59 = vsel %vm6067_vm4, %v6937_v53, %v6939_v13  ;;  %v8739_v6 = vsel %vm6067_vm4, %v6935_v25, %v6868_v60  ;;  %v2395_v57 = vor.u32 %v2394_v29, %v2391_v15  ;;  %v5159_v13 = vld [vmem:[%s6023_s23 + $0x24] sm:$0xe]  ;;  %v5162_v26 = vld [vmem:[%s6023_s23 + $0x48] sm:$0xe] }
  0xb6   : > { %v5134_v17 = vcombine.low %v8739_v6, %v8738_v59  ;;  %v2404_v11 = vrot.slane %v2402_v56, 4  ;;  %v2408_v58 = vshll.u32 %v7037_v45, 16  ;;  %v8740_v36 = vsel %vm6067_vm4, %v6941_v10, %v6891_v63  ;;  %v5941_v63 = vld [vmem:[%s6023_s23 + $0x6c] sm:$0xff]   ;;  %v5163_v6 = vld [vmem:[%s6023_s23 + $0x54] sm:$0xe] }
  0xb7   : > { %v5135_v51 = vcombine.low %v8740_v36, %v2291_v20  ;;  %v2305_v53 = vsel %vm6067_vm4, %v7013_v12, %v6955_v3  ;;  %v2315_v60 = vsel %vm6067_vm4, %v2310_v43, %v7000_v48  ;;  %v2329_v25 = vsel %vm6067_vm4, %v2324_v46, %v6990_v9  ;;  %v7093_v12 = vld [vmem:[%s6023_s23 + $0xc] sm:$0xe] }
  0xb8   : > { %v2339_v10 = vsel %vm6067_vm4, %v2334_v38, %v2338_v32  ;;  %v2353_v3 = vsel %vm6067_vm4, %v2348_v24, %v7010_v55  ;;  %v2363_v20 = vsel %vm6067_vm4, %v2358_v34, %v2362_v14  ;;  %v2405_v48 = vor.u32 %v2404_v11, %v7040_v39  ;;  %v5160_v55 = vld [vmem:[%s6023_s23 + $0x30] sm:$0xe]  ;;  %v5161_v14 = vld [vmem:[%s6023_s23 + $0x3c] sm:$0xe] }
  0xb9   : > { %5741 = vmatmul.mubr.msk.bf16.gmra.mxu0 %vm658_vm3, %v6924_v62  ;;  %v2377_v62 = vsel %vm6067_vm4, %v2372_v19, %v2376_v42  ;;  %v2387_v38 = vsel %vm6067_vm4, %v2382_v33, %v2386_v2  ;;  %v7100_v9 = vrot.slane %v2395_v57, 4  ;;  %v2772_v46 = vrot.slane %v6584_v49, 5  ;;  %v5942_v57 = vld [vmem:[%s6023_s23 + $0x78] sm:$0xff]  }
  0xba   : > { %5744 = vmatprep.mubr.msk.bf16.mxu0 %vm658_vm3, %v5133_v18  ;;  %v7104_v43 = vcombine.low %v2305_v53, %v2315_v60  ;;  %v7106_v32 = vrot.slane %v2405_v48, 4  ;;  %v7108_v52 = vrot.slane %v2408_v58, 5  ;;  %v5175_v7 = vrot.slane %v5159_v13, 9  ;;  %v5943_v53 = vld [vmem:[%s6023_s23 + $0x84] sm:$0xff]   ;;  %v5164_v13 = vld [vmem:[%s6023_s23 + $0x60] sm:$0xe] }
  0xbb   : > { %v7111_v54 = vcombine.low %v2329_v25, %v2339_v10  ;;  %v7113_v42 = vcombine.low %v2353_v3, %v2363_v20  ;;  %v5173_v37 = vrot.slane %v7093_v12, 9  ;;  %v2786_v24 = vrot.slane %v6633_v44, 5  ;;  %v5949_v49 = vld [vmem:[%s6023_s23 + $0x18] sm:$0xff]  }
  0xbc   : > { %5707 = vmatmul.mubr.msk.bf16.gmra.mxu1 %vm658_vm3, %v5940_v23  ;;  %v7119_v15 = vcombine.low %v2377_v62, %v2387_v38  ;;  %v2775_v34 = vrot.slane %v6620_v47, 5  ;;  %v2789_v29 = vrot.slane %v6648_v21, 5  ;;  %v5176_v56 = vrot.slane %v5160_v55, 9  ;;  %v5166_v55 = vld [vmem:[%s6023_s23 + $0x78] sm:$0xe] }
  0xbd   : > { %5710 = vmatprep.mubr.msk.bf16.mxu1 %vm658_vm3, %v5941_v63  ;;  %v2401_v16 = vsel %vm6067_vm4, %v7100_v9, %v7040_v39  ;;  %v7130_v44 = vrot.slane %v2772_v46, 4  ;;  %v7134_v18 = vsel %vm6353_vm7, %v5175_v7, %v2786_v24  ;;  %v2788_v19 = vrot.slane %v2786_v24, 4 }
  0xbe   : > { %v2411_v21 = vsel %vm6067_vm4, %v7106_v32, %v7108_v52  ;;  %v2793_v33 = vrot.slane %v6671_v5, 5  ;;  %v2796_v2 = vrot.slane %v6679_v41, 5  ;;  %v5177_v59 = vrot.slane %v5161_v14, 9  ;;  %v5948_v52 = vld [vmem:[%s6023_s23 + $0xc0] sm:$0xff]  }
  0xbf   : > { %v7146_v11 = vsel %vm6353_vm7, %v2788_v19, %v2789_v29  ;;  %v2800_v58 = vrot.slane %v6688_v61, 5  ;;  %v2803_v23 = vrot.slane %v6740_v50, 5  ;;  %v5178_v36 = vrot.slane %v5162_v26, 9  ;;  %v5167_v19 = vld [vmem:[%s6023_s23 + $0x84] sm:$0xe] }
  0xc0   : > { %v5192_v5 = vcombine.low %v7134_v18, %v7146_v11  ;;  %v7156_v41 = vsel %vm6353_vm7, %v5176_v56, %v2793_v33  ;;  %v2795_v60 = vrot.slane %v2793_v33, 4  ;;  %v2807_v25 = vrot.slane %v6706_v1, 5 }
  0xc1   : > { %5745 = vmatmul.mubr.msk.bf16.gmra.mxu0 %vm658_vm3, %v5134_v17  ;;  %v7163_v61 = vsel %vm6353_vm7, %v5177_v59, %v2800_v58  ;;  %v2802_v50 = vrot.slane %v2800_v58, 4  ;;  %v2810_v17 = vrot.slane %v6754_v8, 5  ;;  %v5179_v63 = vrot.slane %v5163_v6, 9  ;;  %v8741_v59 = vld [vmem:[#allocation4_spill] sm:$0xff] }
  0xc2   : > { %5748 = vmatprep.mubr.msk.bf16.mxu0 %vm658_vm3, %v5135_v51  ;;  %v7168_v10 = vsel %vm6353_vm7, %v2795_v60, %v2796_v2  ;;  %v7172_v3 = vsel %vm6353_vm7, %v5178_v36, %v2807_v25  ;;  %v2809_v1 = vrot.slane %v2807_v25, 4  ;;  %v2814_v20 = vrot.slane %v6749_v40, 5  ;;  %v5165_v51 = vld [vmem:[%s6023_s23 + $0x6c] sm:$0xe]  ;;  %v5944_v58 = vld [vmem:[%s6023_s23 + $0x90] sm:$0xff]  }
  0xc3   : > { %v5193_v48 = vcombine.low %v7156_v41, %v7168_v10  ;;  %v7181_v8 = vsel %vm6353_vm7, %v2802_v50, %v2803_v23  ;;  %v2817_v62 = vrot.slane %v6771_v35, 5  ;;  %v5180_v38 = vrot.slane %v5164_v13, 9  ;;  %v8742_v36 = vld [vmem:[#allocation3_spill] sm:$0xff]  ;;  %v5168_v60 = vld [vmem:[%s6023_s23 + $0x90] sm:$0xe]  ;;  %v8743_v50 = vld [vmem:[#allocation6_spill] sm:$0xff] }
  0xc4   : > { %5711 = vmatmul.mubr.msk.bf16.gmra.mxu1 %vm658_vm3, %v5942_v57  ;;  %v5194_v40 = vcombine.low %v7163_v61, %v7181_v8  ;;  %v7190_v7 = vsel %vm6353_vm7, %v2809_v1, %v2810_v17  ;;  %v7194_v24 = vsel %vm6353_vm7, %v5179_v63, %v2814_v20  ;;  %v2816_v14 = vrot.slane %v2814_v20, 4 }
  0xc5   : > { %5714 = vmatprep.mubr.msk.bf16.mxu1 %vm658_vm3, %v5943_v53  ;;  %v5195_v35 = vcombine.low %v7172_v3, %v7190_v7  ;;  %v2821_v29 = vrot.slane %v6784_v28, 5  ;;  %v2824_v56 = vrot.slane %v6806_v30, 5  ;;  %v5181_v26 = vrot.slane %v5165_v51, 9  ;;  %v8744_v51 = vld [vmem:[#allocation5_spill] sm:$0xff]  ;;  %v5299_v3 = vld [vmem:[%s6023_s23 + $0x48] sm:$0xf] }
  0xc6   : > { %v7203_v33 = vsel %vm6353_vm7, %v2816_v14, %v2817_v62  ;;  %v2828_v2 = vrot.slane %v6803_v27, 5  ;;  %v2831_v6 = vrot.slane %v8741_v59, 5  ;;  %v5182_v57 = vrot.slane %v5166_v55, 9  ;;  %v5945_v27 = vld [vmem:[%s6023_s23 + $0x9c] sm:$0xff]   ;;  %v8752_v55 = vld [vmem:[#allocation15_spill] sm:$0xff] }
  0xc7   : > { %v5196_v23 = vcombine.low %v7194_v24, %v7203_v33  ;;  %v7212_v28 = vsel %vm6353_vm7, %v5180_v38, %v2821_v29  ;;  %v2823_v30 = vrot.slane %v2821_v29, 4  ;;  %v2835_v53 = vrot.slane %v8742_v36, 5  ;;  %v5169_v38 = vld [vmem:[%s6023_s23 + $0x9c] sm:$0xe]  ;;  %v8747_v36 = vld [vmem:[#allocation12_spill] sm:$0xff] }
  0xc8   : > { %v7221_v25 = vsel %vm6353_vm7, %v5181_v26, %v2828_v2  ;;  %v2830_v13 = vrot.slane %v2828_v2, 4  ;;  %v2838_v17 = vrot.slane %v8743_v50, 5  ;;  %v5183_v63 = vrot.slane %v5167_v19, 9  ;;  %v5170_v26 = vld [vmem:[%s6023_s23 + $0xa8] sm:$0xe] }
  0xc9   : > { %5749 = vmatmul.mubr.msk.bf16.gmra.mxu0 %vm658_vm3, %v7104_v43  ;;  %v7228_v1 = vsel %vm6353_vm7, %v2823_v30, %v2824_v56  ;;  %v7232_v43 = vsel %vm6353_vm7, %v5182_v57, %v2835_v53  ;;  %v2837_v20 = vrot.slane %v2835_v53, 4  ;;  %v2842_v62 = vrot.slane %v8744_v51, 5  ;;  %v5172_v57 = vld [vmem:[%s6023_s23 + $0xc0] sm:$0xe]  ;;  %v5946_v19 = vld [vmem:[%s6023_s23 + $0xa8] sm:$0xff]  }
  0xca   : > { %5752 = vmatprep.mubr.msk.bf16.mxu0 %vm658_vm3, %v7111_v54  ;;  %v7240_v14 = vsel %vm6353_vm7, %v2830_v13, %v2831_v6  ;;  %v8745_v54 = vld [vmem:[#allocation8_spill] sm:$0xff]  ;;  %v5184_v56 = vrot.slane %v5168_v60, 9  ;;  %v2852_v53 = vrot.slane %v8747_v36, 5  ;;  %v5185_v60 = vrot.slane %v5169_v38, 9  ;;  %v8750_v38 = vld [vmem:[#allocation13_spill] sm:$0xff] }
  0xcb   : > { %v2845_v29 = vrot.slane %v8745_v54, 5  ;;  %v7249_v2 = vsel %vm6353_vm7, %v2837_v20, %v2838_v17  ;;  %v7253_v59 = vsel %vm6353_vm7, %v5183_v63, %v2842_v62  ;;  %v2844_v6 = vrot.slane %v2842_v62, 4  ;;  %v5171_v13 = vld [vmem:[%s6023_s23 + $0xb4] sm:$0xe]  ;;  %v8748_v17 = vld [vmem:[#allocation10_spill] sm:$0xff] }
  0xcc   : > { %5715 = vmatmul.mubr.msk.bf16.gmra.mxu1 %vm658_vm3, %v5944_v58  ;;  %v8746_v58 = vld [vmem:[#allocation7_spill] sm:$0xff]  ;;  %v2856_v63 = vrot.slane %v8748_v17, 5  ;;  %v8749_v20 = vld [vmem:[#allocation2_spill] sm:$0xff]  ;;  %v5186_v62 = vrot.slane %v5170_v26, 9  ;;  %v2863_v36 = vrot.slane %v8750_v38, 5  ;;  %v5187_v26 = vrot.slane %v5171_v13, 9 }
  0xcd   : > { %5718 = vmatprep.mubr.msk.bf16.mxu1 %vm658_vm3, %v5945_v27  ;;  %v2849_v30 = vrot.slane %v8746_v58, 5  ;;  %v7263_v50 = vsel %vm6353_vm7, %v2844_v6, %v2845_v29  ;;  %v2859_v51 = vrot.slane %v8749_v20, 5  ;;  %v8751_v17 = vld [vmem:[#allocation14_spill] sm:$0xff]  ;;  %v5947_v27 = vld [vmem:[%s6023_s23 + $0xb4] sm:$0xff]   ;;  %v2776_v39 = vsel %vm6353_vm7, %v7130_v44, %v2775_v34  ;;  %v7480_v7 = vld [vmem:[%s6023_s23 + $0x4c] sm:$0xf] }
  0xce   : > { %v7278_v29 = vsel %vm6353_vm7, %v5185_v60, %v2856_v63  ;;  %v2858_v6 = vrot.slane %v2856_v63, 4  ;;  %v2866_v20 = vrot.slane %v8751_v17, 5  ;;  %v2865_v38 = vrot.slane %v2863_v36, 4  ;;  %v5966_v44 = vld [vmem:[%s6023_s23 + $0x20] sm:$0x1] }
  0xcf   : > { %v7271_v54 = vsel %vm6353_vm7, %v5184_v56, %v2849_v30  ;;  %v2851_v58 = vrot.slane %v2849_v30, 4  ;;  %v7290_v30 = vsel %vm6353_vm7, %v5186_v62, %v2863_v36  ;;  %v2870_v60 = vrot.slane %v8752_v55, 5 }
  0xd0   : > { %v5188_v63 = vrot.slane %v5172_v57, 9  ;;  %v7306_v55 = vsel %vm6353_vm7, %v2865_v38, %v2866_v20  ;;  %v2877_v57 = vrot.slane %v7025_v22, 5  ;;  %v2773_v22 = vsel %vm6353_vm7, %v5173_v37, %v2772_v46  ;;  %v5951_v38 = vld [vmem:[%s6023_s23 + $0x30] sm:$0xff]  }
  0xd1   : > { %5753 = vmatmul.mubr.msk.bf16.gmra.mxu0 %vm658_vm3, %v7113_v42  ;;  %v7286_v56 = vsel %vm6353_vm7, %v2851_v58, %v2852_v53  ;;  %v7299_v42 = vsel %vm6353_vm7, %v2858_v6, %v2859_v51  ;;  %v2873_v53 = vrot.slane %v7016_v4, 5  ;;  %v2872_v58 = vrot.slane %v2870_v60, 4 }
  0xd2   : > { %5756 = vmatprep.mubr.msk.bf16.mxu0 %vm658_vm3, %v7119_v15  ;;  %v7310_v15 = vsel %vm6353_vm7, %v5187_v26, %v2870_v60  ;;  %v2880_v51 = vrot.slane %v7037_v45, 5  ;;  %v5158_v45 = vld [vmem:[%s6023_s23 + $0x18] sm:$0xe]  ;;  %v7350_v9 = vsel %vm6353_vm7, %v5188_v63, %v2877_v57  ;;  %v2879_v46 = vrot.slane %v2877_v57, 4  ;;  %v5950_v26 = vld [vmem:[%s6023_s23 + $0x24] sm:$0xff]  }
  0xd3   : > { %v7338_v32 = vsel %vm6353_vm7, %v2872_v58, %v2873_v53  ;;  %v5174_v37 = vrot.slane %v5158_v45, 9  ;;  %v5190_v34 = vcombine.low %v2773_v22, %v2776_v39  ;;  %v8753_v60 = vld [vmem:[#allocation9_spill] sm:$0xff] }
  0xd4   : > { %5719 = vmatmul.mubr.msk.bf16.gmra.mxu1 %vm658_vm3, %v5946_v19  ;;  %v5140_v19 = vcombine.low %v2401_v16, %v2411_v21  ;;  %v7355_v47 = vsel %vm6353_vm7, %v2879_v46, %v2880_v51  ;;  %v2782_v21 = vrot.slane %v5966_v44, 5  ;;  %v4536_v53 = vsel %vm707_vm0, %v8753_v60, 0  ;;  %v5287_v63 = vld [vmem:[%s6023_s23 + $0x18] sm:$0xf]  ;;  %v5288_v57 = vld [vmem:[%s6023_s23 + $0x1c] sm:$0xf] }
  0xd5   : > { %5722 = vmatprep.mubr.msk.bf16.mxu1 %vm658_vm3, %v5947_v27  ;;  %v5965_v27 = vld [vmem:[%s6023_s23 + $0x1c] sm:$0xf]  ;;  %v5290_v51 = vld [vmem:[%s6023_s23 + $0x24] sm:$0xf]  ;;  %v3584_v45 = vshrl.u32 %v5287_v63, 16  ;;  %v3593_v39 = vshll.u32 %v5288_v57, 16 }
  0xd6   : > { %v2779_v36 = vrot.slane %v5965_v27, 5  ;;  %v3587_v27 = vshll.u32 %v5287_v63, 16  ;;  %v3608_v46 = vshrl.u32 %v5290_v51, 16  ;;  %v5953_v44 = vld [vmem:[%s6023_s23 + $0x48] sm:$0xff]   ;;  %v5368_v60 = vld [vmem:[%s6023_s23 + $0x18] sm:$0xe] }
  0xd7   : > { %v7396_v63 = vld [vmem:[%s6023_s23 + $0x2c] sm:$0x1] }
  0xd8   : > { %v2781_v16 = vrot.slane %v2779_v36, 4  ;;  %v2780_v17 = vsel %vm6353_vm7, %v5174_v37, %v2779_v36  ;;  %v7380_v36 = vld [vmem:[%s6023_s23 + $0x28] sm:$0xf]  ;;  %v5952_v37 = vld [vmem:[%s6023_s23 + $0x3c] sm:$0xff]   ;;  %v3610_v18 = vrot.slane %v3608_v46, 4 }
  0xd9   : > { %5757 = vmatmul.mubr.msk.bf16.gmra.mxu0 %vm658_vm3, %v5140_v19  ;;  %v8754_v19 = vld [vmem:[#allocation11_spill] sm:$0xff] }
  0xda   : > { %5796 = vmatprep.mubr.msk.bf16.mxu0 %vm658_vm3, %v5949_v49  ;;  %v2783_v20 = vsel %vm6353_vm7, %v2781_v16, %v2782_v21  ;;  %v4066_v22 = vsel %vm707_vm0, %v8754_v19, 0  ;;  %v3597_v49 = vshrl.u32 %v5288_v57, 16  ;;  %v3621_v16 = vshrl.u32 %v7380_v36, 16  ;;  %v5289_v21 = vld [vmem:[%s6023_s23 + $0x20] sm:$0x1] }
  0xdb   : > { %v5191_v58 = vcombine.low %v2780_v17, %v2783_v20  ;;  %v3586_v17 = vrot.slane %v3584_v45, 4  ;;  %v3589_v20 = vrot.slane %v3587_v27, 5  ;;  %v5293_v19 = vld [vmem:[%s6023_s23 + $0x30] sm:$0xf]  ;;  %v3603_v45 = vshll.u32 %v5289_v21, 16 }
  0xdc   : > { %5723 = vmatmul.mubr.msk.bf16.gmra.mxu1 %vm658_vm3, %v5948_v52  ;;  %v3611_v52 = vshll.u32 %v5290_v51, 16  ;;  %v3623_v51 = vrot.slane %v3621_v16, 4  ;;  %v5384_v27 = vrot.slane %v5368_v60, 9  ;;  %v4330_v46 = vrot.slane %v5289_v21, 5  ;;  %v5369_v16 = vld [vmem:[%s6023_s23 + $0x24] sm:$0xe] }
  0xdd   : > { %5762 = vmatprep.mubr.msk.bf16.mxu1 %vm658_vm3, %v5190_v34  ;;  %v3617_v34 = vshll.u32 %v7380_v36, 16  ;;  %v5954_v21 = vld [vmem:[%s6023_s23 + $0x54] sm:$0xff]   ;;  %v3635_v10 = vshll.u32 %v5293_v19, 16  ;;  %v5955_v60 = vld [vmem:[%s6023_s23 + $0x60] sm:$0xff]  }
  0xde   : > { %v3613_v11 = vrot.slane %v3611_v52, 5  ;;  %v3627_v52 = vshll.u32 %v7396_v63, 16 }
  0xe1   : > { %5797 = vmatmul.mubr.msk.bf16.vlgmr.msra.gmra.mxu0 %vm658_vm3, %v5950_v26  ;;  %v7392_v26 = vrot.slane %v3593_v39, 5 }
  0xe2   : > { %5863 = vmatpush3.bf16.msra.mxu0 %v4536_v53  ;;  %5800 = vmatprep.mubr.msk.bf16.mxu0 %vm658_vm3, %v5951_v38  ;;  %v3599_v38 = vrot.slane %v3597_v49, 4  ;;  %v4327_v53 = vrot.slane %v5288_v57, 5  ;;  %v7406_v57 = vld [vmem:[%s6023_s23 + $0x34] sm:$0xf] }
  0xe4   : > { %5763 = vmatmul.mubr.msk.bf16.vlgmr.msra.gmra.mxu1 %vm658_vm3, %v5191_v58  ;;  %v7401_v58 = vrot.slane %v3617_v34, 5  ;;  %v3600_v39 = vor.u32 %v3599_v38, %v7392_v26  ;;  %v4329_v49 = vrot.slane %v4327_v53, 4  ;;  %v3614_v34 = vor.u32 %v3613_v11, %v3610_v18 }
  0xe5   : > { %5829 = vmatpush3.bf16.msra.mxu1 %v4066_v22  ;;  %5766 = vmatprep.mubr.msk.bf16.mxu1 %vm658_vm3, %v5192_v5  ;;  %v7399_v5 = vpop.f32.mrf.mxu0  ;;  %v3590_v22 = vor.u32 %v3589_v20, %v3586_v17  ;;  %v3632_v17 = vshrl.u32 %v5293_v19, 16  ;;  %v3645_v38 = vshrl.u32 %v7406_v57, 16  ;;  %v7431_v61 = vsel %vm6353_vm7, %v5384_v27, %v4327_v53  ;;  %v5296_v19 = vld [vmem:[%s6023_s23 + $0x3c] sm:$0xf] }
  0xe6   : > { %v3624_v41 = vor.u32 %v3623_v51, %v7401_v58  ;;  %v3601_v8 = vrot.slane %v3600_v39, 4  ;;  %v3629_v11 = vrot.slane %v3627_v52, 5  ;;  %v5385_v51 = vrot.slane %v5369_v16, 9  ;;  %v7445_v39 = vld [vmem:[%s6023_s23 + $0x38] sm:$0x1] }
  0xe7   : > { %v7423_v20 = vpop.f32.mrf.mxu0  ;;  %v3591_v18 = vrot.slane %v3590_v22, 4  ;;  %v3615_v12 = vrot.slane %v3614_v34, 4  ;;  %v4337_v22 = vrot.slane %v7396_v63, 5  ;;  %v3647_v52 = vrot.slane %v3645_v38, 4 }
  0xe8   : > { %v3625_v27 = vrot.slane %v3624_v41, 4  ;;  %v3656_v34 = vshrl.u32 %v5296_v19, 16  ;;  %v3659_v16 = vshll.u32 %v5296_v19, 16  ;;  %v7458_v41 = vld [vmem:[%s6023_s23 + $0x40] sm:$0xf] }
  0xe9   : > { %5801 = vmatmul.mubr.msk.bf16.gmra.mxu0 %vm658_vm3, %v5952_v37  ;;  %v7442_v53 = vpop.f32.mrf.mxu0  ;;  %v3596_v63 = vsel %vm6067_vm4, %v3591_v18, %v7392_v26  ;;  %v3620_v26 = vsel %vm6067_vm4, %v3615_v12, %v7401_v58  ;;  %v5370_v18 = vld [vmem:[%s6023_s23 + $0x30] sm:$0xe]  ;;  %v3665_v24 = vshll.u32 %v7458_v41, 16  ;;  %v3669_v33 = vshrl.u32 %v7458_v41, 16 }
  0xea   : > { %5804 = vmatprep.mubr.msk.bf16.mxu0 %vm658_vm3, %v5953_v44  ;;  %v7414_v37 = vpop.f32.mrf.mxu1  ;;  %v4334_v44 = vrot.slane %v7380_v36, 5  ;;  %v3605_v36 = vrot.slane %v3603_v45, 5  ;;  %v3634_v45 = vrot.slane %v3632_v17, 4  ;;  %v3630_v58 = vsel %vm6067_vm4, %v3625_v27, %v3629_v11 }
  0xeb   : > { %8755 = vst [vmem:[#allocation4_spill] sm:$0xff] %v7414_v37  ;;  %v7487_v12 = vpop.f32.mrf.mxu0  ;;  %v3661_v19 = vrot.slane %v3659_v16, 5  ;;  %v3693_v11 = vshrl.u32 %v7480_v7, 16 }
  0xec   : > { %5767 = vmatmul.mubr.msk.bf16.gmra.mxu1 %vm658_vm3, %v5193_v48  ;;  %v3641_v48 = vshll.u32 %v7406_v57, 16  ;;  %v7438_v6 = vpop.f32.mrf.mxu1  ;;  %v4336_v4 = vrot.slane %v4334_v44, 4  ;;  %v3606_v17 = vsel %vm6067_vm4, %v3601_v8, %v3605_v36  ;;  %v4341_v36 = vrot.slane %v7406_v57, 5  ;;  %v5957_v8 = vld [vmem:[%s6023_s23 + $0x78] sm:$0xff]  }
  0xed   : > { %5770 = vmatprep.mubr.msk.bf16.mxu1 %vm658_vm3, %v5194_v40  ;;  %v7435_v40 = vsel %vm6353_vm7, %v4329_v49, %v4330_v46  ;;  %8756 = vst [vmem:[#allocation3_spill] sm:$0xff] %v7438_v6  ;;  %v3637_v49 = vrot.slane %v3635_v10, 5  ;;  %v7501_v27 = vcombine.low %v3596_v63, %v3606_v17  ;;  %v7503_v57 = vcombine.low %v3620_v26, %v3630_v58  ;;  %v7517_v17 = vld [vmem:[%s6023_s23 + $0x58] sm:$0xf]  ;;  %v7523_v58 = vld [vmem:[%s6023_s23 + $0x44] sm:$0x1] }
  0xee   : > { %v7447_v46 = vrot.slane %v3641_v48, 5  ;;  %v7464_v10 = vpop.f32.mrf.mxu1  ;;  %v7471_v48 = vsel %vm6353_vm7, %v5385_v51, %v4334_v44  ;;  %v7475_v38 = vsel %vm6353_vm7, %v4336_v4, %v4337_v22  ;;  %v3658_v51 = vrot.slane %v3656_v34, 4  ;;  %v5302_v34 = vld [vmem:[%s6023_s23 + $0x54] sm:$0xf] }
  0xef   : > { %8757 = vst [vmem:[#allocation6_spill] sm:$0xff] %v7464_v10  ;;  %v3638_v44 = vor.u32 %v3637_v49, %v3634_v45  ;;  %v3683_v22 = vshll.u32 %v5299_v3, 16  ;;  %v4343_v13 = vrot.slane %v4341_v36, 4  ;;  %v4344_v63 = vrot.slane %v7445_v39, 5  ;;  %v5371_v49 = vld [vmem:[%s6023_s23 + $0x3c] sm:$0xe] }
  0xf0   : > { %v3648_v4 = vor.u32 %v3647_v52, %v7447_v46  ;;  %v7499_v45 = vpop.f32.mrf.mxu1  ;;  %v5386_v52 = vrot.slane %v5370_v18, 9  ;;  %v3662_v18 = vor.u32 %v3661_v19, %v3658_v51  ;;  %v8760_v6 = vcombine.low %v7212_v28, %v7228_v1 }
  0xf1   : > { %5805 = vmatmul.mubr.msk.bf16.gmra.mxu0 %vm658_vm3, %v5954_v21  ;;  %v3689_v21 = vshll.u32 %v7480_v7, 16  ;;  %8758 = vst [vmem:[#allocation5_spill] sm:$0xff] %v7499_v45  ;;  %v3685_v45 = vrot.slane %v3683_v22, 5  ;;  %v3704_v51 = vshrl.u32 %v5302_v34, 16  ;;  %v3707_v19 = vshll.u32 %v5302_v34, 16 }
  0xf2   : > { %5808 = vmatprep.mubr.msk.bf16.mxu0 %vm658_vm3, %v5955_v60  ;;  %v3651_v60 = vshll.u32 %v7445_v39, 16  ;;  %v7520_v26 = vrot.slane %v3648_v4, 4  ;;  %v3695_v39 = vrot.slane %v3693_v11, 4  ;;  %v7558_v22 = vsel %vm6353_vm7, %v4343_v13, %v4344_v63 }
  0xf3   : > { %v7528_v10 = vrot.slane %v3689_v21, 5  ;;  %v8762_v21 = vcombine.low %v7221_v25, %v7240_v14  ;;  %v4348_v25 = vrot.slane %v7458_v41, 5  ;;  %v5959_v14 = vld [vmem:[%s6023_s23 + $0x90] sm:$0xff]   ;;  %v5387_v1 = vrot.slane %v5371_v49, 9  ;;  %v5305_v41 = vld [vmem:[%s6023_s23 + $0x60] sm:$0xf] }
  0xf4   : > { %5771 = vmatmul.mubr.msk.bf16.gmra.mxu1 %vm658_vm3, %v5195_v35  ;;  %v5956_v35 = vld [vmem:[%s6023_s23 + $0x6c] sm:$0xff]   ;;  %v7513_v62 = vrot.slane %v3651_v60, 5  ;;  %v3706_v37 = vrot.slane %v3704_v51, 4 }
  0xf5   : > { %5774 = vmatprep.mubr.msk.bf16.mxu1 %vm658_vm3, %v5196_v23  ;;  %v3680_v23 = vshrl.u32 %v5299_v3, 16  ;;  %v7511_v3 = vrot.slane %v3638_v44, 4  ;;  %v3671_v44 = vrot.slane %v3669_v33, 4  ;;  %v3717_v33 = vshrl.u32 %v7517_v17, 16 }
  0xf6   : > { %v7509_v16 = vpop.f32.mrf.mxu0  ;;  %v3696_v13 = vor.u32 %v3695_v39, %v7528_v10  ;;  %v4355_v39 = vrot.slane %v7480_v7, 5  ;;  %v8766_v7 = vcombine.low %v7232_v43, %v7249_v2  ;;  %v8768_v43 = vcombine.low %v7253_v59, %v7263_v50  ;;  %v5960_v2 = vld [vmem:[%s6023_s23 + $0x9c] sm:$0xff]  }
  0xf7   : > { %8759 = vst [vmem:[#allocation8_spill] sm:$0xff] %v7509_v16  ;;  %v3682_v60 = vrot.slane %v3680_v23, 4  ;;  %v5958_v23 = vld [vmem:[%s6023_s23 + $0x84] sm:$0xff]   ;;  %v7585_v16 = vld [vmem:[%s6023_s23 + $0x5c] sm:$0x1]  ;;  %v4362_v59 = vrot.slane %v7517_v17, 5 }
  0xf8   : > { %v7546_v28 = vpop.f32.mrf.mxu0 }
  0xf9   : > { %5809 = vmatmul.mubr.msk.bf16.gmra.mxu0 %vm658_vm3, %v5956_v35  ;;  %v7525_v35 = vrot.slane %v3665_v24, 5  ;;  %v3713_v24 = vshll.u32 %v7517_v17, 16  ;;  %8763 = vst [vmem:[#allocation12_spill] sm:$0xff] %v7546_v28  ;;  %v3709_v28 = vrot.slane %v3707_v19, 5 }
  0xfa   : > { %5812 = vmatprep.mubr.msk.bf16.mxu0 %vm658_vm3, %v5957_v8  ;;  %v7534_v4 = vpop.f32.mrf.mxu1  ;;  %v7537_v8 = vld [vmem:[%s6023_s23 + $0x50] sm:$0x1]  ;;  %v7578_v49 = vpop.f32.mrf.mxu0 }
  0xfb   : > { %8761 = vst [vmem:[#allocation7_spill] sm:$0xff] %v7534_v4  ;;  %v3672_v34 = vor.u32 %v3671_v44, %v7525_v35  ;;  %v7568_v4 = vrot.slane %v3662_v18, 4  ;;  %v7575_v11 = vrot.slane %v3713_v24, 5  ;;  %v3719_v44 = vrot.slane %v3717_v33, 4  ;;  %8765 = vst [vmem:[#allocation2_spill] sm:$0xff] %v7578_v49 }
  0xfc   : > { %5775 = vmatmul.mubr.msk.bf16.gmra.mxu1 %vm658_vm3, %v8760_v6  ;;  %v7554_v6 = vsel %vm6353_vm7, %v5386_v52, %v4341_v36  ;;  %v3686_v36 = vor.u32 %v3685_v45, %v3682_v60  ;;  %v3699_v52 = vshll.u32 %v7537_v8, 16  ;;  %v7573_v63 = vpop.f32.mrf.mxu1  ;;  %v4350_v18 = vrot.slane %v4348_v25, 4  ;;  %v5372_v24 = vld [vmem:[%s6023_s23 + $0x48] sm:$0xe] }
  0xfd   : > { %5778 = vmatprep.mubr.msk.bf16.mxu1 %vm658_vm3, %v8762_v21  ;;  %v3675_v21 = vshll.u32 %v7523_v58, 16  ;;  %8764 = vst [vmem:[#allocation10_spill] sm:$0xff] %v7573_v63  ;;  %v4351_v60 = vrot.slane %v7523_v58, 5  ;;  %v3673_v51 = vrot.slane %v3672_v34, 4  ;;  %v3728_v33 = vshrl.u32 %v5305_v41, 16 }
  0xfe   : > { %v7591_v63 = vsel %vm6353_vm7, %v5387_v1, %v4348_v25  ;;  %v3687_v45 = vrot.slane %v3686_v36, 4  ;;  %v3697_v49 = vrot.slane %v3696_v13, 4  ;;  %v3701_v58 = vrot.slane %v3699_v52, 5  ;;  %v7606_v36 = vld [vmem:[%s6023_s23 + $0x64] sm:$0xf]  ;;  %v7613_v13 = vpop.f32.mrf.mxu0 }
  0xff   : > { %v3677_v19 = vrot.slane %v3675_v21, 5  ;;  %v3668_v34 = vsel %vm6067_vm4, %v7568_v4, %v7525_v35  ;;  %v3710_v21 = vor.u32 %v3709_v28, %v3706_v37  ;;  %v3720_v1 = vor.u32 %v3719_v44, %v7575_v11  ;;  %8769 = vst [vmem:[#allocation14_spill] sm:$0xff] %v7613_v13  ;;  %v5373_v28 = vld [vmem:[%s6023_s23 + $0x54] sm:$0xe]  ;;  %v5964_v13 = vld [vmem:[%s6023_s23 + $0xcc] sm:$0xff]  }
 0x100   : > { %v3723_v25 = vshll.u32 %v7585_v16, 16  ;;  %v7617_v52 = vsel %vm6353_vm7, %v4350_v18, %v4351_v60  ;;  %v5388_v35 = vrot.slane %v5372_v24, 9  ;;  %v4357_v37 = vrot.slane %v4355_v39, 4 }
 0x101   : > { %5813 = vmatmul.mubr.msk.bf16.gmra.mxu0 %vm658_vm3, %v5958_v23  ;;  %v3731_v23 = vshll.u32 %v5305_v41, 16  ;;  %v4358_v4 = vrot.slane %v7537_v8, 5  ;;  %v5961_v41 = vld [vmem:[%s6023_s23 + $0xa8] sm:$0xff]   ;;  %v3678_v44 = vsel %vm6067_vm4, %v3673_v51, %v3677_v19  ;;  %v3730_v50 = vrot.slane %v3728_v33, 4 }
 0x102   : > { %5816 = vmatprep.mubr.msk.bf16.mxu0 %vm658_vm3, %v5959_v14  ;;  %v7597_v14 = vpop.f32.mrf.mxu1  ;;  %v3702_v18 = vsel %vm6067_vm4, %v3697_v49, %v3701_v58  ;;  %v3737_v60 = vshll.u32 %v7606_v36, 16  ;;  %v3741_v8 = vshrl.u32 %v7606_v36, 16  ;;  %v3721_v51 = vrot.slane %v3720_v1, 4  ;;  %v7635_v33 = vld [vmem:[%s6023_s23 + $0x68] sm:$0x1] }
 0x103   : > { %8767 = vst [vmem:[#allocation13_spill] sm:$0xff] %v7597_v14  ;;  %v3711_v14 = vrot.slane %v3710_v21, 4  ;;  %v3725_v17 = vrot.slane %v3723_v25, 5  ;;  %v5389_v19 = vrot.slane %v5373_v28, 9  ;;  %v8772_v49 = vsel %vm6067_vm4, %v7520_v26, %v7513_v62  ;;  %v5308_v25 = vld [vmem:[%s6023_s23 + $0x6c] sm:$0xf] }
 0x104   : > { %5779 = vmatmul.mubr.msk.bf16.gmra.mxu1 %vm658_vm3, %v8766_v7  ;;  %v3733_v7 = vrot.slane %v3731_v23, 5  ;;  %v7632_v24 = vpop.f32.mrf.mxu1  ;;  %v7656_v21 = vsel %vm6353_vm7, %v5388_v35, %v4355_v39  ;;  %v7660_v1 = vsel %vm6353_vm7, %v4357_v37, %v4358_v4  ;;  %v7663_v62 = vcombine.low %v3668_v34, %v3678_v44  ;;  %v5374_v4 = vld [vmem:[%s6023_s23 + $0x60] sm:$0xe]  ;;  %v5314_v44 = vld [vmem:[%s6023_s23 + $0x84] sm:$0xf] }
 0x105   : > { %5782 = vmatprep.mubr.msk.bf16.mxu1 %vm658_vm3, %v8768_v43  ;;  %v3692_v43 = vsel %vm6067_vm4, %v3687_v45, %v7528_v10  ;;  %8770 = vst [vmem:[#allocation15_spill] sm:$0xff] %v7632_v24  ;;  %v8773_v45 = vsel %vm6067_vm4, %v7511_v3, %v7447_v46  ;;  %v4364_v46 = vrot.slane %v4362_v59, 4  ;;  %v4365_v3 = vrot.slane %v7585_v16, 5 }
 0x106   : > { %v7650_v23 = vcombine.low %v8773_v45, %v8772_v49  ;;  %8774 = vst [vmem:[#allocation11_spill] sm:$0xff] %v7663_v62  ;;  %v3734_v26 = vor.u32 %v3733_v7, %v3730_v50  ;;  %v7670_v28 = vcombine.low %v3692_v43, %v3702_v18  ;;  %v7672_v39 = vrot.slane %v3737_v60, 5 }
 0x107   : > { %v7638_v10 = vpop.f32.mrf.mxu0  ;;  %v7674_v35 = vrot.slane %v3741_v8, 4  ;;  %v3747_v37 = vshll.u32 %v7635_v33, 16  ;;  %v8776_v34 = vcombine.low %v7271_v54, %v7286_v56  ;;  %v3716_v50 = vsel %vm6067_vm4, %v3711_v14, %v7575_v11  ;;  %v5311_v54 = vld [vmem:[%s6023_s23 + $0x78] sm:$0xf] }
 0x108   : > { %8771 = vst [vmem:[#allocation9_spill] sm:$0xff] %v7638_v10  ;;  %8775 = vst [vmem:[#allocation16_spill] sm:$0xff] %v7670_v28  ;;  %v3726_v7 = vsel %vm6067_vm4, %v3721_v51, %v3725_v17  ;;  %v7694_v43 = vsel %vm6353_vm7, %v5389_v19, %v4362_v59  ;;  %v8778_v56 = vcombine.low %v7278_v29, %v7299_v42  ;;  %v3752_v60 = vshrl.u32 %v5308_v25, 16  ;;  %v7706_v51 = vld [vmem:[%s6023_s23 + $0x7c] sm:$0xf]  ;;  %v5963_v59 = vld [vmem:[%s6023_s23 + $0xc0] sm:$0xff]  }
 0x109   : > { %5817 = vmatmul.mubr.msk.bf16.gmra.mxu0 %vm658_vm3, %v5960_v2  ;;  %v7668_v2 = vld [vmem:[%s6023_s23 + $0x70] sm:$0xf]  ;;  %v7701_v18 = vpop.f32.mrf.mxu0  ;;  %v3755_v8 = vshll.u32 %v5308_v25, 16  ;;  %v7711_v17 = vsel %vm6353_vm7, %v4364_v46, %v4365_v3  ;;  %v7713_v29 = vrot.slane %v3734_v26, 4  ;;  %v5390_v42 = vrot.slane %v5374_v4, 9 }
 0x10a   : > { %5820 = vmatprep.mubr.msk.bf16.mxu0 %vm658_vm3, %v5961_v41  ;;  %v5962_v41 = vld [vmem:[%s6023_s23 + $0xb4] sm:$0xff]   ;;  %8779 = vst [vmem:[#allocation18_spill] sm:$0xff] %v7701_v18  ;;  %v3761_v11 = vshll.u32 %v7668_v2, 16  ;;  %v3765_v14 = vshrl.u32 %v7668_v2, 16  ;;  %v4369_v19 = vrot.slane %v7606_v36, 5  ;;  %v7716_v49 = vcombine.low %v3716_v50, %v3726_v7 }
 0x10b   : > { %v3744_v45 = vor.u32 %v7674_v35, %v7672_v39  ;;  %v7720_v25 = vrot.slane %v3747_v37, 5  ;;  %v3776_v46 = vshrl.u32 %v5311_v54, 16  ;;  %v3779_v3 = vshll.u32 %v5311_v54, 16  ;;  %v7732_v4 = vld [vmem:[%s6023_s23 + $0x88] sm:$0xf]  ;;  %v7735_v35 = vpop.f32.mrf.mxu0 }
 0x10c   : > { %5783 = vmatmul.mubr.msk.bf16.gmra.mxu1 %vm658_vm3, %v8776_v34  ;;  %v7682_v16 = vpop.f32.mrf.mxu1  ;;  %8780 = vst [vmem:[#allocation19_spill] sm:$0xff] %v7716_v49  ;;  %v4372_v34 = vrot.slane %v7635_v33, 5  ;;  %v3785_v36 = vshll.u32 %v7706_v51, 16  ;;  %v3789_v26 = vshrl.u32 %v7706_v51, 16  ;;  %8782 = vst [vmem:[#allocation21_spill] sm:$0xff] %v7735_v35  ;;  %v3754_v33 = vrot.slane %v3752_v60, 4 }
 0x10d   : > { %8777 = vst [vmem:[#allocation17_spill] sm:$0xff] %v7682_v16  ;;  %5786 = vmatprep.mubr.msk.bf16.mxu1 %vm658_vm3, %v8778_v56  ;;  %v7724_v56 = vld [vmem:[%s6023_s23 + $0x74] sm:$0x1]  ;;  %v3757_v37 = vrot.slane %v3755_v8, 5  ;;  %v7737_v50 = vrot.slane %v3761_v11, 5  ;;  %v3767_v7 = vrot.slane %v3765_v14, 4  ;;  %v8783_v54 = vcombine.low %v7290_v30, %v7306_v55  ;;  %v7765_v49 = vpop.f32.mrf.mxu0 }
 0x10e   : > { %v7727_v58 = vpop.f32.mrf.mxu1  ;;  %v4371_v16 = vrot.slane %v4369_v19, 4  ;;  %v7750_v60 = vld [vmem:[%s6023_s23 + $0x80] sm:$0x1]  ;;  %v7753_v8 = vld [vmem:[%s6023_s23 + $0x6c] sm:$0xe]  ;;  %v3800_v11 = vshrl.u32 %v5314_v44, 16 }
 0x10f   : > { %8781 = vst [vmem:[#allocation20_spill] sm:$0xff] %v7727_v58  ;;  %v7746_v58 = vsel %vm6353_vm7, %v5390_v42, %v4369_v19  ;;  %v3803_v14 = vshll.u32 %v5314_v44, 16  ;;  %v3813_v24 = vshrl.u32 %v7732_v4, 16  ;;  %v3778_v19 = vrot.slane %v3776_v46, 4  ;;  %8785 = vst [vmem:[#allocation23_spill] sm:$0xff] %v7765_v49 }
 0x110   : > { %v7761_v42 = vpop.f32.mrf.mxu1  ;;  %v3781_v35 = vrot.slane %v3779_v3, 5  ;;  %v7763_v18 = vrot.slane %v3785_v36, 5  ;;  %v3791_v10 = vrot.slane %v3789_v26, 4  ;;  %v8786_v44 = vcombine.low %v7310_v15, %v7338_v32  ;;  %v7784_v32 = vld [vmem:[%s6023_s23 + $0x8c] sm:$0x1] }
 0x111   : > { %5821 = vmatmul.mubr.msk.bf16.gmra.mxu0 %vm658_vm3, %v5962_v41  ;;  %v3771_v41 = vshll.u32 %v7724_v56, 16  ;;  %8784 = vst [vmem:[#allocation22_spill] sm:$0xff] %v7761_v42  ;;  %v3758_v30 = vor.u32 %v3757_v37, %v3754_v33  ;;  %v3768_v55 = vor.u32 %v3767_v7, %v7737_v50  ;;  %v3795_v46 = vshll.u32 %v7750_v60, 16  ;;  %v5376_v33 = vld [vmem:[%s6023_s23 + $0x78] sm:$0xe] }
 0x112   : > { %5824 = vmatprep.mubr.msk.bf16.mxu0 %vm658_vm3, %v5963_v59  ;;  %v3809_v59 = vshll.u32 %v7732_v4, 16  ;;  %v7775_v3 = vrot.slane %v3744_v45, 4  ;;  %v7779_v36 = vsel %vm6353_vm7, %v4371_v16, %v4372_v34  ;;  %v5391_v26 = vrot.slane %v7753_v8, 9  ;;  %v7789_v42 = vpop.f32.mrf.mxu1  ;;  %v5317_v8 = vld [vmem:[%s6023_s23 + $0x90] sm:$0xf] }
 0x113   : > { %v4383_v15 = vrot.slane %v7706_v51, 5  ;;  %v3802_v37 = vrot.slane %v3800_v11, 4  ;;  %v3805_v7 = vrot.slane %v3803_v14, 5  ;;  %8787 = vst [vmem:[#allocation24_spill] sm:$0xff] %v7789_v42  ;;  %v3773_v45 = vrot.slane %v3771_v41, 5 }
 0x114   : > { %5787 = vmatmul.mubr.msk.bf16.gmra.mxu1 %vm658_vm3, %v8783_v54  ;;  %v4376_v54 = vrot.slane %v7668_v2, 5  ;;  %v7787_v2 = vrot.slane %v3809_v59, 5  ;;  %v4379_v49 = vrot.slane %v7724_v56, 5  ;;  %v3782_v16 = vor.u32 %v3781_v35, %v3778_v19  ;;  %v7798_v59 = vld [vmem:[%s6023_s23 + $0x94] sm:$0xf] }
 0x115   : > { %5790 = vmatprep.mubr.msk.bf16.mxu1 %vm658_vm3, %v8786_v44  ;;  %v3815_v44 = vrot.slane %v3813_v24, 4  ;;  %v3792_v34 = vor.u32 %v3791_v10, %v7763_v18  ;;  %v3759_v51 = vrot.slane %v3758_v30, 4  ;;  %v3769_v11 = vrot.slane %v3768_v55, 4 }
 0x116   : > { %v4378_v62 = vrot.slane %v4376_v54, 4  ;;  %v3797_v14 = vrot.slane %v3795_v46, 5  ;;  %v8788_v24 = vcombine.low %v7431_v61, %v7435_v40  ;;  %v5392_v56 = vrot.slane %v5376_v33, 9 }
 0x117   : > { %v4385_v35 = vrot.slane %v4383_v15, 4  ;;  %v4386_v10 = vrot.slane %v7750_v60, 5  ;;  %v3819_v41 = vshll.u32 %v7784_v32, 16  ;;  %v3816_v30 = vor.u32 %v3815_v44, %v7787_v2 }
 0x118   : > { %v3824_v55 = vshrl.u32 %v5317_v8, 16  ;;  %v3827_v46 = vshll.u32 %v5317_v8, 16  ;;  %v8790_v61 = vcombine.low %v7350_v9, %v7355_v47  ;;  %v3783_v40 = vrot.slane %v3782_v16, 4 }
 0x119   : > { %v7794_v28 = vpop.f32.mrf.mxu0  ;;  %5825 = vmatmul.mubr.msk.bf16.gmra.mxu0 %vm658_vm3, %v5964_v13  ;;  %v3806_v13 = vor.u32 %v3805_v7, %v3802_v37  ;;  %v3793_v33 = vrot.slane %v3792_v34, 4  ;;  %v3833_v60 = vshll.u32 %v7798_v59, 16  ;;  %v3750_v37 = vsel %vm6067_vm4, %v7775_v3, %v7720_v25 }
 0x11a   : > { %5864 = vmatprep.mubr.msk.bf16.mxu0 %vm658_vm3, %v8788_v24  ;;  %v3837_v24 = vshrl.u32 %v7798_v59, 16  ;;  %v3764_v9 = vsel %vm6067_vm4, %v3759_v51, %v7737_v50  ;;  %v7830_v47 = vsel %vm6353_vm7, %v5391_v26, %v4376_v54  ;;  %v7834_v7 = vsel %vm6353_vm7, %v4378_v62, %v4379_v49  ;;  %v5377_v54 = vld [vmem:[%s6023_s23 + $0x84] sm:$0xe]  ;;  %v8829_v31 = vld [vmem:[#allocation24_spill] sm:$0xff] }
 0x11b   : > { %v7806_v19 = vpop.f32.mrf.mxu0  ;;  %v7842_v25 = vsel %vm6353_vm7, %v5392_v56, %v4383_v15  ;;  %v7846_v50 = vsel %vm6353_vm7, %v4385_v35, %v4386_v10  ;;  %v3821_v3 = vrot.slane %v3819_v41, 5  ;;  %v3807_v62 = vrot.slane %v3806_v13, 4  ;;  %v7870_v13 = vld [vmem:[%s6023_s23 + $0x98] sm:$0x1] }
 0x11c   : > { %8789 = vst [vmem:[#allocation25_spill] sm:$0xff] %v7806_v19  ;;  %v7809_v42 = vpop.f32.mrf.mxu1  ;;  %5791 = vmatmul.mubr.msk.bf16.gmra.mxu1 %vm658_vm3, %v8790_v61  ;;  %v3817_v49 = vrot.slane %v3816_v30, 4  ;;  %v3826_v16 = vrot.slane %v3824_v55, 4  ;;  %v3829_v34 = vrot.slane %v3827_v46, 5  ;;  %v3788_v15 = vsel %vm6067_vm4, %v3783_v40, %v7763_v18  ;;  %v5320_v30 = vld [vmem:[%s6023_s23 + $0x9c] sm:$0xf] }
 0x11d   : > { %v7817_v19 = vpop.f32.mrf.mxu0  ;;  %5830 = vmatprep.mubr.msk.bf16.mxu1 %vm658_vm3, %v7501_v27  ;;  %v3774_v27 = vsel %vm6067_vm4, %v3769_v11, %v3773_v45  ;;  %v3798_v45 = vsel %vm6067_vm4, %v3793_v33, %v3797_v14  ;;  %v7858_v51 = vrot.slane %v3833_v60, 5  ;;  %v3839_v11 = vrot.slane %v3837_v24, 4  ;;  %v7901_v24 = vld [vmem:[%s6023_s23 + $0xa0] sm:$0xf] }
 0x11e   : > { %v7836_v44 = vpop.f32.mrf.mxu1  ;;  %v8791_v35 = vcombine.low %v7471_v48, %v7475_v38  ;;  %v5406_v10 = vcombine.low %v7694_v43, %v7711_v17  ;;  %v5407_v41 = vcombine.low %v7746_v58, %v7779_v36  ;;  %v5393_v18 = vrot.slane %v5377_v54, 9 }
 0x11f   : > { %v7849_v26 = vpop.f32.mrf.mxu0  ;;  %v4390_v14 = vrot.slane %v7732_v4, 5  ;;  %v8792_v48 = vcombine.low %v7554_v6, %v7558_v22  ;;  %v8793_v38 = vsel %vm6067_vm4, %v7713_v29, %v7672_v39  ;;  %v7886_v61 = vcombine.low %v3764_v9, %v3774_v27  ;;  %v5378_v29 = vld [vmem:[%s6023_s23 + $0x90] sm:$0xe]  ;;  %v8800_v4 = vld [vmem:[#allocation2_spill] sm:$0xff] }
 0x120   : > { %v7851_v8 = vpop.f32.mrf.mxu1  ;;  %v7884_v46 = vcombine.low %v8793_v38, %v3750_v37  ;;  %v7892_v60 = vcombine.low %v3788_v15, %v3798_v45  ;;  %v3812_v6 = vsel %vm6067_vm4, %v3807_v62, %v7787_v2  ;;  %v3822_v22 = vsel %vm6067_vm4, %v3817_v49, %v3821_v3 }
 0x121   : > { %v5662_v56 = vpop.f32.mrf.mxu0  ;;  %5865 = vmatmul.mubr.msk.bf16.vlgmr.msra.gmra.mxu0 %vm658_vm3, %v8791_v35  ;;  %v3830_v39 = vor.u32 %v3829_v34, %v3826_v16  ;;  %v3840_v9 = vor.u32 %v3839_v11, %v7858_v51  ;;  %v3843_v27 = vshll.u32 %v7870_v13, 16  ;;  %v3848_v54 = vshrl.u32 %v5320_v30, 16 }
 0x122   : > { %v7873_v55 = vpop.f32.mrf.mxu1  ;;  %5868 = vmatprep.mubr.msk.bf16.mxu0 %vm658_vm3, %v8792_v48  ;;  %v3851_v15 = vshll.u32 %v5320_v30, 16  ;;  %v7912_v3 = vsel %vm6353_vm7, %v5393_v18, %v4390_v14  ;;  %v4392_v62 = vrot.slane %v4390_v14, 4  ;;  %v4393_v49 = vrot.slane %v7784_v32, 5 }
 0x123   : > { %v1462_v33 = vpop.f32.mrf.mxu0  ;;  %v5394_v16 = vrot.slane %v5378_v29, 9  ;;  %v4397_v34 = vrot.slane %v7798_v59, 5  ;;  %v3857_v11 = vshll.u32 %v7901_v24, 16  ;;  %v3861_v35 = vshrl.u32 %v7901_v24, 16 }
 0x124   : > { %v5628_v37 = vpop.f32.mrf.mxu1  ;;  %5831 = vmatmul.mubr.msk.bf16.vlgmr.msra.gmra.mxu1 %vm658_vm3, %v7503_v57  ;;  %v7921_v48 = vcombine.low %v3812_v6, %v3822_v22  ;;  %v7923_v18 = vrot.slane %v3830_v39, 4  ;;  %v3841_v32 = vrot.slane %v3840_v9, 4  ;;  %v3845_v38 = vrot.slane %v3843_v27, 5  ;;  %v5323_v22 = vld [vmem:[%s6023_s23 + $0xa8] sm:$0xf] }
 0x125   : > { %v1046_v45 = vadd.f32 %v5628_v37, %v7399_v5  ;;  %v5663_v2 = vpop.f32.mrf.mxu0  ;;  %5834 = vmatprep.mubr.msk.bf16.mxu1 %vm658_vm3, %v7650_v23  ;;  %v3850_v29 = vrot.slane %v3848_v54, 4  ;;  %v3853_v59 = vrot.slane %v3851_v15, 5  ;;  %v4400_v6 = vrot.slane %v7870_v13, 5  ;;  %v7949_v27 = vld [vmem:[%s6023_s23 + $0xac] sm:$0xf] }
 0x126   : > { %v1037_v57 = vpop.f32.mrf.mxu1  ;;  %v3863_v9 = vrot.slane %v3861_v35, 4  ;;  %v8797_v35 = vld [vmem:[#allocation8_spill] sm:$0xff] }
 0x127   : > { %v7918_v5 = vadd.f32 %v5662_v56, %v1046_v45  ;;  %v1038_v23 = vadd.f32 %v1037_v57, %v7423_v20  ;;  %v1465_v30 = vpop.f32.mrf.mxu0  ;;  %v8794_v45 = vcombine.low %v7591_v63, %v7617_v52  ;;  %v7934_v20 = vsel %vm6353_vm7, %v4392_v62, %v4393_v49  ;;  %v5379_v62 = vld [vmem:[%s6023_s23 + $0x9c] sm:$0xe] }
 0x128   : > { %v5629_v14 = vpop.f32.mrf.mxu1  ;;  %v4399_v63 = vrot.slane %v4397_v34, 4  ;;  %v7946_v52 = vrot.slane %v3857_v11, 5  ;;  %v4404_v49 = vrot.slane %v7901_v24, 5  ;;  %v3881_v24 = vshll.u32 %v7949_v27, 16 }
 0x129   : > { %v7925_v37 = vadd.f32 %v1462_v33, %v1038_v23  ;;  %v1049_v40 = vadd.f32 %v5629_v14, %v7442_v53  ;;  %v5666_v56 = vpop.f32.mrf.mxu0  ;;  %5869 = vmatmul.mubr.msk.bf16.gmra.mxu0 %vm658_vm3, %v8794_v45  ;;  %v8795_v33 = vcombine.low %v7656_v21, %v7660_v1  ;;  %v7944_v53 = vsel %vm6353_vm7, %v5394_v16, %v4397_v34  ;;  %v5322_v1 = vld [vmem:[%s6023_s23 + $0xa4] sm:$0x1]  ;;  %v8796_v16 = vld [vmem:[#allocation11_spill] sm:$0xff] }
 0x12a   : > { %v1040_v39 = vpop.f32.mrf.mxu1  ;;  %v3836_v21 = vsel %vm6067_vm4, %v7923_v18, %v7858_v51  ;;  %v3872_v34 = vshrl.u32 %v5323_v22, 16  ;;  %v8798_v51 = vld [vmem:[#allocation16_spill] sm:$0xff]  ;;  %v3885_v18 = vshrl.u32 %v7949_v27, 16 }
 0x12b   : > { %5872 = vmatprep.mubr.msk.bf16.mxu0 %vm658_vm3, %v8795_v33  ;;  %v7951_v54 = vadd.f32 %v5663_v2, %v1049_v40  ;;  %v1041_v13 = vadd.f32 %v1040_v39, %v7487_v12  ;;  %v1478_v15 = vpop.f32.mrf.mxu0  ;;  %v3846_v40 = vsel %vm6067_vm4, %v3841_v32, %v3845_v38  ;;  %v3854_v2 = vor.u32 %v3853_v59, %v3850_v29  ;;  %v8799_v59 = vld [vmem:[#allocation12_spill] sm:$0xff] }
 0x12c   : > { %v5632_v57 = vpop.f32.mrf.mxu1  ;;  %5835 = vmatmul.mubr.msk.bf16.gmra.mxu1 %vm658_vm3, %v8796_v16  ;;  %v3875_v12 = vshll.u32 %v5323_v22, 16  ;;  %v7974_v39 = vsel %vm6353_vm7, %v4399_v63, %v4400_v6  ;;  %v3864_v32 = vor.u32 %v3863_v9, %v7946_v52  ;;  %v3867_v38 = vshll.u32 %v5322_v1, 16 }
 0x12d   : > { %v7965_v11 = vadd.f32 %v1465_v30, %v1041_v13  ;;  %v1062_v23 = vadd.f32 %v5632_v57, %v8797_v35  ;;  %v5667_v14 = vpop.f32.mrf.mxu0  ;;  %5838 = vmatprep.mubr.msk.bf16.mxu1 %vm658_vm3, %v8798_v51  ;;  %v5395_v30 = vrot.slane %v5379_v62, 9  ;;  %v4406_v13 = vrot.slane %v4404_v49, 4 }
 0x12e   : > { %v1053_v45 = vpop.f32.mrf.mxu1  ;;  %v4407_v57 = vrot.slane %v5322_v1, 5  ;;  %v7982_v51 = vrot.slane %v3854_v2, 4  ;;  %v3874_v6 = vrot.slane %v3872_v34, 4  ;;  %v3877_v63 = vrot.slane %v3875_v12, 5  ;;  %v7992_v1 = vld [vmem:[%s6023_s23 + $0xb0] sm:$0x1] }
 0x12f   : > { %v7977_v29 = vadd.f32 %v5666_v56, %v1062_v23  ;;  %v1054_v22 = vadd.f32 %v1053_v45, %v8799_v59  ;;  %v1481_v33 = vpop.f32.mrf.mxu0  ;;  %v7994_v23 = vrot.slane %v3881_v24, 5  ;;  %v3887_v2 = vrot.slane %v3885_v18, 4  ;;  %v8801_v12 = vld [vmem:[#allocation14_spill] sm:$0xff] }
 0x130   : > { %v5633_v16 = vpop.f32.mrf.mxu1  ;;  %v8004_v43 = vrot.slane %v3864_v32, 4  ;;  %v8006_v17 = vrot.slane %v3867_v38, 5  ;;  %v8014_v58 = vsel %vm6353_vm7, %v5395_v30, %v4404_v49  ;;  %v8018_v36 = vsel %vm6353_vm7, %v4406_v13, %v4407_v57  ;;  %v8030_v30 = vld [vmem:[%s6023_s23 + $0xb8] sm:$0xf] }
 0x131   : > { %v7984_v9 = vadd.f32 %v1478_v15, %v1054_v22  ;;  %v1065_v62 = vadd.f32 %v5633_v16, %v8800_v4  ;;  %v5670_v56 = vpop.f32.mrf.mxu0  ;;  %5873 = vmatmul.mubr.msk.bf16.gmra.mxu0 %vm658_vm3, %v5406_v10  ;;  %v8000_v15 = vcombine.low %v3836_v21, %v3846_v40  ;;  %v5380_v10 = vld [vmem:[%s6023_s23 + $0xa8] sm:$0xe]  ;;  %v3878_v32 = vor.u32 %v3877_v63, %v3874_v6  ;;  %v8803_v22 = vld [vmem:[#allocation9_spill] sm:$0xff] }
 0x132   : > { %v1056_v45 = vpop.f32.mrf.mxu1  ;;  %5876 = vmatprep.mubr.msk.bf16.mxu0 %vm658_vm3, %v5407_v41  ;;  %v5326_v41 = vld [vmem:[%s6023_s23 + $0xb4] sm:$0xf]  ;;  %v8802_v40 = vld [vmem:[#allocation19_spill] sm:$0xff]  ;;  %v3891_v38 = vshll.u32 %v7992_v1, 16  ;;  %v4411_v49 = vrot.slane %v7949_v27, 5  ;;  %v3888_v16 = vor.u32 %v3887_v2, %v7994_v23  ;;  %v3870_v27 = vsel %vm6067_vm4, %v8004_v43, %v8006_v17 }
 0x133   : > { %v8009_v34 = vadd.f32 %v5667_v14, %v1065_v62  ;;  %v1057_v24 = vadd.f32 %v1056_v45, %v8801_v12  ;;  %v1494_v18 = vpop.f32.mrf.mxu0  ;;  %v5396_v62 = vrot.slane %v5380_v10, 9  ;;  %v3896_v6 = vshrl.u32 %v5326_v41, 16 }
 0x134   : > { %v5636_v21 = vpop.f32.mrf.mxu1  ;;  %5839 = vmatmul.mubr.msk.bf16.gmra.mxu1 %vm658_vm3, %v8802_v40  ;;  %v3899_v63 = vshll.u32 %v5326_v41, 16  ;;  %v3905_v2 = vshll.u32 %v8030_v30, 16  ;;  %v3909_v10 = vshrl.u32 %v8030_v30, 16  ;;  %v5329_v40 = vld [vmem:[%s6023_s23 + $0xc0] sm:$0xf]  ;;  %v3879_v4 = vrot.slane %v3878_v32, 4 }
 0x135   : > { %v8032_v59 = vadd.f32 %v1481_v33, %v1057_v24  ;;  %v1078_v13 = vadd.f32 %v5636_v21, %v8803_v22  ;;  %v5671_v57 = vpop.f32.mrf.mxu0  ;;  %5842 = vmatprep.mubr.msk.bf16.mxu1 %vm658_vm3, %v7884_v46  ;;  %v8805_v24 = vld [vmem:[#allocation18_spill] sm:$0xff]  ;;  %v3893_v43 = vrot.slane %v3891_v38, 5  ;;  %v4413_v17 = vrot.slane %v4411_v49, 4 }
 0x136   : > { %v1069_v45 = vpop.f32.mrf.mxu1  ;;  %v4414_v33 = vrot.slane %v7992_v1, 5  ;;  %v8060_v14 = vsel %vm6353_vm7, %v5396_v62, %v4411_v49  ;;  %v8063_v32 = vld [vmem:[%s6023_s23 + $0xc4] sm:$0xf]  ;;  %v8809_v1 = vcombine.low %v7842_v25, %v7846_v50  ;;  %v8075_v62 = vrot.slane %v3905_v2, 5 }
 0x137   : > { %v8044_v12 = vadd.f32 %v5670_v56, %v1078_v13  ;;  %v1070_v21 = vadd.f32 %v1069_v45, %v8805_v24  ;;  %v1497_v46 = vpop.f32.mrf.mxu0  ;;  %v8807_v56 = vld [vmem:[#allocation21_spill] sm:$0xff]  ;;  %v8808_v45 = vcombine.low %v7830_v47, %v7834_v7  ;;  %v3889_v24 = vrot.slane %v3888_v16, 4  ;;  %v8810_v16 = vld [vmem:[#allocation23_spill] sm:$0xff] }
 0x138   : > { %v5637_v22 = vpop.f32.mrf.mxu1  ;;  %v3920_v47 = vshrl.u32 %v5329_v40, 16  ;;  %v3923_v7 = vshll.u32 %v5329_v40, 16  ;;  %v3884_v25 = vsel %vm6067_vm4, %v3879_v4, %v7994_v23  ;;  %v8084_v50 = vsel %vm6353_vm7, %v4413_v17, %v4414_v33  ;;  %v5381_v40 = vld [vmem:[%s6023_s23 + $0xb4] sm:$0xe] }
 0x139   : > { %8804 = vst [vmem:[#allocation11_spill] sm:$0xff] %v8044_v12  ;;  %v8051_v35 = vadd.f32 %v1494_v18, %v1070_v21  ;;  %v1081_v41 = vadd.f32 %v5637_v22, %v8807_v56  ;;  %v5674_v13 = vpop.f32.mrf.mxu0  ;;  %5877 = vmatmul.mubr.msk.bf16.gmra.mxu0 %vm658_vm3, %v8808_v45  ;;  %v8070_v18 = vld [vmem:[%s6023_s23 + $0xbc] sm:$0x1]  ;;  %v3898_v21 = vrot.slane %v3896_v6, 4  ;;  %v3901_v22 = vrot.slane %v3899_v63, 5 }
 0x13a   : > { %v1072_v38 = vpop.f32.mrf.mxu1  ;;  %5880 = vmatprep.mubr.msk.bf16.mxu0 %vm658_vm3, %v8809_v1  ;;  %v3933_v6 = vshrl.u32 %v8063_v32, 16  ;;  %v3915_v23 = vshll.u32 %v8070_v18, 16  ;;  %v4418_v17 = vrot.slane %v8030_v30, 5  ;;  %v8811_v1 = vld [vmem:[#allocation25_spill] sm:$0xff] }
 0x13b   : > { %8806 = vst [vmem:[#allocation8_spill] sm:$0xff] %v8051_v35  ;;  %v8072_v56 = vadd.f32 %v5671_v57, %v1081_v41  ;;  %v1073_v45 = vadd.f32 %v1072_v38, %v8810_v16  ;;  %v1510_v49 = vpop.f32.mrf.mxu0  ;;  %v3911_v35 = vrot.slane %v3909_v10, 4  ;;  %v3929_v57 = vshll.u32 %v8063_v32, 16 }
 0x13c   : > { %v5640_v12 = vpop.f32.mrf.mxu1  ;;  %5843 = vmatmul.mubr.msk.bf16.gmra.mxu1 %vm658_vm3, %v7886_v61  ;;  %v3894_v61 = vsel %vm6067_vm4, %v3889_v24, %v3893_v43  ;;  %v3902_v33 = vor.u32 %v3901_v22, %v3898_v21  ;;  %v3922_v41 = vrot.slane %v3920_v47, 4  ;;  %v3925_v38 = vrot.slane %v3923_v7, 5 }
 0x13d   : > { %v8088_v63 = vadd.f32 %v1497_v46, %v1073_v45  ;;  %v1094_v2 = vadd.f32 %v5640_v12, %v7794_v28  ;;  %v5675_v10 = vpop.f32.mrf.mxu0  ;;  %5846 = vmatprep.mubr.msk.bf16.mxu1 %vm658_vm3, %v7892_v60  ;;  %v8812_v60 = vsel %vm6067_vm4, %v7982_v51, %v7946_v52  ;;  %v3912_v24 = vor.u32 %v3911_v35, %v8075_v62 }
 0x13e   : > { %v1085_v4 = vpop.f32.mrf.mxu1  ;;  %v8106_v43 = vcombine.low %v8812_v60, %v3870_v27  ;;  %v8109_v30 = vcombine.low %v3884_v25, %v3894_v61  ;;  %v8113_v22 = vrot.slane %v3929_v57, 5  ;;  %v3935_v47 = vrot.slane %v3933_v6, 4  ;;  %v5331_v27 = vld [vmem:[%s6023_s23 + $0xc8] sm:$0x1] }
 0x13f   : > { %v8098_v46 = vadd.f32 %v5674_v13, %v1094_v2  ;;  %v1086_v28 = vadd.f32 %v1085_v4, %v8811_v1  ;;  %v1513_v12 = vpop.f32.mrf.mxu0  ;;  %v5413_v13 = vcombine.low %v8060_v14, %v8084_v50  ;;  %v8813_v52 = vcombine.low %v7912_v3, %v7934_v20  ;;  %v5332_v14 = vld [vmem:[%s6023_s23 + $0xcc] sm:$0xf]  ;;  %v8134_v20 = vld [vmem:[%s6023_s23 + $0xd0] sm:$0xf]  ;;  %v5382_v4 = vld [vmem:[%s6023_s23 + $0xc0] sm:$0xe] }
 0x140   : > { %v5641_v21 = vpop.f32.mrf.mxu1  ;;  %v8122_v35 = vrot.slane %v3915_v23, 5  ;;  %v5397_v51 = vrot.slane %v5381_v40, 9  ;;  %v8814_v50 = vcombine.low %v7944_v53, %v7974_v39  ;;  %v4421_v57 = vrot.slane %v8070_v18, 5 }
 0x141   : > { %v8115_v7 = vadd.f32 %v1510_v49, %v1086_v28  ;;  %v1097_v16 = vadd.f32 %v5641_v21, %v7817_v19  ;;  %v5678_v45 = vpop.f32.mrf.mxu0  ;;  %5881 = vmatmul.mubr.msk.bf16.gmra.mxu0 %vm658_vm3, %v8813_v52  ;;  %v8130_v49 = vrot.slane %v3902_v33, 4  ;;  %v4420_v19 = vrot.slane %v4418_v17, 4 }
 0x142   : > { %v1088_v25 = vpop.f32.mrf.mxu1  ;;  %5884 = vmatprep.mubr.msk.bf16.mxu0 %vm658_vm3, %v8814_v50  ;;  %v3926_v3 = vor.u32 %v3925_v38, %v3922_v41  ;;  %v8139_v23 = vrot.slane %v3912_v24, 4  ;;  %v4425_v53 = vrot.slane %v8063_v32, 5  ;;  %v3936_v33 = vor.u32 %v3935_v47, %v8113_v22 }
 0x143   : > { %v8136_v6 = vadd.f32 %v5675_v10, %v1097_v16  ;;  %v1089_v2 = vadd.f32 %v1088_v25, %v7849_v26  ;;  %v1526_v61 = vpop.f32.mrf.mxu0  ;;  %v3939_v18 = vshll.u32 %v5331_v27, 16  ;;  %v3944_v40 = vshrl.u32 %v5332_v14, 16  ;;  %v8817_v10 = vld [vmem:[#allocation4_spill] sm:$0xff]  ;;  %v8818_v16 = vld [vmem:[#allocation3_spill] sm:$0xff] }
 0x144   : > { %v5644_v39 = vpop.f32.mrf.mxu1  ;;  %5847 = vmatmul.mubr.msk.bf16.gmra.mxu1 %vm658_vm3, %v7921_v48  ;;  %v3947_v41 = vshll.u32 %v5332_v14, 16  ;;  %v3953_v28 = vshll.u32 %v8134_v20, 16  ;;  %v3957_v32 = vshrl.u32 %v8134_v20, 16  ;;  %v4419_v48 = vsel %vm6353_vm7, %v5397_v51, %v4418_v17  ;;  %v8819_v17 = vld [vmem:[#allocation6_spill] sm:$0xff] }
 0x145   : > { %8815 = vst [vmem:[#allocation16_spill] sm:$0xff] %v8136_v6  ;;  %v8146_v38 = vadd.f32 %v1513_v12, %v1089_v2  ;;  %v1110_v1 = vadd.f32 %v5644_v39, %v8817_v10  ;;  %v5679_v26 = vpop.f32.mrf.mxu0  ;;  %5850 = vmatprep.mubr.msk.bf16.mxu1 %vm658_vm3, %v8000_v15  ;;  %v4422_v24 = vsel %vm6353_vm7, %v4420_v19, %v4421_v57  ;;  %v3927_v21 = vrot.slane %v3926_v3, 4 }
 0x146   : > { %v1101_v60 = vpop.f32.mrf.mxu1  ;;  %v5398_v12 = vrot.slane %v5382_v4, 9  ;;  %v4427_v25 = vrot.slane %v4425_v53, 4  ;;  %v4428_v15 = vrot.slane %v5331_v27, 5  ;;  %v3937_v2 = vrot.slane %v3936_v33, 4  ;;  %v5334_v33 = vld [vmem:[%s6023_s23 + $0xd4] sm:$0x1] }
 0x147   : > { %8816 = vst [vmem:[#allocation12_spill] sm:$0xff] %v8146_v38  ;;  %v8157_v47 = vadd.f32 %v5678_v45, %v1110_v1  ;;  %v1102_v52 = vadd.f32 %v1101_v60, %v8818_v16  ;;  %v1529_v14 = vpop.f32.mrf.mxu0  ;;  %v3941_v39 = vrot.slane %v3939_v18, 5  ;;  %v3946_v10 = vrot.slane %v3944_v40, 4  ;;  %v8821_v18 = vld [vmem:[#allocation5_spill] sm:$0xff] }
 0x148   : > { %v5645_v50 = vpop.f32.mrf.mxu1  ;;  %v3949_v38 = vrot.slane %v3947_v41, 5  ;;  %v8820_v45 = vcombine.low %v8014_v58, %v8018_v36  ;;  %v8167_v57 = vrot.slane %v3953_v28, 5  ;;  %v3959_v27 = vrot.slane %v3957_v32, 4 }
 0x149   : > { %v8160_v6 = vadd.f32 %v1526_v61, %v1102_v52  ;;  %v1113_v51 = vadd.f32 %v5645_v50, %v8819_v17  ;;  %v5682_v19 = vpop.f32.mrf.mxu0  ;;  %v3908_v61 = vsel %vm6067_vm4, %v8130_v49, %v8075_v62  ;;  %v3918_v4 = vsel %vm6067_vm4, %v8139_v23, %v8122_v35  ;;  %v5383_v62 = vld [vmem:[%s6023_s23 + $0xcc] sm:$0xe] }
 0x14a   : > { %5885 = vmatmul.mubr.msk.bf16.gmra.mxu0 %vm658_vm3, %v8820_v45  ;;  %v1104_v3 = vpop.f32.mrf.mxu1  ;;  %v4432_v58 = vrot.slane %v8134_v20, 5  ;;  %v4429_v1 = vsel %vm6353_vm7, %v4427_v25, %v4428_v15  ;;  %v5414_v35 = vcombine.low %v4419_v48, %v4422_v24  ;;  %v3932_v20 = vsel %vm6067_vm4, %v3927_v21, %v8113_v22  ;;  %v8823_v25 = vld [vmem:[#allocation10_spill] sm:$0xff] }
 0x14b   : > { %5888 = vmatprep.mubr.msk.bf16.mxu0 %vm658_vm3, %v5413_v13  ;;  %v8180_v36 = vadd.f32 %v5679_v26, %v1113_v51  ;;  %v1105_v40 = vadd.f32 %v1104_v3, %v8821_v18  ;;  %v1542_v41 = vpop.f32.mrf.mxu0  ;;  %v4426_v13 = vsel %vm6353_vm7, %v5398_v12, %v4425_v53  ;;  %v3942_v23 = vsel %vm6067_vm4, %v3937_v2, %v3941_v39  ;;  %v8822_v53 = vld [vmem:[#allocation7_spill] sm:$0xff] }
 0x14c   : > { %v5648_v49 = vpop.f32.mrf.mxu1  ;;  %5851 = vmatmul.mubr.msk.bf16.gmra.mxu1 %vm658_vm3, %v8106_v43  ;;  %v3950_v26 = vor.u32 %v3949_v38, %v3946_v10  ;;  %v3960_v12 = vor.u32 %v3959_v27, %v8167_v57  ;;  %v3963_v43 = vshll.u32 %v5334_v33, 16  ;;  %v5415_v24 = vcombine.low %v4426_v13, %v4429_v1 }
 0x14d   : > { %v8195_v28 = vadd.f32 %v1529_v14, %v1105_v40  ;;  %v1126_v32 = vadd.f32 %v5648_v49, %v8822_v53  ;;  %v5683_v60 = vpop.f32.mrf.mxu0  ;;  %5854 = vmatprep.mubr.msk.bf16.mxu1 %vm658_vm3, %v8109_v30  ;;  %v5399_v16 = vrot.slane %v5383_v62, 9  ;;  %v4434_v52 = vrot.slane %v4432_v58, 4  ;;  %v8824_v30 = vld [vmem:[#allocation13_spill] sm:$0xff] }
 0x14e   : > { %v1117_v48 = vpop.f32.mrf.mxu1  ;;  %v4435_v22 = vrot.slane %v5334_v33, 5  ;;  %v5349_v50 = vcombine.low %v3908_v61, %v3918_v4  ;;  %v5350_v2 = vcombine.low %v3932_v20, %v3942_v23  ;;  %v3951_v39 = vrot.slane %v3950_v26, 4  ;;  %v8825_v33 = vld [vmem:[#allocation15_spill] sm:$0xff]  ;;  %v8826_v62 = vld [vmem:[#allocation17_spill] sm:$0xff]  ;;  %v8827_v26 = vld [vmem:[#allocation20_spill] sm:$0xff] }
 0x14f   : > { %v8201_v21 = vadd.f32 %v5682_v19, %v1126_v32  ;;  %v1118_v38 = vadd.f32 %v1117_v48, %v8823_v25  ;;  %v1545_v14 = vpop.f32.mrf.mxu0  ;;  %v3961_v45 = vrot.slane %v3960_v12, 4  ;;  %v3965_v27 = vrot.slane %v3963_v43, 5  ;;  %v8828_v43 = vld [vmem:[#allocation22_spill] sm:$0xff] }
 0x150   : > { %v5649_v15 = vpop.f32.mrf.mxu1  ;;  %v4433_v19 = vsel %vm6353_vm7, %v5399_v16, %v4432_v58  ;;  %v4436_v61 = vsel %vm6353_vm7, %v4434_v52, %v4435_v22  ;;  %v3956_v13 = vsel %vm6067_vm4, %v3951_v39, %v8167_v57 }
 0x151   : > { %v8204_v10 = vadd.f32 %v1542_v41, %v1118_v38  ;;  %v1129_v17 = vadd.f32 %v5649_v15, %v8824_v30  ;;  %v5686_v51 = vpop.f32.mrf.mxu0  ;;  %v3966_v0 = vsel %vm6067_vm4, %v3961_v45, %v3965_v27 }
 0x152   : > { %5889 = vmatmul.mubr.msk.bf16.gmra.mxu0 %vm658_vm3, %v5414_v35  ;;  %v1120_v3 = vpop.f32.mrf.mxu1  ;;  %v5416_v35 = vcombine.low %v4433_v19, %v4436_v61  ;;  %v5351_v12 = vcombine.low %v3956_v13, %v3966_v0 }
 0x153   : > { %5892 = vmatprep.mubr.msk.bf16.mxu0 %vm658_vm3, %v5415_v24  ;;  %v8213_v4 = vadd.f32 %v5683_v60, %v1129_v17  ;;  %v1121_v18 = vadd.f32 %v1120_v3, %v8825_v33  ;;  %v1558_v40 = vpop.f32.mrf.mxu0 }
 0x154   : > { %v5652_v41 = vpop.f32.mrf.mxu1  ;;  %5855 = vmatmul.mubr.msk.bf16.gmra.mxu1 %vm658_vm3, %v5349_v50 }
 0x155   : > { %v8220_v1 = vadd.f32 %v1545_v14, %v1121_v18  ;;  %v1142_v49 = vadd.f32 %v5652_v41, %v8826_v62  ;;  %v5687_v58 = vpop.f32.mrf.mxu0  ;;  %5858 = vmatprep.mubr.msk.bf16.mxu1 %vm658_vm3, %v5350_v2 }
 0x156   : > { %v1133_v20 = vpop.f32.mrf.mxu1 }
 0x157   : > { %v8226_v23 = vadd.f32 %v5686_v51, %v1142_v49  ;;  %v1134_v53 = vadd.f32 %v1133_v20, %v8827_v26  ;;  %v1561_v32 = vpop.f32.mrf.mxu0 }
 0x158   : > { %v5653_v60 = vpop.f32.mrf.mxu1 }
 0x159   : > { %v8229_v57 = vadd.f32 %v1558_v40, %v1134_v53  ;;  %v1145_v48 = vadd.f32 %v5653_v60, %v8828_v43  ;;  %v5690_v24 = vpop.f32.mrf.mxu0 }
 0x15a   : > { %5893 = vmatmul.mubr.msk.bf16.gmra.mxu0 %vm658_vm3, %v5416_v35  ;;  %v1136_v16 = vpop.f32.mrf.mxu1 }
 0x15b   : > { %v8233_v52 = vadd.f32 %v5687_v58, %v1145_v48  ;;  %v1137_v22 = vadd.f32 %v1136_v16, %v8829_v31  ;;  %v1574_v25 = vpop.f32.mrf.mxu0 }
 0x15c   : > { %v5656_v38 = vpop.f32.mrf.mxu1  ;;  %5859 = vmatmul.mubr.msk.bf16.gmra.mxu1 %vm658_vm3, %v5351_v12 }
 0x15d   : > { %v8237_v14 = vadd.f32 %v1561_v32, %v1137_v22  ;;  %v1158_v15 = vadd.f32 %v5656_v38, %v7809_v42  ;;  %v5691_v50 = vpop.f32.mrf.mxu0 }
 0x15e   : > { %v1149_v2 = vpop.f32.mrf.mxu1 }
 0x15f   : > { %v8240_v39 = vadd.f32 %v5690_v24, %v1158_v15  ;;  %v1150_v30 = vadd.f32 %v1149_v2, %v7836_v44  ;;  %v1577_v17 = vpop.f32.mrf.mxu0 }
 0x160   : > { %v5657_v51 = vpop.f32.mrf.mxu1 }
 0x161   : > { %v8243_v45 = vadd.f32 %v1574_v25, %v1150_v30  ;;  %v1161_v27 = vadd.f32 %v5657_v51, %v7851_v8  ;;  %v5730_v3 = vpop.f32.mrf.mxu0  ;;  %v8830_v30 = vld [vmem:[#allocation11_spill] sm:$0xff] }
 0x162   : > { %v1152_v19 = vpop.f32.mrf.mxu1 }
 0x163   : > { %v8246_v61 = vadd.f32 %v5691_v50, %v1161_v27  ;;  %v1153_v33 = vadd.f32 %v1152_v19, %v7873_v55  ;;  %v2547_v18 = vpop.f32.mrf.mxu0 }
 0x164   : > { %v5696_v42 = vpop.f32.mrf.mxu1 }
 0x165   : > { %v8249_v40 = vadd.f32 %v1577_v17, %v1153_v33  ;;  %v1950_v41 = vadd.f32 %v5696_v42, %v7918_v5  ;;  %v5731_v13 = vpop.f32.mrf.mxu0 }
 0x166   : > { %v1821_v44 = vpop.f32.mrf.mxu1 }
 0x167   : > { %v8252_v62 = vadd.f32 %v5730_v3, %v1950_v41  ;;  %v1948_v49 = vadd.f32 %v1821_v44, %v7925_v37  ;;  %v2550_v58 = vpop.f32.mrf.mxu0  ;;  %v8831_v3 = vld [vmem:[#allocation8_spill] sm:$0xff] }
 0x168   : > { %v5697_v8 = vpop.f32.mrf.mxu1 }
 0x169   : > { %v8255_v0 = vadd.f32 %v2547_v18, %v1948_v49  ;;  %v1951_v35 = vadd.f32 %v5697_v8, %v7951_v54  ;;  %v5734_v20 = vpop.f32.mrf.mxu0 }
 0x16a   : > { %v1824_v55 = vpop.f32.mrf.mxu1 }
 0x16b   : > { %v8258_v26 = vadd.f32 %v5731_v13, %v1951_v35  ;;  %v1949_v53 = vadd.f32 %v1824_v55, %v7965_v11  ;;  %v2563_v32 = vpop.f32.mrf.mxu0 }
 0x16c   : > { %v5700_v5 = vpop.f32.mrf.mxu1 }
 0x16d   : > { %v8261_v60 = vadd.f32 %v2550_v58, %v1949_v53  ;;  %v1954_v12 = vadd.f32 %v5700_v5, %v7977_v29  ;;  %v5735_v43 = vpop.f32.mrf.mxu0 }
 0x16e   : > { %v1837_v37 = vpop.f32.mrf.mxu1 }
 0x16f   : > { %v8264_v48 = vadd.f32 %v5734_v20, %v1954_v12  ;;  %v1952_v24 = vadd.f32 %v1837_v37, %v7984_v9  ;;  %v2566_v16 = vpop.f32.mrf.mxu0 }
 0x170   : > { %v5701_v54 = vpop.f32.mrf.mxu1 }
 0x171   : > { %v8267_v31 = vadd.f32 %v2563_v32, %v1952_v24  ;;  %v1955_v22 = vadd.f32 %v5701_v54, %v8009_v34  ;;  %v5738_v25 = vpop.f32.mrf.mxu0  ;;  %v8833_v54 = vld [vmem:[#allocation12_spill] sm:$0xff] }
 0x172   : > { %v1840_v11 = vpop.f32.mrf.mxu1 }
 0x173   : > { %v8270_v38 = vadd.f32 %v5735_v43, %v1955_v22  ;;  %v1953_v15 = vadd.f32 %v1840_v11, %v8032_v59  ;;  %v2579_v50 = vpop.f32.mrf.mxu0  ;;  %v8832_v43 = vld [vmem:[#allocation16_spill] sm:$0xff] }
 0x174   : > { %v5704_v29 = vpop.f32.mrf.mxu1 }
 0x175   : > { %v8273_v2 = vadd.f32 %v2566_v16, %v1953_v15  ;;  %v1958_v17 = vadd.f32 %v5704_v29, %v8830_v30  ;;  %v5739_v51 = vpop.f32.mrf.mxu0 }
 0x176   : > { %v1853_v9 = vpop.f32.mrf.mxu1 }
 0x177   : > { %v8276_v27 = vadd.f32 %v5738_v25, %v1958_v17  ;;  %v1956_v19 = vadd.f32 %v1853_v9, %v8831_v3  ;;  %v2582_v33 = vpop.f32.mrf.mxu0 }
 0x178   : > { %v5705_v34 = vpop.f32.mrf.mxu1 }
 0x179   : > { %v8279_v18 = vadd.f32 %v2579_v50, %v1956_v19  ;;  %v1959_v42 = vadd.f32 %v5705_v34, %v8072_v56  ;;  %v5742_v41 = vpop.f32.mrf.mxu0 }
 0x17a   : > { %v1856_v59 = vpop.f32.mrf.mxu1 }
 0x17b   : > { %v8282_v13 = vadd.f32 %v5739_v51, %v1959_v42  ;;  %v1957_v44 = vadd.f32 %v1856_v59, %v8088_v63  ;;  %v2595_v49 = vpop.f32.mrf.mxu0 }
 0x17c   : > { %v5708_v58 = vpop.f32.mrf.mxu1 }
 0x17d   : > { %v8285_v8 = vadd.f32 %v2582_v33, %v1957_v44  ;;  %v1962_v35 = vadd.f32 %v5708_v58, %v8098_v46  ;;  %v5743_v20 = vpop.f32.mrf.mxu0 }
 0x17e   : > { %v1869_v55 = vpop.f32.mrf.mxu1 }
 0x17f   : > { %v8288_v53 = vadd.f32 %v5742_v41, %v1962_v35  ;;  %v1960_v32 = vadd.f32 %v1869_v55, %v8115_v7  ;;  %v2598_v5 = vpop.f32.mrf.mxu0 }
 0x180   : > { %v5709_v56 = vpop.f32.mrf.mxu1 }
 0x181   : > { %v8291_v12 = vadd.f32 %v2595_v49, %v1960_v32  ;;  %v1963_v37 = vadd.f32 %v5709_v56, %v8832_v43  ;;  %v5746_v24 = vpop.f32.mrf.mxu0 }
 0x182   : > { %v1872_v63 = vpop.f32.mrf.mxu1 }
 0x183   : > { %v8294_v16 = vadd.f32 %v5743_v20, %v1963_v37  ;;  %v1961_v22 = vadd.f32 %v1872_v63, %v8833_v54  ;;  %v2611_v25 = vpop.f32.mrf.mxu0 }
 0x184   : > { %v5712_v46 = vpop.f32.mrf.mxu1 }
 0x185   : > { %v8297_v11 = vadd.f32 %v2598_v5, %v1961_v22  ;;  %v1966_v15 = vadd.f32 %v5712_v46, %v8157_v47  ;;  %v5747_v50 = vpop.f32.mrf.mxu0 }
 0x186   : > { %v1885_v7 = vpop.f32.mrf.mxu1 }
 0x187   : > { %v8300_v29 = vadd.f32 %v5746_v24, %v1966_v15  ;;  %v1964_v30 = vadd.f32 %v1885_v7, %v8160_v6  ;;  %v2614_v17 = vpop.f32.mrf.mxu0 }
 0x188   : > { %v5713_v51 = vpop.f32.mrf.mxu1 }
 0x189   : > { %v8303_v9 = vadd.f32 %v2611_v25, %v1964_v30  ;;  %v1967_v3 = vadd.f32 %v5713_v51, %v8180_v36  ;;  %v5750_v19 = vpop.f32.mrf.mxu0 }
 0x18a   : > { %v1888_v33 = vpop.f32.mrf.mxu1 }
 0x18b   : > { %v8306_v34 = vadd.f32 %v5747_v50, %v1967_v3  ;;  %v1965_v42 = vadd.f32 %v1888_v33, %v8195_v28  ;;  %v2627_v41 = vpop.f32.mrf.mxu0 }
 0x18c   : > { %v5716_v47 = vpop.f32.mrf.mxu1 }
 0x18d   : > { %8834 = vst [vmem:[#allocation2_spill] sm:$0xff] %v8306_v34  ;;  %v8309_v59 = vadd.f32 %v2614_v17, %v1965_v42  ;;  %v1970_v44 = vadd.f32 %v5716_v47, %v8201_v21  ;;  %v5751_v49 = vpop.f32.mrf.mxu0 }
 0x18e   : > { %v1901_v6 = vpop.f32.mrf.mxu1 }
 0x18f   : > { %8835 = vst [vmem:[#allocation14_spill] sm:$0xff] %v8309_v59  ;;  %v8312_v58 = vadd.f32 %v5750_v19, %v1970_v44  ;;  %v1968_v35 = vadd.f32 %v1901_v6, %v8204_v10  ;;  %v2630_v20 = vpop.f32.mrf.mxu0 }
 0x190   : > { %v5717_v36 = vpop.f32.mrf.mxu1 }
 0x191   : > { %8836 = vst [vmem:[#allocation19_spill] sm:$0xff] %v8312_v58  ;;  %v8315_v55 = vadd.f32 %v2627_v41, %v1968_v35  ;;  %v1971_v32 = vadd.f32 %v5717_v36, %v8213_v4  ;;  %v5754_v5 = vpop.f32.mrf.mxu0 }
 0x192   : > { %v1904_v28 = vpop.f32.mrf.mxu1 }
 0x193   : > { %8837 = vst [vmem:[#allocation9_spill] sm:$0xff] %v8315_v55  ;;  %v8318_v56 = vadd.f32 %v5751_v49, %v1971_v32  ;;  %v1969_v43 = vadd.f32 %v1904_v28, %v8220_v1  ;;  %v2643_v37 = vpop.f32.mrf.mxu0 }
 0x194   : > { %v5720_v21 = vpop.f32.mrf.mxu1 }
 0x195   : > { %8838 = vst [vmem:[#allocation18_spill] sm:$0xff] %v8318_v56  ;;  %v8321_v24 = vadd.f32 %v2630_v20, %v1969_v43  ;;  %v1974_v63 = vadd.f32 %v5720_v21, %v8226_v23  ;;  %v5755_v54 = vpop.f32.mrf.mxu0 }
 0x196   : > { %v1917_v10 = vpop.f32.mrf.mxu1 }
 0x197   : > { %8839 = vst [vmem:[#allocation21_spill] sm:$0xff] %v8321_v24  ;;  %v8324_v22 = vadd.f32 %v5754_v5, %v1974_v63  ;;  %v1972_v25 = vadd.f32 %v1917_v10, %v8229_v57  ;;  %v2646_v46 = vpop.f32.mrf.mxu0 }
 0x198   : > { %v5721_v4 = vpop.f32.mrf.mxu1 }
 0x199   : > { %8840 = vst [vmem:[#allocation23_spill] sm:$0xff] %v8324_v22  ;;  %v8327_v15 = vadd.f32 %v2643_v37, %v1972_v25  ;;  %v1975_v50 = vadd.f32 %v5721_v4, %v8233_v52  ;;  %v5758_v7 = vpop.f32.mrf.mxu0 }
 0x19a   : > { %v1920_v1 = vpop.f32.mrf.mxu1 }
 0x19b   : > { %8841 = vst [vmem:[#allocation25_spill] sm:$0xff] %v8327_v15  ;;  %v8330_v30 = vadd.f32 %v5755_v54, %v1975_v50  ;;  %v1973_v17 = vadd.f32 %v1920_v1, %v8237_v14  ;;  %v2659_v51 = vpop.f32.mrf.mxu0 }
 0x19c   : > { %v5724_v23 = vpop.f32.mrf.mxu1 }
 0x19d   : > { %8842 = vst [vmem:[#allocation4_spill] sm:$0xff] %v8330_v30  ;;  %v8333_v3 = vadd.f32 %v2646_v46, %v1973_v17  ;;  %v1978_v19 = vadd.f32 %v5724_v23, %v8240_v39  ;;  %v5759_v33 = vpop.f32.mrf.mxu0 }
 0x19e   : > { %v1933_v57 = vpop.f32.mrf.mxu1 }
 0x19f   : > { %8843 = vst [vmem:[#allocation3_spill] sm:$0xff] %v8333_v3  ;;  %v8336_v42 = vadd.f32 %v5758_v7, %v1978_v19  ;;  %v1976_v41 = vadd.f32 %v1933_v57, %v8243_v45  ;;  %v2662_v47 = vpop.f32.mrf.mxu0 }
 0x1a0   : > { %v5725_v52 = vpop.f32.mrf.mxu1 }
 0x1a1   : > { %8844 = vst [vmem:[#allocation6_spill] sm:$0xff] %v8336_v42  ;;  %v8339_v44 = vadd.f32 %v2659_v51, %v1976_v41  ;;  %v1979_v49 = vadd.f32 %v5725_v52, %v8246_v61  ;;  %v8342_v6 = vpop.f32.mrf.mxu0 }
 0x1a2   : > { %v1936_v14 = vpop.f32.mrf.mxu1 }
 0x1a3   : > { %8845 = vst [vmem:[#allocation5_spill] sm:$0xff] %v8339_v44  ;;  %v8344_v35 = vadd.f32 %v5759_v33, %v1979_v49  ;;  %v1977_v20 = vadd.f32 %v1936_v14, %v8249_v40  ;;  %v8347_v39 = vpop.f32.mrf.mxu0 }
 0x1a4   : > { %v5764_v36 = vpop.f32.mrf.mxu1 }
 0x1a5   : > { %8846 = vst [vmem:[#allocation7_spill] sm:$0xff] %v8344_v35  ;;  %v8349_v32 = vadd.f32 %v2662_v47, %v1977_v20  ;;  %v8351_v5 = vpop.f32.mrf.mxu0 }
 0x1a6   : > { %v3017_v45 = vpop.f32.mrf.mxu1 }
 0x1a7   : > { %8847 = vst [vmem:[#allocation10_spill] sm:$0xff] %v8349_v32  ;;  %v8353_v28 = vpop.f32.mrf.mxu0 }
 0x1a8   : > { %v5765_v43 = vpop.f32.mrf.mxu1 }
 0x1a9   : > { %v8355_v37 = vpop.f32.mrf.mxu0 }
 0x1aa   : > { %v8357_v61 = vpop.f32.mrf.mxu1 }
 0x1ab   : > { %v8359_v21 = vpop.f32.mrf.mxu0 }
 0x1ac   : > { %v8361_v63 = vpop.f32.mrf.mxu1 }
 0x1ad   : > { %v8363_v40 = vpop.f32.mrf.mxu0 }
 0x1ae   : > { %v8365_v54 = vpop.f32.mrf.mxu1 }
 0x1af   : > { %v8367_v10 = vpop.f32.mrf.mxu0 }
 0x1b0   : > { %v8369_v25 = vpop.f32.mrf.mxu1 }
 0x1b1   : > { %v8371_v46 = vpop.f32.mrf.mxu0 }
 0x1b2   : > { %v8373_v4 = vpop.f32.mrf.mxu1 }
 0x1b3   : > { %v8375_v50 = vpop.f32.mrf.mxu0 }
 0x1b4   : > { %v8377_v7 = vpop.f32.mrf.mxu1 }
 0x1b5   : > { %v8379_v1 = vpop.f32.mrf.mxu0 }
 0x1b6   : > { %v8381_v17 = vpop.f32.mrf.mxu1 }
 0x1b7   : > { %v8383_v51 = vpop.f32.mrf.mxu0 }
 0x1b8   : > { %v8385_v23 = vpop.f32.mrf.mxu1 }
 0x1b9   : > { %v8387_v19 = vpop.f32.mrf.mxu0 }
 0x1ba   : > { %v8389_v33 = vpop.f32.mrf.mxu1 }
 0x1bb   : > { %v8391_v57 = vpop.f32.mrf.mxu0 }
 0x1bc   : > { %v8393_v41 = vpop.f32.mrf.mxu1 }
 0x1bd   : > { %v8395_v47 = vpop.f32.mrf.mxu0 }
 0x1be   : > { %v8397_v52 = vpop.f32.mrf.mxu1 }
 0x1bf   : > { %v8399_v49 = vpop.f32.mrf.mxu0 }
 0x1c0   : > { %v8401_v14 = vpop.f32.mrf.mxu1 }
 0x1c1   : > { %v8403_v20 = vpop.f32.mrf.mxu0 }
 0x1c2   : > { %v8405_v32 = vpop.f32.mrf.mxu1 }
 0x1c3   : > { %v8407_v35 = vpop.f32.mrf.mxu0 }
 0x1c4   : > { %8848 = vst [vmem:[#allocation13_spill] sm:$0xff] %v8407_v35  ;;  %v8409_v44 = vpop.f32.mrf.mxu1 }
 0x1c5   : > { %v8411_v42 = vpop.f32.mrf.mxu0 }
 0x1c6   : > { %8849 = vst [vmem:[#allocation15_spill] sm:$0xff] %v8411_v42  ;;  %v8413_v3 = vpop.f32.mrf.mxu1 }
 0x1c7   : > { %v8415_v30 = vpop.f32.mrf.mxu0 }
 0x1c8   : > { %8850 = vst [vmem:[#allocation17_spill] sm:$0xff] %v8415_v30  ;;  %v8417_v15 = vpop.f32.mrf.mxu1 }
 0x1c9   : > { %8851 = vst [vmem:[#allocation20_spill] sm:$0xff] %v8417_v15  ;;  %v8419_v22 = vpop.f32.mrf.mxu0 }
 0x1ca   : > { %8852 = vst [vmem:[#allocation22_spill] sm:$0xff] %v8419_v22  ;;  %v8421_v24 = vpop.f32.mrf.mxu1 }
 0x1cb   : > { %8853 = vst [vmem:[#allocation24_spill] sm:$0xff] %v8421_v24  ;;  %v8423_v56 = vpop.f32.mrf.mxu0 }
 0x1cc   : > { %8854 = vst [vmem:[#allocation11_spill] sm:$0xff] %v8423_v56  ;;  %v8425_v55 = vpop.f32.mrf.mxu1 }
 0x1cd   : > { %8855 = vst [vmem:[#allocation8_spill] sm:$0xff] %v8425_v55  ;;  %v8427_v58 = vpop.f32.mrf.mxu0 }
 0x1ce   : > { %8856 = vst [vmem:[#allocation16_spill] sm:$0xff] %v8427_v58  ;;  %v8429_v59 = vpop.f32.mrf.mxu1 }
 0x1cf   : > { %8857 = vst [vmem:[#allocation12_spill] sm:$0xff] %v8429_v59  ;;  %v8431_v35 = vpop.f32.mrf.mxu0 }
 0x1d0   : > { %8858 = vst [vmem:[#allocation26_spill] sm:$0xff] %v8431_v35  ;;  %v8433_v42 = vpop.f32.mrf.mxu1 }
 0x1d1   : > { %8859 = vst [vmem:[#allocation27_spill] sm:$0xff] %v8433_v42  ;;  %v8435_v34 = vpop.f32.mrf.mxu0 }
 0x1d2   : > { %8860 = vst [vmem:[#allocation28_spill] sm:$0xff] %v8435_v34  ;;  %v8437_v30 = vpop.f32.mrf.mxu1 }
 0x1d3   : > { %8861 = vst [vmem:[#allocation29_spill] sm:$0xff] %v8437_v30  ;;  %v8439_v15 = vpop.f32.mrf.mxu0 }
 0x1d4   : > { %8862 = vst [vmem:[#allocation30_spill] sm:$0xff] %v8439_v15  ;;  %v8441_v22 = vpop.f32.mrf.mxu1 }
 0x1d5   : > { %8863 = vst [vmem:[#allocation31_spill] sm:$0xff] %v8441_v22  ;;  %v8443_v24 = vpop.f32.mrf.mxu0 }
 0x1d6   : > { %8864 = vst [vmem:[#allocation32_spill] sm:$0xff] %v8443_v24  ;;  %v8445_v56 = vpop.f32.mrf.mxu1  ;;  %v3146_v24 = vadd.f32 %v5764_v36, %v8252_v62  ;;  %v3145_v62 = vadd.f32 %v8357_v61, %v8261_v60  ;;  %v3148_v60 = vadd.f32 %v8365_v54, %v8267_v31 }
 0x1d7   : > { %8865 = vst [vmem:[#allocation33_spill] sm:$0xff] %v8445_v56  ;;  %v8447_v55 = vpop.f32.mrf.mxu0 }
 0x1d8   : > { %8866 = vst [vmem:[#allocation34_spill] sm:$0xff] %v8447_v55  ;;  %v8449_v58 = vpop.f32.mrf.mxu1  ;;  %v3144_v55 = vadd.f32 %v3017_v45, %v8255_v0  ;;  %v8481_v0 = vld [vmem:[%s8642_s2] ss:$0 sm:$0xff]  ;;  %v3507_v54 = vadd.f32 %v8359_v21, %v3148_v60 }
 0x1d9   : > { %8867 = vst [vmem:[#allocation35_spill] sm:$0xff] %v8449_v58  ;;  %v8451_v59 = vpop.f32.mrf.mxu0 }
 0x1da   : > { %8868 = vst [vmem:[#allocation36_spill] sm:$0xff] %v8451_v59  ;;  %v8453_v35 = vpop.f32.mrf.mxu1 }
 0x1db   : > { %8869 = vst [vmem:[#allocation37_spill] sm:$0xff] %v8453_v35  ;;  %v8455_v42 = vpop.f32.mrf.mxu0 }
 0x1dc   : > { %8870 = vst [vmem:[#allocation38_spill] sm:$0xff] %v8455_v42  ;;  %v8457_v34 = vpop.f32.mrf.mxu1  ;;  %v3505_v42 = vadd.f32 %v8342_v6, %v3146_v24 }
 0x1dd   : > { %8871 = vst [vmem:[#allocation39_spill] sm:$0xff] %v8457_v34  ;;  %v8459_v30 = vpop.f32.mrf.mxu0  ;;  %v3147_v34 = vadd.f32 %v5765_v43, %v8258_v26 }
 0x1de   : > { %8872 = vst [vmem:[#allocation40_spill] sm:$0xff] %v8459_v30  ;;  %v8461_v15 = vpop.f32.mrf.mxu1 }
 0x1df   : > { %8873 = vst [vmem:[#allocation41_spill] sm:$0xff] %v8461_v15  ;;  %v8464_v22 = vpop.f32.mrf.mxu0  ;;  %v3503_v15 = vadd.f32 %v8347_v39, %v3144_v55  ;;  %v3506_v26 = vadd.f32 %v8351_v5, %v3147_v34  ;;  %v3151_v34 = vadd.f32 %v8369_v25, %v8270_v38 }
 0x1e0   : > { %8874 = vst [vmem:[#allocation42_spill] sm:$0xff] %v8464_v22  ;;  %v8466_v56 = vpop.f32.mrf.mxu1 }
 0x1e1   : > { %8875 = vst [vmem:[#allocation43_spill] sm:$0xff] %v8466_v56  ;;  %v5866_v59 = vpop.f32.mrf.mxu0  ;;  %v3150_v56 = vadd.f32 %v8361_v63, %v8264_v48 }
 0x1e2   : > { %v8469_v58 = vpop.f32.mrf.mxu1 }
 0x1e3   : > { %v4572_v35 = vpop.f32.mrf.mxu0  ;;  %v3509_v63 = vadd.f32 %v8355_v37, %v3150_v56  ;;  %v3149_v56 = vadd.f32 %v8373_v4, %v8273_v2 }
 0x1e4   : > { %v5832_v30 = vpop.f32.mrf.mxu1 }
 0x1e5   : > { %v4231_v36 = vadd.f32 %v5832_v30, %v3505_v42  ;;  %v5867_v22 = vpop.f32.mrf.mxu0  ;;  %v3504_v42 = vadd.f32 %v8353_v28, %v3145_v62 }
 0x1e6   : > { %v4102_v24 = vpop.f32.mrf.mxu1 }
 0x1e7   : > { %v4701_v6 = vadd.f32 %v5866_v59, %v4231_v36  ;;  %v4229_v45 = vadd.f32 %v4102_v24, %v3503_v15  ;;  %v4575_v55 = vpop.f32.mrf.mxu0 }
 0x1e8   : > { %v5833_v30 = vpop.f32.mrf.mxu1 }
 0x1e9   : > { %v4740_v48 = vadd.f32 %v8481_v0, %v4701_v6  ;;  %v4699_v39 = vadd.f32 %v4572_v35, %v4229_v45  ;;  %v4232_v43 = vadd.f32 %v5833_v30, %v3506_v26  ;;  %v5870_v61 = vpop.f32.mrf.mxu0  ;;  %v3510_v26 = vadd.f32 %v8363_v40, %v3151_v34 }
 0x1ea   : > { %v4105_v31 = vpop.f32.mrf.mxu1  ;;  %v3508_v30 = vadd.f32 %v8367_v10, %v3149_v56  ;;  %v3158_v56 = vadd.f32 %v8393_v41, %v8288_v53 }
 0x1eb   : > { %v4772_v59 = vmax.f32 %v4740_v48, 0.0  ;;  %v4738_v15 = vadd.f32 %v8481_v0, %v4699_v39  ;;  %v4702_v5 = vadd.f32 %v5867_v22, %v4232_v43  ;;  %v4230_v35 = vadd.f32 %v4105_v31, %v3504_v42  ;;  %v4588_v28 = vpop.f32.mrf.mxu0 }
 0x1ec   : > { %v5836_v38 = vpop.f32.mrf.mxu1  ;;  %v3154_v22 = vadd.f32 %v8377_v7, %v8276_v27 }
 0x1ed   : > { %4804 = vst [vmem:[%s8495_s15 + $0x10] sm:$0xff] %v4772_v59  ;;  %v4770_v37 = vmax.f32 %v4738_v15, 0.0  ;;  %v4741_v25 = vadd.f32 %v8481_v0, %v4702_v5  ;;  %v4700_v62 = vadd.f32 %v4575_v55, %v4230_v35  ;;  %v4235_v36 = vadd.f32 %v5836_v38, %v3509_v63  ;;  %v5871_v24 = vpop.f32.mrf.mxu0 }
 0x1ee   : > { %v4118_v6 = vpop.f32.mrf.mxu1  ;;  %v3152_v55 = vadd.f32 %v8381_v17, %v8279_v18  ;;  %v3513_v43 = vadd.f32 %v8371_v46, %v3154_v22  ;;  %v3153_v15 = vadd.f32 %v8389_v33, %v8285_v8 }
 0x1ef   : > { %4802 = vst [vmem:[%s8495_s15] sm:$0xff] %v4770_v37  ;;  %v4773_v21 = vmax.f32 %v4741_v25, 0.0  ;;  %v4739_v45 = vadd.f32 %v8481_v0, %v4700_v62  ;;  %v4705_v2 = vadd.f32 %v5870_v61, %v4235_v36  ;;  %v4233_v4 = vadd.f32 %v4118_v6, %v3507_v54  ;;  %v4591_v60 = vpop.f32.mrf.mxu0 }
 0x1f0   : > { %v5837_v42 = vpop.f32.mrf.mxu1  ;;  %v3155_v61 = vadd.f32 %v8385_v23, %v8282_v13  ;;  %v3511_v59 = vadd.f32 %v8375_v50, %v3152_v55  ;;  %v3512_v62 = vadd.f32 %v8383_v51, %v3153_v15  ;;  %v3156_v36 = vadd.f32 %v8397_v52, %v8291_v12 }
 0x1f1   : > { %4805 = vst [vmem:[%s8495_s15 + $0x18] sm:$0xff] %v4773_v21  ;;  %v4771_v40 = vmax.f32 %v4739_v45, 0.0  ;;  %v4744_v48 = vadd.f32 %v8481_v0, %v4705_v2  ;;  %v4703_v27 = vadd.f32 %v4588_v28, %v4233_v4  ;;  %v4236_v7 = vadd.f32 %v5837_v42, %v3510_v26  ;;  %v5874_v39 = vpop.f32.mrf.mxu0 }
 0x1f2   : > { %v4121_v63 = vpop.f32.mrf.mxu1  ;;  %v3514_v54 = vadd.f32 %v8379_v1, %v3155_v61  ;;  %v3517_v6 = vadd.f32 %v8387_v19, %v3158_v56  ;;  %v3159_v21 = vadd.f32 %v8401_v14, %v8294_v16 }
 0x1f3   : > { %4803 = vst [vmem:[%s8495_s15 + $0x8] sm:$0xff] %v4771_v40  ;;  %v4776_v10 = vmax.f32 %v4744_v48, 0.0  ;;  %v4742_v34 = vadd.f32 %v8481_v0, %v4703_v27  ;;  %v4706_v18 = vadd.f32 %v5871_v24, %v4236_v7  ;;  %v4234_v17 = vadd.f32 %v4121_v63, %v3508_v30  ;;  %v4604_v31 = vpop.f32.mrf.mxu0 }
 0x1f4   : > { %v5840_v5 = vpop.f32.mrf.mxu1  ;;  %v3157_v30 = vadd.f32 %v8405_v32, %v8297_v11  ;;  %v3518_v48 = vadd.f32 %v8395_v47, %v3159_v21  ;;  %v3162_v27 = vadd.f32 %v8409_v44, %v8300_v29  ;;  %v3160_v63 = vadd.f32 %v8413_v3, %v8303_v9 }
 0x1f5   : > { %4808 = vst [vmem:[%s8495_s15 + $0x30] sm:$0xff] %v4776_v10  ;;  %v4774_v46 = vmax.f32 %v4742_v34, 0.0  ;;  %v4745_v35 = vadd.f32 %v8481_v0, %v4706_v18  ;;  %v4704_v13 = vadd.f32 %v4591_v60, %v4234_v17  ;;  %v4239_v23 = vadd.f32 %v5840_v5, %v3513_v43  ;;  %v5875_v28 = vpop.f32.mrf.mxu0 }
 0x1f6   : > { %v4134_v38 = vpop.f32.mrf.mxu1  ;;  %v3515_v60 = vadd.f32 %v8391_v57, %v3156_v36  ;;  %v3516_v61 = vadd.f32 %v8399_v49, %v3157_v30  ;;  %v3521_v17 = vadd.f32 %v8403_v20, %v3162_v27  ;;  %v8882_v36 = vld [vmem:[#allocation19_spill] sm:$0xff] }
 0x1f7   : > { %4806 = vst [vmem:[%s8495_s15 + $0x20] sm:$0xff] %v4774_v46  ;;  %v4777_v50 = vmax.f32 %v4745_v35, 0.0  ;;  %v4743_v37 = vadd.f32 %v8481_v0, %v4704_v13  ;;  %v4709_v8 = vadd.f32 %v5874_v39, %v4239_v23  ;;  %v4237_v33 = vadd.f32 %v4134_v38, %v3511_v59  ;;  %v4607_v25 = vpop.f32.mrf.mxu0  ;;  %v8877_v59 = vld [vmem:[#allocation20_spill] sm:$0xff]  ;;  %v8878_v13 = vld [vmem:[#allocation13_spill] sm:$0xff] }
 0x1f8   : > { %v5841_v24 = vpop.f32.mrf.mxu1  ;;  %v3519_v23 = vadd.f32 %v8878_v13, %v3160_v63 }
 0x1f9   : > { %4809 = vst [vmem:[%s8495_s15 + $0x38] sm:$0xff] %v4777_v50  ;;  %v4775_v1 = vmax.f32 %v4743_v37, 0.0  ;;  %v4748_v26 = vadd.f32 %v8481_v0, %v4709_v8  ;;  %v4707_v53 = vadd.f32 %v4604_v31, %v4237_v33  ;;  %v4240_v41 = vadd.f32 %v5841_v24, %v3514_v54  ;;  %v5878_v22 = vpop.f32.mrf.mxu0  ;;  %v8876_v31 = vld [vmem:[#allocation2_spill] sm:$0xff]  ;;  %v8880_v54 = vld [vmem:[#allocation24_spill] sm:$0xff] }
 0x1fa   : > { %v4137_v45 = vpop.f32.mrf.mxu1  ;;  %v3163_v15 = vadd.f32 %v8877_v59, %v8876_v31  ;;  %v8883_v24 = vld [vmem:[#allocation8_spill] sm:$0xff] }
 0x1fb   : > { %4807 = vst [vmem:[%s8495_s15 + $0x28] sm:$0xff] %v4775_v1  ;;  %v4780_v51 = vmax.f32 %v4748_v26, 0.0  ;;  %v4746_v2 = vadd.f32 %v8481_v0, %v4707_v53  ;;  %v4710_v12 = vadd.f32 %v5875_v28, %v4240_v41  ;;  %v4238_v52 = vadd.f32 %v4137_v45, %v3512_v62  ;;  %v4620_v4 = vpop.f32.mrf.mxu0  ;;  %v8879_v28 = vld [vmem:[#allocation14_spill] sm:$0xff]  ;;  %v8884_v45 = vld [vmem:[#allocation17_spill] sm:$0xff] }
 0x1fc   : > { %v5844_v55 = vpop.f32.mrf.mxu1  ;;  %v3161_v56 = vadd.f32 %v8880_v54, %v8879_v28  ;;  %v3166_v1 = vadd.f32 %v8883_v24, %v8882_v36 }
 0x1fd   : > { %4812 = vst [vmem:[%s8495_s15 + $0x50] sm:$0xff] %v4780_v51  ;;  %v4778_v19 = vmax.f32 %v4746_v2, 0.0  ;;  %v4749_v42 = vadd.f32 %v8481_v0, %v4710_v12  ;;  %v4708_v16 = vadd.f32 %v4607_v25, %v4238_v52  ;;  %v4243_v14 = vadd.f32 %v5844_v55, %v3517_v6  ;;  %v5879_v40 = vpop.f32.mrf.mxu0  ;;  %v8881_v25 = vld [vmem:[#allocation15_spill] sm:$0xff]  ;;  %v8885_v2 = vld [vmem:[#allocation9_spill] sm:$0xff]  ;;  %v8886_v12 = vld [vmem:[#allocation12_spill] sm:$0xff] }
 0x1fe   : > { %v4150_v7 = vpop.f32.mrf.mxu1  ;;  %v3522_v62 = vadd.f32 %v8881_v25, %v3163_v15  ;;  %v3520_v51 = vadd.f32 %v8884_v45, %v3161_v56  ;;  %v3164_v52 = vadd.f32 %v8886_v12, %v8885_v2  ;;  %v8893_v15 = vld [vmem:[#allocation16_spill] sm:$0xff]  ;;  %v8896_v56 = vld [vmem:[#allocation26_spill] sm:$0xff] }
 0x1ff   : > { %4810 = vst [vmem:[%s8495_s15 + $0x40] sm:$0xff] %v4778_v19  ;;  %v4781_v57 = vmax.f32 %v4749_v42, 0.0  ;;  %v4747_v39 = vadd.f32 %v8481_v0, %v4708_v16  ;;  %v4713_v11 = vadd.f32 %v5878_v22, %v4243_v14  ;;  %v4241_v32 = vadd.f32 %v4150_v7, %v3515_v60  ;;  %v4623_v43 = vpop.f32.mrf.mxu0  ;;  %v8887_v16 = vld [vmem:[#allocation22_spill] sm:$0xff] }
 0x200   : > { %v5845_v10 = vpop.f32.mrf.mxu1  ;;  %v3525_v14 = vadd.f32 %v8887_v16, %v3166_v1  ;;  %v8899_v1 = vld [vmem:[#allocation28_spill] sm:$0xff] }
 0x201   : > { %4813 = vst [vmem:[%s8495_s15 + $0x58] sm:$0xff] %v4781_v57  ;;  %v4779_v47 = vmax.f32 %v4747_v39, 0.0  ;;  %v4752_v34 = vadd.f32 %v8481_v0, %v4713_v11  ;;  %v4711_v29 = vadd.f32 %v4620_v4, %v4241_v32  ;;  %v4244_v44 = vadd.f32 %v5845_v10, %v3518_v48  ;;  %v5882_v18 = vpop.f32.mrf.mxu0  ;;  %v8889_v48 = vld [vmem:[#allocation27_spill] sm:$0xff]  ;;  %v8891_v10 = vld [vmem:[#allocation21_spill] sm:$0xff] }
 0x202   : > { %v4153_v5 = vpop.f32.mrf.mxu1 }
 0x203   : > { %4811 = vst [vmem:[%s8495_s15 + $0x48] sm:$0xff] %v4779_v47  ;;  %v4784_v49 = vmax.f32 %v4752_v34, 0.0  ;;  %v4750_v46 = vadd.f32 %v8481_v0, %v4711_v29  ;;  %v4714_v9 = vadd.f32 %v5879_v40, %v4244_v44  ;;  %v4242_v3 = vadd.f32 %v4153_v5, %v3516_v61  ;;  %v4636_v35 = vpop.f32.mrf.mxu0  ;;  %v8888_v40 = vld [vmem:[#allocation18_spill] sm:$0xff]  ;;  %v8890_v61 = vld [vmem:[#allocation11_spill] sm:$0xff]  ;;  %v8892_v47 = vld [vmem:[#allocation29_spill] sm:$0xff] }
 0x204   : > { %v5848_v38 = vpop.f32.mrf.mxu1  ;;  %v3167_v27 = vadd.f32 %v8889_v48, %v8888_v40  ;;  %v3523_v63 = vadd.f32 %v8890_v61, %v3164_v52  ;;  %v3165_v34 = vadd.f32 %v8892_v47, %v8891_v10  ;;  %v8902_v52 = vld [vmem:[#allocation30_spill] sm:$0xff] }
 0x205   : > { %4816 = vst [vmem:[%s8495_s15 + $0x70] sm:$0xff] %v4784_v49  ;;  %v4782_v20 = vmax.f32 %v4750_v46, 0.0  ;;  %v4753_v50 = vadd.f32 %v8481_v0, %v4714_v9  ;;  %v4712_v37 = vadd.f32 %v4623_v43, %v4242_v3  ;;  %v4247_v8 = vadd.f32 %v5848_v38, %v3521_v17  ;;  %v5883_v33 = vpop.f32.mrf.mxu0  ;;  %v8894_v49 = vld [vmem:[#allocation23_spill] sm:$0xff] }
 0x206   : > { %v4166_v26 = vpop.f32.mrf.mxu1  ;;  %v3526_v5 = vadd.f32 %v8893_v15, %v3167_v27  ;;  %v8895_v46 = vld [vmem:[#allocation31_spill] sm:$0xff]  ;;  %v3524_v38 = vadd.f32 %v8896_v56, %v3165_v34  ;;  %v8905_v27 = vld [vmem:[#allocation32_spill] sm:$0xff]  ;;  %v8908_v34 = vld [vmem:[#allocation34_spill] sm:$0xff] }
 0x207   : > { %4814 = vst [vmem:[%s8495_s15 + $0x60] sm:$0xff] %v4782_v20  ;;  %v4785_v53 = vmax.f32 %v4753_v50, 0.0  ;;  %v4751_v41 = vadd.f32 %v8481_v0, %v4712_v37  ;;  %v4717_v22 = vadd.f32 %v5882_v18, %v4247_v8  ;;  %v4245_v6 = vadd.f32 %v4166_v26, %v3519_v23  ;;  %v4639_v21 = vpop.f32.mrf.mxu0  ;;  %v8897_v20 = vld [vmem:[#allocation25_spill] sm:$0xff] }
 0x208   : > { %v5849_v4 = vpop.f32.mrf.mxu1  ;;  %v3170_v9 = vadd.f32 %v8895_v46, %v8894_v49  ;;  %v8898_v50 = vld [vmem:[#allocation33_spill] sm:$0xff] }
 0x209   : > { %4817 = vst [vmem:[%s8495_s15 + $0x78] sm:$0xff] %v4785_v53  ;;  %v4783_v60 = vmax.f32 %v4751_v41, 0.0  ;;  %v4756_v30 = vadd.f32 %v8481_v0, %v4717_v22  ;;  %v4715_v55 = vadd.f32 %v4636_v35, %v4245_v6  ;;  %v4248_v19 = vadd.f32 %v5849_v4, %v3522_v62  ;;  %v8900_v53 = vld [vmem:[#allocation4_spill] sm:$0xff]  ;;  %v8901_v41 = vld [vmem:[#allocation35_spill] sm:$0xff] }
 0x20a   : > { %v5886_v42 = vpop.f32.mrf.mxu0  ;;  %v4169_v7 = vpop.f32.mrf.mxu1  ;;  %v3168_v37 = vadd.f32 %v8898_v50, %v8897_v20  ;;  %v3529_v26 = vadd.f32 %v8899_v1, %v3170_v9  ;;  %v3171_v22 = vadd.f32 %v8901_v41, %v8900_v53  ;;  %v8911_v9 = vld [vmem:[#allocation36_spill] sm:$0xff]  ;;  %v8914_v50 = vld [vmem:[#allocation38_spill] sm:$0xff] }
 0x20b   : > { %4815 = vst [vmem:[%s8495_s15 + $0x68] sm:$0xff] %v4783_v60  ;;  %v4788_v57 = vmax.f32 %v4756_v30, 0.0  ;;  %v4754_v39 = vadd.f32 %v8481_v0, %v4715_v55  ;;  %v4718_v11 = vadd.f32 %v5883_v33, %v4248_v19  ;;  %v4246_v32 = vadd.f32 %v4169_v7, %v3520_v51  ;;  %v8903_v60 = vld [vmem:[#allocation3_spill] sm:$0xff]  ;;  %v8904_v30 = vld [vmem:[#allocation37_spill] sm:$0xff]  ;;  %v8916_v53 = vld [vmem:[#allocation40_spill] sm:$0xff] }
 0x20c   : > { %v4652_v43 = vpop.f32.mrf.mxu0  ;;  %v5852_v29 = vpop.f32.mrf.mxu1  ;;  %v3527_v4 = vadd.f32 %v8902_v52, %v3168_v37  ;;  %v3169_v55 = vadd.f32 %v8904_v30, %v8903_v60  ;;  %v3530_v7 = vadd.f32 %v8905_v27, %v3171_v22 }
 0x20d   : > { %4820 = vst [vmem:[%s8495_s15 + $0x90] sm:$0xff] %v4788_v57  ;;  %v4786_v44 = vmax.f32 %v4754_v39, 0.0  ;;  %v4757_v18 = vadd.f32 %v8481_v0, %v4718_v11  ;;  %v4716_v17 = vadd.f32 %v4639_v21, %v4246_v32  ;;  %v4251_v31 = vadd.f32 %v5852_v29, %v3525_v14  ;;  %v8906_v57 = vld [vmem:[#allocation6_spill] sm:$0xff]  ;;  %v8907_v39 = vld [vmem:[#allocation39_spill] sm:$0xff] }
 0x20e   : > { %v5887_v59 = vpop.f32.mrf.mxu0  ;;  %v4182_v3 = vpop.f32.mrf.mxu1  ;;  %v3174_v11 = vadd.f32 %v8907_v39, %v8906_v57  ;;  %v3528_v29 = vadd.f32 %v8908_v34, %v3169_v55 }
 0x20f   : > { %4818 = vst [vmem:[%s8495_s15 + $0x80] sm:$0xff] %v4786_v44  ;;  %v4789_v35 = vmax.f32 %v4757_v18, 0.0  ;;  %v4755_v13 = vadd.f32 %v8481_v0, %v4716_v17  ;;  %v4721_v23 = vadd.f32 %v5886_v42, %v4251_v31  ;;  %v4249_v28 = vadd.f32 %v4182_v3, %v3523_v63  ;;  %v8909_v44 = vld [vmem:[#allocation5_spill] sm:$0xff] }
 0x210   : > { %v4655_v54 = vpop.f32.mrf.mxu0  ;;  %v5853_v8 = vpop.f32.mrf.mxu1  ;;  %v8910_v18 = vld [vmem:[#allocation41_spill] sm:$0xff]  ;;  %v3533_v3 = vadd.f32 %v8911_v9, %v3174_v11 }
 0x211   : > { %4821 = vst [vmem:[%s8495_s15 + $0x98] sm:$0xff] %v4789_v35  ;;  %v4787_v33 = vmax.f32 %v4755_v13, 0.0  ;;  %v4760_v25 = vadd.f32 %v8481_v0, %v4721_v23  ;;  %v4719_v62 = vadd.f32 %v4652_v43, %v4249_v28  ;;  %v4252_v36 = vadd.f32 %v5853_v8, %v3526_v5  ;;  %v8912_v35 = vld [vmem:[#allocation7_spill] sm:$0xff]  ;;  %v8915_v8 = vld [vmem:[#allocation10_spill] sm:$0xff] }
 0x212   : > { %v5890_v24 = vpop.f32.mrf.mxu0  ;;  %v4185_v6 = vpop.f32.mrf.mxu1  ;;  %v3172_v17 = vadd.f32 %v8910_v18, %v8909_v44  ;;  %v8913_v13 = vld [vmem:[#allocation43_spill] sm:$0xff] }
 0x213   : > { %4819 = vst [vmem:[%s8495_s15 + $0x88] sm:$0xff] %v4787_v33  ;;  %v4792_v21 = vmax.f32 %v4760_v25, 0.0  ;;  %v4758_v45 = vadd.f32 %v8481_v0, %v4719_v62  ;;  %v4722_v51 = vadd.f32 %v5887_v59, %v4252_v36  ;;  %v4250_v2 = vadd.f32 %v4185_v6, %v3524_v38 }
 0x214   : > { %v4668_v12 = vpop.f32.mrf.mxu0  ;;  %v5856_v19 = vpop.f32.mrf.mxu1  ;;  %v3175_v23 = vadd.f32 %v8913_v13, %v8912_v35  ;;  %v3531_v37 = vadd.f32 %v8914_v50, %v3172_v17  ;;  %v3173_v33 = vadd.f32 %v8469_v58, %v8915_v8  ;;  %v8917_v58 = vld [vmem:[#allocation42_spill] sm:$0xff] }
 0x215   : > { %4824 = vst [vmem:[%s8495_s15 + $0xb0] sm:$0xff] %v4792_v21  ;;  %v4790_v42 = vmax.f32 %v4758_v45, 0.0  ;;  %v4761_v16 = vadd.f32 %v8481_v0, %v4722_v51  ;;  %v4720_v14 = vadd.f32 %v4655_v54, %v4250_v2  ;;  %v4255_v40 = vadd.f32 %v5856_v19, %v3529_v26 }
 0x216   : > { %v5891_v48 = vpop.f32.mrf.mxu0  ;;  %v4198_v32 = vpop.f32.mrf.mxu1  ;;  %v3534_v41 = vadd.f32 %v8916_v53, %v3175_v23  ;;  %v3532_v2 = vadd.f32 %v8917_v58, %v3173_v33 }
 0x217   : > { %4822 = vst [vmem:[%s8495_s15 + $0xa0] sm:$0xff] %v4790_v42  ;;  %v4793_v43 = vmax.f32 %v4761_v16, 0.0  ;;  %v4759_v61 = vadd.f32 %v8481_v0, %v4720_v14  ;;  %v4725_v63 = vadd.f32 %v5890_v24, %v4255_v40  ;;  %v4253_v10 = vadd.f32 %v4198_v32, %v3527_v4 }
 0x218   : > { %v4671_v47 = vpop.f32.mrf.mxu0  ;;  %v5857_v31 = vpop.f32.mrf.mxu1 }
 0x219   : > { %4825 = vst [vmem:[%s8495_s15 + $0xb8] sm:$0xff] %v4793_v43  ;;  %v4791_v59 = vmax.f32 %v4759_v61, 0.0  ;;  %v4764_v15 = vadd.f32 %v8481_v0, %v4725_v63  ;;  %v4723_v5 = vadd.f32 %v4668_v12, %v4253_v10  ;;  %v4256_v49 = vadd.f32 %v5857_v31, %v3530_v7 }
 0x21a   : > { %v5894_v46 = vpop.f32.mrf.mxu0  ;;  %v4201_v28 = vpop.f32.mrf.mxu1 }
 0x21b   : > { %4823 = vst [vmem:[%s8495_s15 + $0xa8] sm:$0xff] %v4791_v59  ;;  %v4796_v54 = vmax.f32 %v4764_v15, 0.0  ;;  %v4762_v56 = vadd.f32 %v8481_v0, %v4723_v5  ;;  %v4726_v38 = vadd.f32 %v5891_v48, %v4256_v49  ;;  %v4254_v20 = vadd.f32 %v4201_v28, %v3528_v29 }
 0x21c   : > { %v5860_v25 = vpop.f32.mrf.mxu1  ;;  %v4684_v62 = vpop.f32.mrf.mxu0 }
 0x21d   : > { %4828 = vst [vmem:[%s8495_s15 + $0xd0] sm:$0xff] %v4796_v54  ;;  %v4794_v36 = vmax.f32 %v4762_v56, 0.0  ;;  %v4765_v24 = vadd.f32 %v8481_v0, %v4726_v38  ;;  %v4724_v1 = vadd.f32 %v4671_v47, %v4254_v20  ;;  %v4259_v26 = vadd.f32 %v5860_v25, %v3533_v3 }
 0x21e   : > { %v4214_v22 = vpop.f32.mrf.mxu1  ;;  %v5895_v52 = vpop.f32.mrf.mxu0 }
 0x21f   : > { %4826 = vst [vmem:[%s8495_s15 + $0xc0] sm:$0xff] %v4794_v36  ;;  %v4797_v6 = vmax.f32 %v4765_v24, 0.0  ;;  %v4763_v21 = vadd.f32 %v8481_v0, %v4724_v1  ;;  %v4729_v45 = vadd.f32 %v5894_v46, %v4259_v26  ;;  %v4257_v51 = vadd.f32 %v4214_v22, %v3531_v37 }
 0x220   : > { %v5861_v12 = vpop.f32.mrf.mxu1  ;;  %v4687_v48 = vpop.f32.mrf.mxu0 }
 0x221   : > { %4829 = vst [vmem:[%s8495_s15 + $0xd8] sm:$0xff] %v4797_v6  ;;  %v4795_v4 = vmax.f32 %v4763_v21, 0.0  ;;  %v4768_v60 = vadd.f32 %v8481_v0, %v4729_v45  ;;  %v4727_v30 = vadd.f32 %v4684_v62, %v4257_v51  ;;  %v4260_v55 = vadd.f32 %v5861_v12, %v3534_v41 }
 0x222   : > { %v4217_v19 = vpop.f32.mrf.mxu1 }
 0x223   : > { %4827 = vst [vmem:[%s8495_s15 + $0xc8] sm:$0xff] %v4795_v4  ;;  %v4800_v42 = vmax.f32 %v4768_v60, 0.0  ;;  %v4766_v16 = vadd.f32 %v8481_v0, %v4727_v30  ;;  %v4730_v14 = vadd.f32 %v5895_v52, %v4260_v55  ;;  %v4258_v40 = vadd.f32 %v4217_v19, %v3532_v2 }
 0x225   : > { %4832 = vst [vmem:[%s8495_s15 + $0xf0] sm:$0xff] %v4800_v42  ;;  %v4798_v27 = vmax.f32 %v4766_v16, 0.0  ;;  %v4769_v7 = vadd.f32 %v8481_v0, %v4730_v14  ;;  %v4728_v57 = vadd.f32 %v4687_v48, %v4258_v40 }
 0x227   : > { %4830 = vst [vmem:[%s8495_s15 + $0xe0] sm:$0xff] %v4798_v27  ;;  %v4801_v39 = vmax.f32 %v4769_v7, 0.0  ;;  %v4767_v11 = vadd.f32 %v8481_v0, %v4728_v57 }
 0x229   : > { %4833 = vst [vmem:[%s8495_s15 + $0xf8] sm:$0xff] %v4801_v39  ;;  %v4799_v32 = vmax.f32 %v4767_v11, 0.0 }
 0x22b   : > { %4831 = vst [vmem:[%s8495_s15 + $0xe8] sm:$0xff] %v4799_v32 }
 0x22c PF: > { %s13_s12 = sadd.s32 1, %s5973_s12  }
 0x22d   : > { %p10_p4 = scmp.ge.s32.totalorder %s13_s12, 4  }
 0x22f   :  { %12 = sbr.rel (!%p10_p4) target bundleno = 1 (0x1), region = 72 }

</bundles_post_ra>
